<compile_context>
chip_gen: v7x
topology: tpu7x:2x2x1
jax: 0.10.0
libtpu: 0.0.40
codegen_flags: <defaults>
</compile_context>

<pallas_src>
import jax
import jax.numpy as jnp
from jax import lax
from jax.experimental import pallas as pl
from jax.experimental.pallas import tpu as pltpu


def bilstm_kernel(ids_ref, wfold_f_ref, whh_f_ref, b_f_ref,
                  wfold_b_ref, b_b_ref,
                  wfc_f_ref, wfc_b_ref, bfc_ref,
                  out_ref, gx_ref):
    TB, G = gx_ref.shape                 # (T*Bt, 4*Hp)
    Bt = out_ref.shape[0]                # batch tile (sublane multiple)
    T = TB // Bt
    Hp = G // 4
    Vp = wfold_f_ref.shape[0]            # padded vocab (multiple of 128)

    # ---- one-hot token selection over the padded vocab (exact gather) ----
    ids = ids_ref[...]                                             # (T*Bt, 1) int32
    lane = lax.broadcasted_iota(jnp.int32, (TB, Vp), 1)
    onehot = (lane == ids).astype(jnp.float32)                     # (T*Bt, Vp)

    # ---- folded input projection: table already folded into W_ih (wrapper) ----
    gx_ref[...] = (jnp.dot(onehot, wfold_f_ref[...],
                           preferred_element_type=jnp.float32)
                   + b_f_ref[...])                                 # (T*Bt, 4*Hp)

    def gate_math(gi, gf, gg, go, c):
        i = jax.nn.sigmoid(gi)
        f = jax.nn.sigmoid(gf)
        o = jax.nn.sigmoid(go)
        g = jnp.tanh(gg)
        c_new = f * c + i * g
        h_new = o * jnp.tanh(c_new)
        return h_new, c_new

    zeros = jnp.zeros((Bt, Hp), jnp.float32)

    # ---- reverse direction: exactly one step on x[:, -1] from a zero state ----
    # (h0 == 0 so h0 @ W_hh_b is identically zero and is skipped entirely.)
    gxb = (jnp.dot(onehot[(T - 1) * Bt:, :], wfold_b_ref[...],
                   preferred_element_type=jnp.float32)
           + b_b_ref[...])
    h_bwd, _ = gate_math(gxb[:, 0 * Hp:1 * Hp], gxb[:, 1 * Hp:2 * Hp],
                         gxb[:, 2 * Hp:3 * Hp], gxb[:, 3 * Hp:4 * Hp], zeros)

    # ---- forward direction: full recurrence, fully unrolled ----
    # Per-gate 128-lane dots, weights re-indexed from VMEM inside the step.
    def step(t, carry):
        h, c = carry
        row = pl.multiple_of(t * Bt, 8)
        gx = gx_ref[pl.ds(row, Bt), :]
        gi = gx[:, 0 * Hp:1 * Hp] + jnp.dot(h, whh_f_ref[:, 0 * Hp:1 * Hp],
                                            preferred_element_type=jnp.float32)
        gf = gx[:, 1 * Hp:2 * Hp] + jnp.dot(h, whh_f_ref[:, 1 * Hp:2 * Hp],
                                            preferred_element_type=jnp.float32)
        gg = gx[:, 2 * Hp:3 * Hp] + jnp.dot(h, whh_f_ref[:, 2 * Hp:3 * Hp],
                                            preferred_element_type=jnp.float32)
        go = gx[:, 3 * Hp:4 * Hp] + jnp.dot(h, whh_f_ref[:, 3 * Hp:4 * Hp],
                                            preferred_element_type=jnp.float32)
        return gate_math(gi, gf, gg, go, c)

    h_fwd, _ = lax.fori_loop(0, T, step, (zeros, zeros), unroll=True)

    # ---- fc on concat(h_fwd, h_bwd), computed as a split (no lane concat) ----
    out = (jnp.dot(h_fwd, wfc_f_ref[...], preferred_element_type=jnp.float32)
           + jnp.dot(h_bwd, wfc_b_ref[...], preferred_element_type=jnp.float32)
           + bfc_ref[...])
    out_ref[...] = out.astype(out_ref.dtype)


def _pad_gate_cols(w, H, Hp):
    """(in_dim, 4H) -> (in_dim, 4Hp): PyTorch gate block g placed at lanes g*Hp."""
    out = jnp.zeros((w.shape[0], 4 * Hp), jnp.float32)
    for g in range(4):
        out = out.at[:, g * Hp:g * Hp + H].set(w[:, g * H:(g + 1) * H])
    return out


def make_kernel_params(embeddings, w_ih_f, w_hh_f, b_ih_f, b_hh_f,
                       w_ih_b, w_hh_b, b_ih_b, b_hh_b, fc_w, fc_b,
                       hidden_dim, Hp=128, lane=128):
    del w_hh_b  # unused: reverse direction is a single step from a zero state
    H = hidden_dim
    O = fc_w.shape[0]
    Op = ((O + lane - 1) // lane) * lane
    vocab, _ = embeddings.shape
    Vp = ((vocab + lane - 1) // lane) * lane
    hi = lax.Precision.HIGHEST

    table = embeddings.astype(jnp.float32)
    wih_f = _pad_gate_cols(w_ih_f.T.astype(jnp.float32), H, Hp)      # (E, 4Hp)
    wih_b = _pad_gate_cols(w_ih_b.T.astype(jnp.float32), H, Hp)      # (E, 4Hp)

    # Fold the frozen embedding table into the input projections (HIGHEST
    # precision so the re-association stays inside the 1e-5 tolerance), and
    # pad the vocab dimension to a lane multiple (pad rows never selected).
    wfold_f = jnp.zeros((Vp, 4 * Hp), jnp.float32).at[:vocab].set(
        jnp.dot(table, wih_f, precision=hi))
    wfold_b = jnp.zeros((Vp, 4 * Hp), jnp.float32).at[:vocab].set(
        jnp.dot(table, wih_b, precision=hi))

    whh_f = jnp.zeros((Hp, 4 * Hp), jnp.float32).at[:H, :].set(
        _pad_gate_cols(w_hh_f.T.astype(jnp.float32), H, Hp))         # (Hp, 4Hp)

    # Pad columns/biases are exactly zero -> gate pads give i=f=o=0.5, g=0, so
    # c_pad and h_pad stay exactly 0 through the recurrence.
    b_f = _pad_gate_cols((b_ih_f + b_hh_f).reshape(1, 4 * H).astype(jnp.float32), H, Hp)
    b_b = _pad_gate_cols((b_ih_b + b_hh_b).reshape(1, 4 * H).astype(jnp.float32), H, Hp)

    fc_t = fc_w.T.astype(jnp.float32)                                # (2H, O)
    w_fc_f = jnp.zeros((Hp, Op), jnp.float32).at[:H, :O].set(fc_t[:H])
    w_fc_b = jnp.zeros((Hp, Op), jnp.float32).at[:H, :O].set(fc_t[H:])
    b_fc = jnp.zeros((1, Op), jnp.float32).at[0, :O].set(fc_b.astype(jnp.float32))

    return {
        "wfold_f": wfold_f, "whh_f": whh_f, "b_f": b_f,
        "wfold_b": wfold_b, "b_b": b_b,
        "w_fc_f": w_fc_f, "w_fc_b": w_fc_b, "b_fc": b_fc,
        "out_dim": O,
    }


def bilstm_forward(x_ids, params, batch_tile=8):
    """x_ids: (B, T) int token ids. Returns (B, O) float32 logits."""
    B, T = x_ids.shape
    Op = params["b_fc"].shape[-1]
    Hp = params["whh_f"].shape[0]
    Bt = batch_tile
    Bp = max(Bt, ((B + Bt - 1) // Bt) * Bt)
    nb = Bp // Bt

    # token ids, batch padded with token 0, laid out batch-tile-major
    # (time-major within each tile) so each grid step sees a contiguous block.
    ids = jnp.zeros((T, Bp), jnp.int32).at[:, :B].set(x_ids.T.astype(jnp.int32))
    ids = ids.reshape(T, nb, Bt).transpose(1, 0, 2).reshape(nb * T * Bt, 1)

    def full_spec(a):
        return pl.BlockSpec(a.shape, lambda i, _nd=a.ndim: (0,) * _nd)

    weight_args = (params["wfold_f"], params["whh_f"], params["b_f"],
                   params["wfold_b"], params["b_b"],
                   params["w_fc_f"], params["w_fc_b"], params["b_fc"])

    grid_spec = pltpu.PrefetchScalarGridSpec(
        num_scalar_prefetch=0,
        grid=(nb,),
        in_specs=[pl.BlockSpec((T * Bt, 1), lambda i: (i, 0))]
                 + [full_spec(a) for a in weight_args],
        out_specs=pl.BlockSpec((Bt, Op), lambda i: (i, 0)),
        scratch_shapes=[pltpu.VMEM((T * Bt, 4 * Hp), jnp.float32)],
    )
    out = pl.pallas_call(
        bilstm_kernel,
        out_shape=jax.ShapeDtypeStruct((Bp, Op), jnp.float32),
        grid_spec=grid_spec,
        compiler_params=pltpu.CompilerParams(
            dimension_semantics=("parallel",)),
    )(ids, *weight_args)
    return out[:B, :params["out_dim"]]


def reference_forward(x_ids, embeddings, pt_params, hidden_dim):
    """Pure-JAX replica of the PyTorch forward (full bi-LSTM, then slice)."""
    hi = lax.Precision.HIGHEST
    emb = embeddings[x_ids]  # (B, T, E)

    def cell(x_t, h, c, w_ih, w_hh, b_ih, b_hh):
        g = (jnp.dot(x_t, w_ih.T, precision=hi) + b_ih
             + jnp.dot(h, w_hh.T, precision=hi) + b_hh)
        H = hidden_dim
        i = jax.nn.sigmoid(g[:, 0:H])
        f = jax.nn.sigmoid(g[:, H:2 * H])
        gg = jnp.tanh(g[:, 2 * H:3 * H])
        o = jax.nn.sigmoid(g[:, 3 * H:4 * H])
        c = f * c + i * gg
        h = o * jnp.tanh(c)
        return h, c

    B, T, E = emb.shape
    h0 = jnp.zeros((B, hidden_dim), jnp.float32)
    c0 = jnp.zeros((B, hidden_dim), jnp.float32)

    def run(seq_tbd, w_ih, w_hh, b_ih, b_hh):
        def scan_step(carry, x_t):
            h, c = carry
            h, c = cell(x_t, h, c, w_ih, w_hh, b_ih, b_hh)
            return (h, c), h
        _, hs = lax.scan(scan_step, (h0, c0), seq_tbd)
        return hs  # (T, B, H)

    seq = jnp.transpose(emb, (1, 0, 2))                     # (T, B, E)
    hs_f = run(seq, *pt_params["fwd"])                      # forward direction
    hs_b = run(seq[::-1], *pt_params["bwd"])[::-1]          # reverse direction
    out = jnp.concatenate([hs_f, hs_b], axis=-1)            # (T, B, 2H)
    last = out[-1]                                          # (B, 2H)
    return jnp.dot(last, pt_params["fc_w"].T, precision=hi) + pt_params["fc_b"]


if __name__ == "__main__":
    vocab_size, embed_dim, hidden_dim, output_size = 50, 32, 32, 4
    B, T = 2, 8

    key = jax.random.PRNGKey(0)
    ks = jax.random.split(key, 12)
    s = 0.1

    # Deterministic synthetic parameters (PyTorch native layouts).
    embeddings = jax.random.normal(ks[0], (vocab_size, embed_dim), jnp.float32) * s
    w_ih_f = jax.random.normal(ks[1], (4 * hidden_dim, embed_dim), jnp.float32) * s
    w_hh_f = jax.random.normal(ks[2], (4 * hidden_dim, hidden_dim), jnp.float32) * s
    b_ih_f = jax.random.normal(ks[3], (4 * hidden_dim,), jnp.float32) * s
    b_hh_f = jax.random.normal(ks[4], (4 * hidden_dim,), jnp.float32) * s
    w_ih_b = jax.random.normal(ks[5], (4 * hidden_dim, embed_dim), jnp.float32) * s
    w_hh_b = jax.random.normal(ks[6], (4 * hidden_dim, hidden_dim), jnp.float32) * s
    b_ih_b = jax.random.normal(ks[7], (4 * hidden_dim,), jnp.float32) * s
    b_hh_b = jax.random.normal(ks[8], (4 * hidden_dim,), jnp.float32) * s
    fc_w = jax.random.normal(ks[9], (output_size, 2 * hidden_dim), jnp.float32) * s
    fc_b = jax.random.normal(ks[10], (output_size,), jnp.float32) * s

    # Token ids (the module input x is (B, T) integer indices).
    x_ids = jax.random.randint(ks[11], (B, T), 0, vocab_size, dtype=jnp.int32)

    kernel_params = make_kernel_params(
        embeddings, w_ih_f, w_hh_f, b_ih_f, b_hh_f,
        w_ih_b, w_hh_b, b_ih_b, b_hh_b, fc_w, fc_b, hidden_dim)

    out = bilstm_forward(x_ids, kernel_params)
    out = jax.block_until_ready(out)

    # Independent pure-JAX reference (full bidirectional output, then slice).
    ref_params = {
        "fwd": (w_ih_f, w_hh_f, b_ih_f, b_hh_f),
        "bwd": (w_ih_b, w_hh_b, b_ih_b, b_hh_b),
        "fc_w": fc_w, "fc_b": fc_b,
    }
    ref = reference_forward(x_ids, embeddings, ref_params, hidden_dim)

    assert out.shape == (B, output_size)
    assert jnp.allclose(out, ref, atol=1e-5, rtol=1e-5), (out, ref)
    print("KERNEL_OK")
</pallas_src>

<mosaic_0001>
module attributes {stable_mosaic.version = 11 : i64} {
  func.func @bilstm_kernel(%arg0: i32, %arg1: memref<64x1xi32, #tpu.memory_space<vmem>>, %arg2: memref<128x512xf32, #tpu.memory_space<vmem>>, %arg3: memref<128x512xf32, #tpu.memory_space<vmem>>, %arg4: memref<1x512xf32, #tpu.memory_space<vmem>>, %arg5: memref<128x512xf32, #tpu.memory_space<vmem>>, %arg6: memref<1x512xf32, #tpu.memory_space<vmem>>, %arg7: memref<128x128xf32, #tpu.memory_space<vmem>>, %arg8: memref<128x128xf32, #tpu.memory_space<vmem>>, %arg9: memref<1x128xf32, #tpu.memory_space<vmem>>, %arg10: memref<8x128xf32, #tpu.memory_space<vmem>>, %arg11: memref<64x512xf32, #tpu.memory_space<vmem>>) attributes {dimension_semantics = [#tpu.dimension_semantics<parallel>], iteration_bounds = array<i64: 1>, scalar_prefetch = 0 : i64, scratch_operands = 1 : i64, tpu.core_type = #tpu.core_type<tc>, window_params = [{transform_indices = @transform_0, window_bounds = array<i64: 64, 1>}, {pipeline_mode = #tpu.pipeline_mode<synchronous>, transform_indices = @transform_1, window_bounds = array<i64: 128, 512>}, {pipeline_mode = #tpu.pipeline_mode<synchronous>, transform_indices = @transform_2, window_bounds = array<i64: 128, 512>}, {pipeline_mode = #tpu.pipeline_mode<synchronous>, transform_indices = @transform_3, window_bounds = array<i64: 1, 512>}, {pipeline_mode = #tpu.pipeline_mode<synchronous>, transform_indices = @transform_4, window_bounds = array<i64: 128, 512>}, {pipeline_mode = #tpu.pipeline_mode<synchronous>, transform_indices = @transform_5, window_bounds = array<i64: 1, 512>}, {pipeline_mode = #tpu.pipeline_mode<synchronous>, transform_indices = @transform_6, window_bounds = array<i64: 128, 128>}, {pipeline_mode = #tpu.pipeline_mode<synchronous>, transform_indices = @transform_7, window_bounds = array<i64: 128, 128>}, {pipeline_mode = #tpu.pipeline_mode<synchronous>, transform_indices = @transform_8, window_bounds = array<i64: 1, 128>}, {transform_indices = @transform_9, window_bounds = array<i64: 8, 128>}]} {
    %c0 = arith.constant 0 : index
    %c0_0 = arith.constant 0 : index
    %0 = vector.load %arg1[%c0, %c0_0] : memref<64x1xi32, #tpu.memory_space<vmem>>, vector<64x1xi32>
    %1 = tpu.iota {dimensions = array<i32: 1>} : vector<64x128xi32>
    %2 = vector.broadcast %0 : vector<64x1xi32> to vector<64x128xi32>
    %3 = arith.cmpi eq, %1, %2 : vector<64x128xi32>
    %4 = arith.extui %3 : vector<64x128xi1> to vector<64x128xi32>
    %5 = arith.sitofp %4 : vector<64x128xi32> to vector<64x128xf32>
    %c0_1 = arith.constant 0 : index
    %c0_2 = arith.constant 0 : index
    %6 = vector.load %arg2[%c0_1, %c0_2] : memref<128x512xf32, #tpu.memory_space<vmem>>, vector<128x512xf32>
    %cst = arith.constant dense<0.000000e+00> : vector<64x512xf32>
    %7 = tpu.matmul %5, %6, %cst {dimension_numbers = #tpu.dot_dimension_numbers<[1], [0], [0], [1], [0, 0, 1, 1], [], []>} : vector<64x128xf32>, vector<128x512xf32>, vector<64x512xf32> -> vector<64x512xf32>
    %c0_3 = arith.constant 0 : index
    %c0_4 = arith.constant 0 : index
    %8 = vector.load %arg4[%c0_3, %c0_4] : memref<1x512xf32, #tpu.memory_space<vmem>>, vector<1x512xf32>
    %9 = vector.broadcast %8 : vector<1x512xf32> to vector<64x512xf32>
    %10 = arith.addf %7, %9 : vector<64x512xf32>
    %c0_5 = arith.constant 0 : index
    %c0_6 = arith.constant 0 : index
    %11 = vector.load %arg11[%c0_5, %c0_6] : memref<64x512xf32, #tpu.memory_space<vmem>>, vector<64x512xf32>
    tpu.vector_store %arg11[%c0_5, %c0_6], %10 {strides = array<i32>} : memref<64x512xf32, #tpu.memory_space<vmem>>, vector<64x512xf32>,
    %cst_7 = arith.constant 0.000000e+00 : f32
    %12 = vector.broadcast %cst_7 : f32 to vector<8x128xf32>
    %13 = vector.extract_strided_slice %5 {offsets = [56, 0], sizes = [8, 128], strides = [1, 1]} : vector<64x128xf32> to vector<8x128xf32>
    %c0_8 = arith.constant 0 : index
    %c0_9 = arith.constant 0 : index
    %14 = vector.load %arg5[%c0_8, %c0_9] : memref<128x512xf32, #tpu.memory_space<vmem>>, vector<128x512xf32>
    %cst_10 = arith.constant dense<0.000000e+00> : vector<8x512xf32>
    %15 = tpu.matmul %13, %14, %cst_10 {dimension_numbers = #tpu.dot_dimension_numbers<[1], [0], [0], [1], [0, 0, 1, 1], [], []>} : vector<8x128xf32>, vector<128x512xf32>, vector<8x512xf32> -> vector<8x512xf32>
    %c0_11 = arith.constant 0 : index
    %c0_12 = arith.constant 0 : index
    %16 = vector.load %arg6[%c0_11, %c0_12] : memref<1x512xf32, #tpu.memory_space<vmem>>, vector<1x512xf32>
    %17 = vector.broadcast %16 : vector<1x512xf32> to vector<8x512xf32>
    %18 = arith.addf %15, %17 : vector<8x512xf32>
    %19 = vector.extract_strided_slice %18 {offsets = [0, 0], sizes = [8, 128], strides = [1, 1]} : vector<8x512xf32> to vector<8x128xf32>
    %20 = vector.extract_strided_slice %18 {offsets = [0, 128], sizes = [8, 128], strides = [1, 1]} : vector<8x512xf32> to vector<8x128xf32>
    %21 = vector.extract_strided_slice %18 {offsets = [0, 256], sizes = [8, 128], strides = [1, 1]} : vector<8x512xf32> to vector<8x128xf32>
    %22 = vector.extract_strided_slice %18 {offsets = [0, 384], sizes = [8, 128], strides = [1, 1]} : vector<8x512xf32> to vector<8x128xf32>
    %23 = arith.negf %19 : vector<8x128xf32>
    %24 = math.exp %23 : vector<8x128xf32>
    %cst_13 = arith.constant 1.000000e+00 : f32
    %25 = vector.broadcast %cst_13 : f32 to vector<8x128xf32>
    %26 = arith.addf %25, %24 : vector<8x128xf32>
    %27 = arith.divf %25, %26 : vector<8x128xf32>
    %28 = arith.negf %20 : vector<8x128xf32>
    %29 = math.exp %28 : vector<8x128xf32>
    %cst_14 = arith.constant 1.000000e+00 : f32
    %30 = vector.broadcast %cst_14 : f32 to vector<8x128xf32>
    %31 = arith.addf %30, %29 : vector<8x128xf32>
    %32 = arith.divf %30, %31 : vector<8x128xf32>
    %33 = arith.negf %22 : vector<8x128xf32>
    %34 = math.exp %33 : vector<8x128xf32>
    %cst_15 = arith.constant 1.000000e+00 : f32
    %35 = vector.broadcast %cst_15 : f32 to vector<8x128xf32>
    %36 = arith.addf %35, %34 : vector<8x128xf32>
    %37 = arith.divf %35, %36 : vector<8x128xf32>
    %38 = math.tanh %21 : vector<8x128xf32>
    %39 = arith.mulf %32, %12 : vector<8x128xf32>
    %40 = arith.mulf %27, %38 : vector<8x128xf32>
    %41 = arith.addf %39, %40 : vector<8x128xf32>
    %42 = math.tanh %41 : vector<8x128xf32>
    %43 = arith.mulf %37, %42 : vector<8x128xf32>
    %c0_i32 = arith.constant 0 : i32
    %c8_i32 = arith.constant 8 : i32
    %44 = arith.muli %c0_i32, %c8_i32 : i32
    %45 = tpu.assume_multiple %44, 8 : i32
    %46 = arith.index_cast %45 : i32 to index
    %c0_16 = arith.constant 0 : index
    %47 = vector.load %arg11[%46, %c0_16] : memref<64x512xf32, #tpu.memory_space<vmem>>, vector<8x512xf32>
    %48 = vector.extract_strided_slice %47 {offsets = [0, 0], sizes = [8, 128], strides = [1, 1]} : vector<8x512xf32> to vector<8x128xf32>
    %c0_17 = arith.constant 0 : index
    %c0_18 = arith.constant 0 : index
    %49 = vector.load %arg3[%c0_17, %c0_18] : memref<128x512xf32, #tpu.memory_space<vmem>>, vector<128x128xf32>
    %cst_19 = arith.constant dense<0.000000e+00> : vector<8x128xf32>
    %50 = tpu.matmul %12, %49, %cst_19 {dimension_numbers = #tpu.dot_dimension_numbers<[1], [0], [0], [1], [0, 0, 1, 1], [], []>} : vector<8x128xf32>, vector<128x128xf32>, vector<8x128xf32> -> vector<8x128xf32>
    %51 = arith.addf %48, %50 : vector<8x128xf32>
    %52 = vector.extract_strided_slice %47 {offsets = [0, 128], sizes = [8, 128], strides = [1, 1]} : vector<8x512xf32> to vector<8x128xf32>
    %c0_20 = arith.constant 0 : index
    %c128 = arith.constant 128 : index
    %53 = vector.load %arg3[%c0_20, %c128] : memref<128x512xf32, #tpu.memory_space<vmem>>, vector<128x128xf32>
    %cst_21 = arith.constant dense<0.000000e+00> : vector<8x128xf32>
    %54 = tpu.matmul %12, %53, %cst_21 {dimension_numbers = #tpu.dot_dimension_numbers<[1], [0], [0], [1], [0, 0, 1, 1], [], []>} : vector<8x128xf32>, vector<128x128xf32>, vector<8x128xf32> -> vector<8x128xf32>
    %55 = arith.addf %52, %54 : vector<8x128xf32>
    %56 = vector.extract_strided_slice %47 {offsets = [0, 256], sizes = [8, 128], strides = [1, 1]} : vector<8x512xf32> to vector<8x128xf32>
    %c0_22 = arith.constant 0 : index
    %c256 = arith.constant 256 : index
    %57 = vector.load %arg3[%c0_22, %c256] : memref<128x512xf32, #tpu.memory_space<vmem>>, vector<128x128xf32>
    %cst_23 = arith.constant dense<0.000000e+00> : vector<8x128xf32>
    %58 = tpu.matmul %12, %57, %cst_23 {dimension_numbers = #tpu.dot_dimension_numbers<[1], [0], [0], [1], [0, 0, 1, 1], [], []>} : vector<8x128xf32>, vector<128x128xf32>, vector<8x128xf32> -> vector<8x128xf32>
    %59 = arith.addf %56, %58 : vector<8x128xf32>
    %60 = vector.extract_strided_slice %47 {offsets = [0, 384], sizes = [8, 128], strides = [1, 1]} : vector<8x512xf32> to vector<8x128xf32>
    %c0_24 = arith.constant 0 : index
    %c384 = arith.constant 384 : index
    %61 = vector.load %arg3[%c0_24, %c384] : memref<128x512xf32, #tpu.memory_space<vmem>>, vector<128x128xf32>
    %cst_25 = arith.constant dense<0.000000e+00> : vector<8x128xf32>
    %62 = tpu.matmul %12, %61, %cst_25 {dimension_numbers = #tpu.dot_dimension_numbers<[1], [0], [0], [1], [0, 0, 1, 1], [], []>} : vector<8x128xf32>, vector<128x128xf32>, vector<8x128xf32> -> vector<8x128xf32>
    %63 = arith.addf %60, %62 : vector<8x128xf32>
    %64 = arith.negf %51 : vector<8x128xf32>
    %65 = math.exp %64 : vector<8x128xf32>
    %cst_26 = arith.constant 1.000000e+00 : f32
    %66 = vector.broadcast %cst_26 : f32 to vector<8x128xf32>
    %67 = arith.addf %66, %65 : vector<8x128xf32>
    %68 = arith.divf %66, %67 : vector<8x128xf32>
    %69 = arith.negf %55 : vector<8x128xf32>
    %70 = math.exp %69 : vector<8x128xf32>
    %cst_27 = arith.constant 1.000000e+00 : f32
    %71 = vector.broadcast %cst_27 : f32 to vector<8x128xf32>
    %72 = arith.addf %71, %70 : vector<8x128xf32>
    %73 = arith.divf %71, %72 : vector<8x128xf32>
    %74 = arith.negf %63 : vector<8x128xf32>
    %75 = math.exp %74 : vector<8x128xf32>
    %cst_28 = arith.constant 1.000000e+00 : f32
    %76 = vector.broadcast %cst_28 : f32 to vector<8x128xf32>
    %77 = arith.addf %76, %75 : vector<8x128xf32>
    %78 = arith.divf %76, %77 : vector<8x128xf32>
    %79 = math.tanh %59 : vector<8x128xf32>
    %80 = arith.mulf %73, %12 : vector<8x128xf32>
    %81 = arith.mulf %68, %79 : vector<8x128xf32>
    %82 = arith.addf %80, %81 : vector<8x128xf32>
    %83 = math.tanh %82 : vector<8x128xf32>
    %84 = arith.mulf %78, %83 : vector<8x128xf32>
    %c1_i32 = arith.constant 1 : i32
    %c8_i32_29 = arith.constant 8 : i32
    %85 = arith.muli %c1_i32, %c8_i32_29 : i32
    %86 = tpu.assume_multiple %85, 8 : i32
    %87 = arith.index_cast %86 : i32 to index
    %c0_30 = arith.constant 0 : index
    %88 = vector.load %arg11[%87, %c0_30] : memref<64x512xf32, #tpu.memory_space<vmem>>, vector<8x512xf32>
    %89 = vector.extract_strided_slice %88 {offsets = [0, 0], sizes = [8, 128], strides = [1, 1]} : vector<8x512xf32> to vector<8x128xf32>
    %c0_31 = arith.constant 0 : index
    %c0_32 = arith.constant 0 : index
    %90 = vector.load %arg3[%c0_31, %c0_32] : memref<128x512xf32, #tpu.memory_space<vmem>>, vector<128x128xf32>
    %cst_33 = arith.constant dense<0.000000e+00> : vector<8x128xf32>
    %91 = tpu.matmul %84, %90, %cst_33 {dimension_numbers = #tpu.dot_dimension_numbers<[1], [0], [0], [1], [0, 0, 1, 1], [], []>} : vector<8x128xf32>, vector<128x128xf32>, vector<8x128xf32> -> vector<8x128xf32>
    %92 = arith.addf %89, %91 : vector<8x128xf32>
    %93 = vector.extract_strided_slice %88 {offsets = [0, 128], sizes = [8, 128], strides = [1, 1]} : vector<8x512xf32> to vector<8x128xf32>
    %c0_34 = arith.constant 0 : index
    %c128_35 = arith.constant 128 : index
    %94 = vector.load %arg3[%c0_34, %c128_35] : memref<128x512xf32, #tpu.memory_space<vmem>>, vector<128x128xf32>
    %cst_36 = arith.constant dense<0.000000e+00> : vector<8x128xf32>
    %95 = tpu.matmul %84, %94, %cst_36 {dimension_numbers = #tpu.dot_dimension_numbers<[1], [0], [0], [1], [0, 0, 1, 1], [], []>} : vector<8x128xf32>, vector<128x128xf32>, vector<8x128xf32> -> vector<8x128xf32>
    %96 = arith.addf %93, %95 : vector<8x128xf32>
    %97 = vector.extract_strided_slice %88 {offsets = [0, 256], sizes = [8, 128], strides = [1, 1]} : vector<8x512xf32> to vector<8x128xf32>
    %c0_37 = arith.constant 0 : index
    %c256_38 = arith.constant 256 : index
    %98 = vector.load %arg3[%c0_37, %c256_38] : memref<128x512xf32, #tpu.memory_space<vmem>>, vector<128x128xf32>
    %cst_39 = arith.constant dense<0.000000e+00> : vector<8x128xf32>
    %99 = tpu.matmul %84, %98, %cst_39 {dimension_numbers = #tpu.dot_dimension_numbers<[1], [0], [0], [1], [0, 0, 1, 1], [], []>} : vector<8x128xf32>, vector<128x128xf32>, vector<8x128xf32> -> vector<8x128xf32>
    %100 = arith.addf %97, %99 : vector<8x128xf32>
    %101 = vector.extract_strided_slice %88 {offsets = [0, 384], sizes = [8, 128], strides = [1, 1]} : vector<8x512xf32> to vector<8x128xf32>
    %c0_40 = arith.constant 0 : index
    %c384_41 = arith.constant 384 : index
    %102 = vector.load %arg3[%c0_40, %c384_41] : memref<128x512xf32, #tpu.memory_space<vmem>>, vector<128x128xf32>
    %cst_42 = arith.constant dense<0.000000e+00> : vector<8x128xf32>
    %103 = tpu.matmul %84, %102, %cst_42 {dimension_numbers = #tpu.dot_dimension_numbers<[1], [0], [0], [1], [0, 0, 1, 1], [], []>} : vector<8x128xf32>, vector<128x128xf32>, vector<8x128xf32> -> vector<8x128xf32>
    %104 = arith.addf %101, %103 : vector<8x128xf32>
    %105 = arith.negf %92 : vector<8x128xf32>
    %106 = math.exp %105 : vector<8x128xf32>
    %cst_43 = arith.constant 1.000000e+00 : f32
    %107 = vector.broadcast %cst_43 : f32 to vector<8x128xf32>
    %108 = arith.addf %107, %106 : vector<8x128xf32>
    %109 = arith.divf %107, %108 : vector<8x128xf32>
    %110 = arith.negf %96 : vector<8x128xf32>
    %111 = math.exp %110 : vector<8x128xf32>
    %cst_44 = arith.constant 1.000000e+00 : f32
    %112 = vector.broadcast %cst_44 : f32 to vector<8x128xf32>
    %113 = arith.addf %112, %111 : vector<8x128xf32>
    %114 = arith.divf %112, %113 : vector<8x128xf32>
    %115 = arith.negf %104 : vector<8x128xf32>
    %116 = math.exp %115 : vector<8x128xf32>
    %cst_45 = arith.constant 1.000000e+00 : f32
    %117 = vector.broadcast %cst_45 : f32 to vector<8x128xf32>
    %118 = arith.addf %117, %116 : vector<8x128xf32>
    %119 = arith.divf %117, %118 : vector<8x128xf32>
    %120 = math.tanh %100 : vector<8x128xf32>
    %121 = arith.mulf %114, %82 : vector<8x128xf32>
    %122 = arith.mulf %109, %120 : vector<8x128xf32>
    %123 = arith.addf %121, %122 : vector<8x128xf32>
    %124 = math.tanh %123 : vector<8x128xf32>
    %125 = arith.mulf %119, %124 : vector<8x128xf32>
    %c2_i32 = arith.constant 2 : i32
    %c8_i32_46 = arith.constant 8 : i32
    %126 = arith.muli %c2_i32, %c8_i32_46 : i32
    %127 = tpu.assume_multiple %126, 8 : i32
    %128 = arith.index_cast %127 : i32 to index
    %c0_47 = arith.constant 0 : index
    %129 = vector.load %arg11[%128, %c0_47] : memref<64x512xf32, #tpu.memory_space<vmem>>, vector<8x512xf32>
    %130 = vector.extract_strided_slice %129 {offsets = [0, 0], sizes = [8, 128], strides = [1, 1]} : vector<8x512xf32> to vector<8x128xf32>
    %c0_48 = arith.constant 0 : index
    %c0_49 = arith.constant 0 : index
    %131 = vector.load %arg3[%c0_48, %c0_49] : memref<128x512xf32, #tpu.memory_space<vmem>>, vector<128x128xf32>
    %cst_50 = arith.constant dense<0.000000e+00> : vector<8x128xf32>
    %132 = tpu.matmul %125, %131, %cst_50 {dimension_numbers = #tpu.dot_dimension_numbers<[1], [0], [0], [1], [0, 0, 1, 1], [], []>} : vector<8x128xf32>, vector<128x128xf32>, vector<8x128xf32> -> vector<8x128xf32>
    %133 = arith.addf %130, %132 : vector<8x128xf32>
    %134 = vector.extract_strided_slice %129 {offsets = [0, 128], sizes = [8, 128], strides = [1, 1]} : vector<8x512xf32> to vector<8x128xf32>
    %c0_51 = arith.constant 0 : index
    %c128_52 = arith.constant 128 : index
    %135 = vector.load %arg3[%c0_51, %c128_52] : memref<128x512xf32, #tpu.memory_space<vmem>>, vector<128x128xf32>
    %cst_53 = arith.constant dense<0.000000e+00> : vector<8x128xf32>
    %136 = tpu.matmul %125, %135, %cst_53 {dimension_numbers = #tpu.dot_dimension_numbers<[1], [0], [0], [1], [0, 0, 1, 1], [], []>} : vector<8x128xf32>, vector<128x128xf32>, vector<8x128xf32> -> vector<8x128xf32>
    %137 = arith.addf %134, %136 : vector<8x128xf32>
    %138 = vector.extract_strided_slice %129 {offsets = [0, 256], sizes = [8, 128], strides = [1, 1]} : vector<8x512xf32> to vector<8x128xf32>
    %c0_54 = arith.constant 0 : index
    %c256_55 = arith.constant 256 : index
    %139 = vector.load %arg3[%c0_54, %c256_55] : memref<128x512xf32, #tpu.memory_space<vmem>>, vector<128x128xf32>
    %cst_56 = arith.constant dense<0.000000e+00> : vector<8x128xf32>
    %140 = tpu.matmul %125, %139, %cst_56 {dimension_numbers = #tpu.dot_dimension_numbers<[1], [0], [0], [1], [0, 0, 1, 1], [], []>} : vector<8x128xf32>, vector<128x128xf32>, vector<8x128xf32> -> vector<8x128xf32>
    %141 = arith.addf %138, %140 : vector<8x128xf32>
    %142 = vector.extract_strided_slice %129 {offsets = [0, 384], sizes = [8, 128], strides = [1, 1]} : vector<8x512xf32> to vector<8x128xf32>
    %c0_57 = arith.constant 0 : index
    %c384_58 = arith.constant 384 : index
    %143 = vector.load %arg3[%c0_57, %c384_58] : memref<128x512xf32, #tpu.memory_space<vmem>>, vector<128x128xf32>
    %cst_59 = arith.constant dense<0.000000e+00> : vector<8x128xf32>
    %144 = tpu.matmul %125, %143, %cst_59 {dimension_numbers = #tpu.dot_dimension_numbers<[1], [0], [0], [1], [0, 0, 1, 1], [], []>} : vector<8x128xf32>, vector<128x128xf32>, vector<8x128xf32> -> vector<8x128xf32>
    %145 = arith.addf %142, %144 : vector<8x128xf32>
    %146 = arith.negf %133 : vector<8x128xf32>
    %147 = math.exp %146 : vector<8x128xf32>
    %cst_60 = arith.constant 1.000000e+00 : f32
    %148 = vector.broadcast %cst_60 : f32 to vector<8x128xf32>
    %149 = arith.addf %148, %147 : vector<8x128xf32>
    %150 = arith.divf %148, %149 : vector<8x128xf32>
    %151 = arith.negf %137 : vector<8x128xf32>
    %152 = math.exp %151 : vector<8x128xf32>
    %cst_61 = arith.constant 1.000000e+00 : f32
    %153 = vector.broadcast %cst_61 : f32 to vector<8x128xf32>
    %154 = arith.addf %153, %152 : vector<8x128xf32>
    %155 = arith.divf %153, %154 : vector<8x128xf32>
    %156 = arith.negf %145 : vector<8x128xf32>
    %157 = math.exp %156 : vector<8x128xf32>
    %cst_62 = arith.constant 1.000000e+00 : f32
    %158 = vector.broadcast %cst_62 : f32 to vector<8x128xf32>
    %159 = arith.addf %158, %157 : vector<8x128xf32>
    %160 = arith.divf %158, %159 : vector<8x128xf32>
    %161 = math.tanh %141 : vector<8x128xf32>
    %162 = arith.mulf %155, %123 : vector<8x128xf32>
    %163 = arith.mulf %150, %161 : vector<8x128xf32>
    %164 = arith.addf %162, %163 : vector<8x128xf32>
    %165 = math.tanh %164 : vector<8x128xf32>
    %166 = arith.mulf %160, %165 : vector<8x128xf32>
    %c3_i32 = arith.constant 3 : i32
    %c8_i32_63 = arith.constant 8 : i32
    %167 = arith.muli %c3_i32, %c8_i32_63 : i32
    %168 = tpu.assume_multiple %167, 8 : i32
    %169 = arith.index_cast %168 : i32 to index
    %c0_64 = arith.constant 0 : index
    %170 = vector.load %arg11[%169, %c0_64] : memref<64x512xf32, #tpu.memory_space<vmem>>, vector<8x512xf32>
    %171 = vector.extract_strided_slice %170 {offsets = [0, 0], sizes = [8, 128], strides = [1, 1]} : vector<8x512xf32> to vector<8x128xf32>
    %c0_65 = arith.constant 0 : index
    %c0_66 = arith.constant 0 : index
    %172 = vector.load %arg3[%c0_65, %c0_66] : memref<128x512xf32, #tpu.memory_space<vmem>>, vector<128x128xf32>
    %cst_67 = arith.constant dense<0.000000e+00> : vector<8x128xf32>
    %173 = tpu.matmul %166, %172, %cst_67 {dimension_numbers = #tpu.dot_dimension_numbers<[1], [0], [0], [1], [0, 0, 1, 1], [], []>} : vector<8x128xf32>, vector<128x128xf32>, vector<8x128xf32> -> vector<8x128xf32>
    %174 = arith.addf %171, %173 : vector<8x128xf32>
    %175 = vector.extract_strided_slice %170 {offsets = [0, 128], sizes = [8, 128], strides = [1, 1]} : vector<8x512xf32> to vector<8x128xf32>
    %c0_68 = arith.constant 0 : index
    %c128_69 = arith.constant 128 : index
    %176 = vector.load %arg3[%c0_68, %c128_69] : memref<128x512xf32, #tpu.memory_space<vmem>>, vector<128x128xf32>
    %cst_70 = arith.constant dense<0.000000e+00> : vector<8x128xf32>
    %177 = tpu.matmul %166, %176, %cst_70 {dimension_numbers = #tpu.dot_dimension_numbers<[1], [0], [0], [1], [0, 0, 1, 1], [], []>} : vector<8x128xf32>, vector<128x128xf32>, vector<8x128xf32> -> vector<8x128xf32>
    %178 = arith.addf %175, %177 : vector<8x128xf32>
    %179 = vector.extract_strided_slice %170 {offsets = [0, 256], sizes = [8, 128], strides = [1, 1]} : vector<8x512xf32> to vector<8x128xf32>
    %c0_71 = arith.constant 0 : index
    %c256_72 = arith.constant 256 : index
    %180 = vector.load %arg3[%c0_71, %c256_72] : memref<128x512xf32, #tpu.memory_space<vmem>>, vector<128x128xf32>
    %cst_73 = arith.constant dense<0.000000e+00> : vector<8x128xf32>
    %181 = tpu.matmul %166, %180, %cst_73 {dimension_numbers = #tpu.dot_dimension_numbers<[1], [0], [0], [1], [0, 0, 1, 1], [], []>} : vector<8x128xf32>, vector<128x128xf32>, vector<8x128xf32> -> vector<8x128xf32>
    %182 = arith.addf %179, %181 : vector<8x128xf32>
    %183 = vector.extract_strided_slice %170 {offsets = [0, 384], sizes = [8, 128], strides = [1, 1]} : vector<8x512xf32> to vector<8x128xf32>
    %c0_74 = arith.constant 0 : index
    %c384_75 = arith.constant 384 : index
    %184 = vector.load %arg3[%c0_74, %c384_75] : memref<128x512xf32, #tpu.memory_space<vmem>>, vector<128x128xf32>
    %cst_76 = arith.constant dense<0.000000e+00> : vector<8x128xf32>
    %185 = tpu.matmul %166, %184, %cst_76 {dimension_numbers = #tpu.dot_dimension_numbers<[1], [0], [0], [1], [0, 0, 1, 1], [], []>} : vector<8x128xf32>, vector<128x128xf32>, vector<8x128xf32> -> vector<8x128xf32>
    %186 = arith.addf %183, %185 : vector<8x128xf32>
    %187 = arith.negf %174 : vector<8x128xf32>
    %188 = math.exp %187 : vector<8x128xf32>
    %cst_77 = arith.constant 1.000000e+00 : f32
    %189 = vector.broadcast %cst_77 : f32 to vector<8x128xf32>
    %190 = arith.addf %189, %188 : vector<8x128xf32>
    %191 = arith.divf %189, %190 : vector<8x128xf32>
    %192 = arith.negf %178 : vector<8x128xf32>
    %193 = math.exp %192 : vector<8x128xf32>
    %cst_78 = arith.constant 1.000000e+00 : f32
    %194 = vector.broadcast %cst_78 : f32 to vector<8x128xf32>
    %195 = arith.addf %194, %193 : vector<8x128xf32>
    %196 = arith.divf %194, %195 : vector<8x128xf32>
    %197 = arith.negf %186 : vector<8x128xf32>
    %198 = math.exp %197 : vector<8x128xf32>
    %cst_79 = arith.constant 1.000000e+00 : f32
    %199 = vector.broadcast %cst_79 : f32 to vector<8x128xf32>
    %200 = arith.addf %199, %198 : vector<8x128xf32>
    %201 = arith.divf %199, %200 : vector<8x128xf32>
    %202 = math.tanh %182 : vector<8x128xf32>
    %203 = arith.mulf %196, %164 : vector<8x128xf32>
    %204 = arith.mulf %191, %202 : vector<8x128xf32>
    %205 = arith.addf %203, %204 : vector<8x128xf32>
    %206 = math.tanh %205 : vector<8x128xf32>
    %207 = arith.mulf %201, %206 : vector<8x128xf32>
    %c4_i32 = arith.constant 4 : i32
    %c8_i32_80 = arith.constant 8 : i32
    %208 = arith.muli %c4_i32, %c8_i32_80 : i32
    %209 = tpu.assume_multiple %208, 8 : i32
    %210 = arith.index_cast %209 : i32 to index
    %c0_81 = arith.constant 0 : index
    %211 = vector.load %arg11[%210, %c0_81] : memref<64x512xf32, #tpu.memory_space<vmem>>, vector<8x512xf32>
    %212 = vector.extract_strided_slice %211 {offsets = [0, 0], sizes = [8, 128], strides = [1, 1]} : vector<8x512xf32> to vector<8x128xf32>
    %c0_82 = arith.constant 0 : index
    %c0_83 = arith.constant 0 : index
    %213 = vector.load %arg3[%c0_82, %c0_83] : memref<128x512xf32, #tpu.memory_space<vmem>>, vector<128x128xf32>
    %cst_84 = arith.constant dense<0.000000e+00> : vector<8x128xf32>
    %214 = tpu.matmul %207, %213, %cst_84 {dimension_numbers = #tpu.dot_dimension_numbers<[1], [0], [0], [1], [0, 0, 1, 1], [], []>} : vector<8x128xf32>, vector<128x128xf32>, vector<8x128xf32> -> vector<8x128xf32>
    %215 = arith.addf %212, %214 : vector<8x128xf32>
    %216 = vector.extract_strided_slice %211 {offsets = [0, 128], sizes = [8, 128], strides = [1, 1]} : vector<8x512xf32> to vector<8x128xf32>
    %c0_85 = arith.constant 0 : index
    %c128_86 = arith.constant 128 : index
    %217 = vector.load %arg3[%c0_85, %c128_86] : memref<128x512xf32, #tpu.memory_space<vmem>>, vector<128x128xf32>
    %cst_87 = arith.constant dense<0.000000e+00> : vector<8x128xf32>
    %218 = tpu.matmul %207, %217, %cst_87 {dimension_numbers = #tpu.dot_dimension_numbers<[1], [0], [0], [1], [0, 0, 1, 1], [], []>} : vector<8x128xf32>, vector<128x128xf32>, vector<8x128xf32> -> vector<8x128xf32>
    %219 = arith.addf %216, %218 : vector<8x128xf32>
    %220 = vector.extract_strided_slice %211 {offsets = [0, 256], sizes = [8, 128], strides = [1, 1]} : vector<8x512xf32> to vector<8x128xf32>
    %c0_88 = arith.constant 0 : index
    %c256_89 = arith.constant 256 : index
    %221 = vector.load %arg3[%c0_88, %c256_89] : memref<128x512xf32, #tpu.memory_space<vmem>>, vector<128x128xf32>
    %cst_90 = arith.constant dense<0.000000e+00> : vector<8x128xf32>
    %222 = tpu.matmul %207, %221, %cst_90 {dimension_numbers = #tpu.dot_dimension_numbers<[1], [0], [0], [1], [0, 0, 1, 1], [], []>} : vector<8x128xf32>, vector<128x128xf32>, vector<8x128xf32> -> vector<8x128xf32>
    %223 = arith.addf %220, %222 : vector<8x128xf32>
    %224 = vector.extract_strided_slice %211 {offsets = [0, 384], sizes = [8, 128], strides = [1, 1]} : vector<8x512xf32> to vector<8x128xf32>
    %c0_91 = arith.constant 0 : index
    %c384_92 = arith.constant 384 : index
    %225 = vector.load %arg3[%c0_91, %c384_92] : memref<128x512xf32, #tpu.memory_space<vmem>>, vector<128x128xf32>
    %cst_93 = arith.constant dense<0.000000e+00> : vector<8x128xf32>
    %226 = tpu.matmul %207, %225, %cst_93 {dimension_numbers = #tpu.dot_dimension_numbers<[1], [0], [0], [1], [0, 0, 1, 1], [], []>} : vector<8x128xf32>, vector<128x128xf32>, vector<8x128xf32> -> vector<8x128xf32>
    %227 = arith.addf %224, %226 : vector<8x128xf32>
    %228 = arith.negf %215 : vector<8x128xf32>
    %229 = math.exp %228 : vector<8x128xf32>
    %cst_94 = arith.constant 1.000000e+00 : f32
    %230 = vector.broadcast %cst_94 : f32 to vector<8x128xf32>
    %231 = arith.addf %230, %229 : vector<8x128xf32>
    %232 = arith.divf %230, %231 : vector<8x128xf32>
    %233 = arith.negf %219 : vector<8x128xf32>
    %234 = math.exp %233 : vector<8x128xf32>
    %cst_95 = arith.constant 1.000000e+00 : f32
    %235 = vector.broadcast %cst_95 : f32 to vector<8x128xf32>
    %236 = arith.addf %235, %234 : vector<8x128xf32>
    %237 = arith.divf %235, %236 : vector<8x128xf32>
    %238 = arith.negf %227 : vector<8x128xf32>
    %239 = math.exp %238 : vector<8x128xf32>
    %cst_96 = arith.constant 1.000000e+00 : f32
    %240 = vector.broadcast %cst_96 : f32 to vector<8x128xf32>
    %241 = arith.addf %240, %239 : vector<8x128xf32>
    %242 = arith.divf %240, %241 : vector<8x128xf32>
    %243 = math.tanh %223 : vector<8x128xf32>
    %244 = arith.mulf %237, %205 : vector<8x128xf32>
    %245 = arith.mulf %232, %243 : vector<8x128xf32>
    %246 = arith.addf %244, %245 : vector<8x128xf32>
    %247 = math.tanh %246 : vector<8x128xf32>
    %248 = arith.mulf %242, %247 : vector<8x128xf32>
    %c5_i32 = arith.constant 5 : i32
    %c8_i32_97 = arith.constant 8 : i32
    %249 = arith.muli %c5_i32, %c8_i32_97 : i32
    %250 = tpu.assume_multiple %249, 8 : i32
    %251 = arith.index_cast %250 : i32 to index
    %c0_98 = arith.constant 0 : index
    %252 = vector.load %arg11[%251, %c0_98] : memref<64x512xf32, #tpu.memory_space<vmem>>, vector<8x512xf32>
    %253 = vector.extract_strided_slice %252 {offsets = [0, 0], sizes = [8, 128], strides = [1, 1]} : vector<8x512xf32> to vector<8x128xf32>
    %c0_99 = arith.constant 0 : index
    %c0_100 = arith.constant 0 : index
    %254 = vector.load %arg3[%c0_99, %c0_100] : memref<128x512xf32, #tpu.memory_space<vmem>>, vector<128x128xf32>
    %cst_101 = arith.constant dense<0.000000e+00> : vector<8x128xf32>
    %255 = tpu.matmul %248, %254, %cst_101 {dimension_numbers = #tpu.dot_dimension_numbers<[1], [0], [0], [1], [0, 0, 1, 1], [], []>} : vector<8x128xf32>, vector<128x128xf32>, vector<8x128xf32> -> vector<8x128xf32>
    %256 = arith.addf %253, %255 : vector<8x128xf32>
    %257 = vector.extract_strided_slice %252 {offsets = [0, 128], sizes = [8, 128], strides = [1, 1]} : vector<8x512xf32> to vector<8x128xf32>
    %c0_102 = arith.constant 0 : index
    %c128_103 = arith.constant 128 : index
    %258 = vector.load %arg3[%c0_102, %c128_103] : memref<128x512xf32, #tpu.memory_space<vmem>>, vector<128x128xf32>
    %cst_104 = arith.constant dense<0.000000e+00> : vector<8x128xf32>
    %259 = tpu.matmul %248, %258, %cst_104 {dimension_numbers = #tpu.dot_dimension_numbers<[1], [0], [0], [1], [0, 0, 1, 1], [], []>} : vector<8x128xf32>, vector<128x128xf32>, vector<8x128xf32> -> vector<8x128xf32>
    %260 = arith.addf %257, %259 : vector<8x128xf32>
    %261 = vector.extract_strided_slice %252 {offsets = [0, 256], sizes = [8, 128], strides = [1, 1]} : vector<8x512xf32> to vector<8x128xf32>
    %c0_105 = arith.constant 0 : index
    %c256_106 = arith.constant 256 : index
    %262 = vector.load %arg3[%c0_105, %c256_106] : memref<128x512xf32, #tpu.memory_space<vmem>>, vector<128x128xf32>
    %cst_107 = arith.constant dense<0.000000e+00> : vector<8x128xf32>
    %263 = tpu.matmul %248, %262, %cst_107 {dimension_numbers = #tpu.dot_dimension_numbers<[1], [0], [0], [1], [0, 0, 1, 1], [], []>} : vector<8x128xf32>, vector<128x128xf32>, vector<8x128xf32> -> vector<8x128xf32>
    %264 = arith.addf %261, %263 : vector<8x128xf32>
    %265 = vector.extract_strided_slice %252 {offsets = [0, 384], sizes = [8, 128], strides = [1, 1]} : vector<8x512xf32> to vector<8x128xf32>
    %c0_108 = arith.constant 0 : index
    %c384_109 = arith.constant 384 : index
    %266 = vector.load %arg3[%c0_108, %c384_109] : memref<128x512xf32, #tpu.memory_space<vmem>>, vector<128x128xf32>
    %cst_110 = arith.constant dense<0.000000e+00> : vector<8x128xf32>
    %267 = tpu.matmul %248, %266, %cst_110 {dimension_numbers = #tpu.dot_dimension_numbers<[1], [0], [0], [1], [0, 0, 1, 1], [], []>} : vector<8x128xf32>, vector<128x128xf32>, vector<8x128xf32> -> vector<8x128xf32>
    %268 = arith.addf %265, %267 : vector<8x128xf32>
    %269 = arith.negf %256 : vector<8x128xf32>
    %270 = math.exp %269 : vector<8x128xf32>
    %cst_111 = arith.constant 1.000000e+00 : f32
    %271 = vector.broadcast %cst_111 : f32 to vector<8x128xf32>
    %272 = arith.addf %271, %270 : vector<8x128xf32>
    %273 = arith.divf %271, %272 : vector<8x128xf32>
    %274 = arith.negf %260 : vector<8x128xf32>
    %275 = math.exp %274 : vector<8x128xf32>
    %cst_112 = arith.constant 1.000000e+00 : f32
    %276 = vector.broadcast %cst_112 : f32 to vector<8x128xf32>
    %277 = arith.addf %276, %275 : vector<8x128xf32>
    %278 = arith.divf %276, %277 : vector<8x128xf32>
    %279 = arith.negf %268 : vector<8x128xf32>
    %280 = math.exp %279 : vector<8x128xf32>
    %cst_113 = arith.constant 1.000000e+00 : f32
    %281 = vector.broadcast %cst_113 : f32 to vector<8x128xf32>
    %282 = arith.addf %281, %280 : vector<8x128xf32>
    %283 = arith.divf %281, %282 : vector<8x128xf32>
    %284 = math.tanh %264 : vector<8x128xf32>
    %285 = arith.mulf %278, %246 : vector<8x128xf32>
    %286 = arith.mulf %273, %284 : vector<8x128xf32>
    %287 = arith.addf %285, %286 : vector<8x128xf32>
    %288 = math.tanh %287 : vector<8x128xf32>
    %289 = arith.mulf %283, %288 : vector<8x128xf32>
    %c6_i32 = arith.constant 6 : i32
    %c8_i32_114 = arith.constant 8 : i32
    %290 = arith.muli %c6_i32, %c8_i32_114 : i32
    %291 = tpu.assume_multiple %290, 8 : i32
    %292 = arith.index_cast %291 : i32 to index
    %c0_115 = arith.constant 0 : index
    %293 = vector.load %arg11[%292, %c0_115] : memref<64x512xf32, #tpu.memory_space<vmem>>, vector<8x512xf32>
    %294 = vector.extract_strided_slice %293 {offsets = [0, 0], sizes = [8, 128], strides = [1, 1]} : vector<8x512xf32> to vector<8x128xf32>
    %c0_116 = arith.constant 0 : index
    %c0_117 = arith.constant 0 : index
    %295 = vector.load %arg3[%c0_116, %c0_117] : memref<128x512xf32, #tpu.memory_space<vmem>>, vector<128x128xf32>
    %cst_118 = arith.constant dense<0.000000e+00> : vector<8x128xf32>
    %296 = tpu.matmul %289, %295, %cst_118 {dimension_numbers = #tpu.dot_dimension_numbers<[1], [0], [0], [1], [0, 0, 1, 1], [], []>} : vector<8x128xf32>, vector<128x128xf32>, vector<8x128xf32> -> vector<8x128xf32>
    %297 = arith.addf %294, %296 : vector<8x128xf32>
    %298 = vector.extract_strided_slice %293 {offsets = [0, 128], sizes = [8, 128], strides = [1, 1]} : vector<8x512xf32> to vector<8x128xf32>
    %c0_119 = arith.constant 0 : index
    %c128_120 = arith.constant 128 : index
    %299 = vector.load %arg3[%c0_119, %c128_120] : memref<128x512xf32, #tpu.memory_space<vmem>>, vector<128x128xf32>
    %cst_121 = arith.constant dense<0.000000e+00> : vector<8x128xf32>
    %300 = tpu.matmul %289, %299, %cst_121 {dimension_numbers = #tpu.dot_dimension_numbers<[1], [0], [0], [1], [0, 0, 1, 1], [], []>} : vector<8x128xf32>, vector<128x128xf32>, vector<8x128xf32> -> vector<8x128xf32>
    %301 = arith.addf %298, %300 : vector<8x128xf32>
    %302 = vector.extract_strided_slice %293 {offsets = [0, 256], sizes = [8, 128], strides = [1, 1]} : vector<8x512xf32> to vector<8x128xf32>
    %c0_122 = arith.constant 0 : index
    %c256_123 = arith.constant 256 : index
    %303 = vector.load %arg3[%c0_122, %c256_123] : memref<128x512xf32, #tpu.memory_space<vmem>>, vector<128x128xf32>
    %cst_124 = arith.constant dense<0.000000e+00> : vector<8x128xf32>
    %304 = tpu.matmul %289, %303, %cst_124 {dimension_numbers = #tpu.dot_dimension_numbers<[1], [0], [0], [1], [0, 0, 1, 1], [], []>} : vector<8x128xf32>, vector<128x128xf32>, vector<8x128xf32> -> vector<8x128xf32>
    %305 = arith.addf %302, %304 : vector<8x128xf32>
    %306 = vector.extract_strided_slice %293 {offsets = [0, 384], sizes = [8, 128], strides = [1, 1]} : vector<8x512xf32> to vector<8x128xf32>
    %c0_125 = arith.constant 0 : index
    %c384_126 = arith.constant 384 : index
    %307 = vector.load %arg3[%c0_125, %c384_126] : memref<128x512xf32, #tpu.memory_space<vmem>>, vector<128x128xf32>
    %cst_127 = arith.constant dense<0.000000e+00> : vector<8x128xf32>
    %308 = tpu.matmul %289, %307, %cst_127 {dimension_numbers = #tpu.dot_dimension_numbers<[1], [0], [0], [1], [0, 0, 1, 1], [], []>} : vector<8x128xf32>, vector<128x128xf32>, vector<8x128xf32> -> vector<8x128xf32>
    %309 = arith.addf %306, %308 : vector<8x128xf32>
    %310 = arith.negf %297 : vector<8x128xf32>
    %311 = math.exp %310 : vector<8x128xf32>
    %cst_128 = arith.constant 1.000000e+00 : f32
    %312 = vector.broadcast %cst_128 : f32 to vector<8x128xf32>
    %313 = arith.addf %312, %311 : vector<8x128xf32>
    %314 = arith.divf %312, %313 : vector<8x128xf32>
    %315 = arith.negf %301 : vector<8x128xf32>
    %316 = math.exp %315 : vector<8x128xf32>
    %cst_129 = arith.constant 1.000000e+00 : f32
    %317 = vector.broadcast %cst_129 : f32 to vector<8x128xf32>
    %318 = arith.addf %317, %316 : vector<8x128xf32>
    %319 = arith.divf %317, %318 : vector<8x128xf32>
    %320 = arith.negf %309 : vector<8x128xf32>
    %321 = math.exp %320 : vector<8x128xf32>
    %cst_130 = arith.constant 1.000000e+00 : f32
    %322 = vector.broadcast %cst_130 : f32 to vector<8x128xf32>
    %323 = arith.addf %322, %321 : vector<8x128xf32>
    %324 = arith.divf %322, %323 : vector<8x128xf32>
    %325 = math.tanh %305 : vector<8x128xf32>
    %326 = arith.mulf %319, %287 : vector<8x128xf32>
    %327 = arith.mulf %314, %325 : vector<8x128xf32>
    %328 = arith.addf %326, %327 : vector<8x128xf32>
    %329 = math.tanh %328 : vector<8x128xf32>
    %330 = arith.mulf %324, %329 : vector<8x128xf32>
    %c7_i32 = arith.constant 7 : i32
    %c8_i32_131 = arith.constant 8 : i32
    %331 = arith.muli %c7_i32, %c8_i32_131 : i32
    %332 = tpu.assume_multiple %331, 8 : i32
    %333 = arith.index_cast %332 : i32 to index
    %c0_132 = arith.constant 0 : index
    %334 = vector.load %arg11[%333, %c0_132] : memref<64x512xf32, #tpu.memory_space<vmem>>, vector<8x512xf32>
    %335 = vector.extract_strided_slice %334 {offsets = [0, 0], sizes = [8, 128], strides = [1, 1]} : vector<8x512xf32> to vector<8x128xf32>
    %c0_133 = arith.constant 0 : index
    %c0_134 = arith.constant 0 : index
    %336 = vector.load %arg3[%c0_133, %c0_134] : memref<128x512xf32, #tpu.memory_space<vmem>>, vector<128x128xf32>
    %cst_135 = arith.constant dense<0.000000e+00> : vector<8x128xf32>
    %337 = tpu.matmul %330, %336, %cst_135 {dimension_numbers = #tpu.dot_dimension_numbers<[1], [0], [0], [1], [0, 0, 1, 1], [], []>} : vector<8x128xf32>, vector<128x128xf32>, vector<8x128xf32> -> vector<8x128xf32>
    %338 = arith.addf %335, %337 : vector<8x128xf32>
    %339 = vector.extract_strided_slice %334 {offsets = [0, 128], sizes = [8, 128], strides = [1, 1]} : vector<8x512xf32> to vector<8x128xf32>
    %c0_136 = arith.constant 0 : index
    %c128_137 = arith.constant 128 : index
    %340 = vector.load %arg3[%c0_136, %c128_137] : memref<128x512xf32, #tpu.memory_space<vmem>>, vector<128x128xf32>
    %cst_138 = arith.constant dense<0.000000e+00> : vector<8x128xf32>
    %341 = tpu.matmul %330, %340, %cst_138 {dimension_numbers = #tpu.dot_dimension_numbers<[1], [0], [0], [1], [0, 0, 1, 1], [], []>} : vector<8x128xf32>, vector<128x128xf32>, vector<8x128xf32> -> vector<8x128xf32>
    %342 = arith.addf %339, %341 : vector<8x128xf32>
    %343 = vector.extract_strided_slice %334 {offsets = [0, 256], sizes = [8, 128], strides = [1, 1]} : vector<8x512xf32> to vector<8x128xf32>
    %c0_139 = arith.constant 0 : index
    %c256_140 = arith.constant 256 : index
    %344 = vector.load %arg3[%c0_139, %c256_140] : memref<128x512xf32, #tpu.memory_space<vmem>>, vector<128x128xf32>
    %cst_141 = arith.constant dense<0.000000e+00> : vector<8x128xf32>
    %345 = tpu.matmul %330, %344, %cst_141 {dimension_numbers = #tpu.dot_dimension_numbers<[1], [0], [0], [1], [0, 0, 1, 1], [], []>} : vector<8x128xf32>, vector<128x128xf32>, vector<8x128xf32> -> vector<8x128xf32>
    %346 = arith.addf %343, %345 : vector<8x128xf32>
    %347 = vector.extract_strided_slice %334 {offsets = [0, 384], sizes = [8, 128], strides = [1, 1]} : vector<8x512xf32> to vector<8x128xf32>
    %c0_142 = arith.constant 0 : index
    %c384_143 = arith.constant 384 : index
    %348 = vector.load %arg3[%c0_142, %c384_143] : memref<128x512xf32, #tpu.memory_space<vmem>>, vector<128x128xf32>
    %cst_144 = arith.constant dense<0.000000e+00> : vector<8x128xf32>
    %349 = tpu.matmul %330, %348, %cst_144 {dimension_numbers = #tpu.dot_dimension_numbers<[1], [0], [0], [1], [0, 0, 1, 1], [], []>} : vector<8x128xf32>, vector<128x128xf32>, vector<8x128xf32> -> vector<8x128xf32>
    %350 = arith.addf %347, %349 : vector<8x128xf32>
    %351 = arith.negf %338 : vector<8x128xf32>
    %352 = math.exp %351 : vector<8x128xf32>
    %cst_145 = arith.constant 1.000000e+00 : f32
    %353 = vector.broadcast %cst_145 : f32 to vector<8x128xf32>
    %354 = arith.addf %353, %352 : vector<8x128xf32>
    %355 = arith.divf %353, %354 : vector<8x128xf32>
    %356 = arith.negf %342 : vector<8x128xf32>
    %357 = math.exp %356 : vector<8x128xf32>
    %cst_146 = arith.constant 1.000000e+00 : f32
    %358 = vector.broadcast %cst_146 : f32 to vector<8x128xf32>
    %359 = arith.addf %358, %357 : vector<8x128xf32>
    %360 = arith.divf %358, %359 : vector<8x128xf32>
    %361 = arith.negf %350 : vector<8x128xf32>
    %362 = math.exp %361 : vector<8x128xf32>
    %cst_147 = arith.constant 1.000000e+00 : f32
    %363 = vector.broadcast %cst_147 : f32 to vector<8x128xf32>
    %364 = arith.addf %363, %362 : vector<8x128xf32>
    %365 = arith.divf %363, %364 : vector<8x128xf32>
    %366 = math.tanh %346 : vector<8x128xf32>
    %367 = arith.mulf %360, %328 : vector<8x128xf32>
    %368 = arith.mulf %355, %366 : vector<8x128xf32>
    %369 = arith.addf %367, %368 : vector<8x128xf32>
    %370 = math.tanh %369 : vector<8x128xf32>
    %371 = arith.mulf %365, %370 : vector<8x128xf32>
    %c8_i32_148 = arith.constant 8 : i32
    %c0_149 = arith.constant 0 : index
    %c0_150 = arith.constant 0 : index
    %372 = vector.load %arg7[%c0_149, %c0_150] : memref<128x128xf32, #tpu.memory_space<vmem>>, vector<128x128xf32>
    %cst_151 = arith.constant dense<0.000000e+00> : vector<8x128xf32>
    %373 = tpu.matmul %371, %372, %cst_151 {dimension_numbers = #tpu.dot_dimension_numbers<[1], [0], [0], [1], [0, 0, 1, 1], [], []>} : vector<8x128xf32>, vector<128x128xf32>, vector<8x128xf32> -> vector<8x128xf32>
    %c0_152 = arith.constant 0 : index
    %c0_153 = arith.constant 0 : index
    %374 = vector.load %arg8[%c0_152, %c0_153] : memref<128x128xf32, #tpu.memory_space<vmem>>, vector<128x128xf32>
    %cst_154 = arith.constant dense<0.000000e+00> : vector<8x128xf32>
    %375 = tpu.matmul %43, %374, %cst_154 {dimension_numbers = #tpu.dot_dimension_numbers<[1], [0], [0], [1], [0, 0, 1, 1], [], []>} : vector<8x128xf32>, vector<128x128xf32>, vector<8x128xf32> -> vector<8x128xf32>
    %376 = arith.addf %373, %375 : vector<8x128xf32>
    %c0_155 = arith.constant 0 : index
    %c0_156 = arith.constant 0 : index
    %377 = vector.load %arg9[%c0_155, %c0_156] : memref<1x128xf32, #tpu.memory_space<vmem>>, vector<1x128xf32>
    %378 = vector.broadcast %377 : vector<1x128xf32> to vector<8x128xf32>
    %379 = arith.addf %376, %378 : vector<8x128xf32>
    %c0_157 = arith.constant 0 : index
    %c0_158 = arith.constant 0 : index
    %380 = vector.load %arg10[%c0_157, %c0_158] : memref<8x128xf32, #tpu.memory_space<vmem>>, vector<8x128xf32>
    tpu.vector_store %arg10[%c0_157, %c0_158], %379 {strides = array<i32>} : memref<8x128xf32, #tpu.memory_space<vmem>>, vector<8x128xf32>,
    return
  }
  func.func @transform_0(%arg0: i32) -> (i32, i32) {
    %c0_i32 = arith.constant 0 : i32
    %c0_i32_0 = arith.constant 0 : i32
    return %arg0, %c0_i32 : i32, i32
  }
  func.func @transform_1(%arg0: i32) -> (i32, i32) {
    %c0_i32 = arith.constant 0 : i32
    %c0_i32_0 = arith.constant 0 : i32
    %c0_i32_1 = arith.constant 0 : i32
    return %c0_i32, %c0_i32_0 : i32, i32
  }
  func.func @transform_2(%arg0: i32) -> (i32, i32) {
    %c0_i32 = arith.constant 0 : i32
    %c0_i32_0 = arith.constant 0 : i32
    %c0_i32_1 = arith.constant 0 : i32
    return %c0_i32, %c0_i32_0 : i32, i32
  }
  func.func @transform_3(%arg0: i32) -> (i32, i32) {
    %c0_i32 = arith.constant 0 : i32
    %c0_i32_0 = arith.constant 0 : i32
    %c0_i32_1 = arith.constant 0 : i32
    return %c0_i32, %c0_i32_0 : i32, i32
  }
  func.func @transform_4(%arg0: i32) -> (i32, i32) {
    %c0_i32 = arith.constant 0 : i32
    %c0_i32_0 = arith.constant 0 : i32
    %c0_i32_1 = arith.constant 0 : i32
    return %c0_i32, %c0_i32_0 : i32, i32
  }
  func.func @transform_5(%arg0: i32) -> (i32, i32) {
    %c0_i32 = arith.constant 0 : i32
    %c0_i32_0 = arith.constant 0 : i32
    %c0_i32_1 = arith.constant 0 : i32
    return %c0_i32, %c0_i32_0 : i32, i32
  }
  func.func @transform_6(%arg0: i32) -> (i32, i32) {
    %c0_i32 = arith.constant 0 : i32
    %c0_i32_0 = arith.constant 0 : i32
    %c0_i32_1 = arith.constant 0 : i32
    return %c0_i32, %c0_i32_0 : i32, i32
  }
  func.func @transform_7(%arg0: i32) -> (i32, i32) {
    %c0_i32 = arith.constant 0 : i32
    %c0_i32_0 = arith.constant 0 : i32
    %c0_i32_1 = arith.constant 0 : i32
    return %c0_i32, %c0_i32_0 : i32, i32
  }
  func.func @transform_8(%arg0: i32) -> (i32, i32) {
    %c0_i32 = arith.constant 0 : i32
    %c0_i32_0 = arith.constant 0 : i32
    %c0_i32_1 = arith.constant 0 : i32
    return %c0_i32, %c0_i32_0 : i32, i32
  }
  func.func @transform_9(%arg0: i32) -> (i32, i32) {
    %c0_i32 = arith.constant 0 : i32
    %c0_i32_0 = arith.constant 0 : i32
    return %arg0, %c0_i32 : i32, i32
  }
}

</mosaic_0001>

<bundles_post_ra>
// kernel: tpu_custom_call.1
= control target key start
LH: loop header
LB: loop body
LE: loop exit
PB: predicated region body
PF: predicated region fallthrough
CT: control target
= control target key end

     0   :  { %14 = vsyncpa [#allocation4], 0  ;;  %s7723_s0 = inlined_call_operand.vmem [shape: s32[64,1], index: 0, kind: input, shape index: {}]   ;;  %s7724_s1 = inlined_call_operand.hbm [shape: f32[128,512], index: 1, kind: input, shape index: {}]   ;;  %s7725_s2 = inlined_call_operand.hbm [shape: f32[128,512], index: 2, kind: input, shape index: {}]   ;;  %s7726_s3 = inlined_call_operand.vmem [shape: f32[1,512], index: 3, kind: input, shape index: {}]   ;;  %s7727_s4 = inlined_call_operand.hbm [shape: f32[128,512], index: 4, kind: input, shape index: {}]   ;;  %s7728_s5 = inlined_call_operand.vmem [shape: f32[1,512], index: 5, kind: input, shape index: {}]   ;;  %s7729_s6 = inlined_call_operand.hbm [shape: f32[128,128], index: 6, kind: input, shape index: {}]   ;;  %s7730_s7 = inlined_call_operand.hbm [shape: f32[128,128], index: 7, kind: input, shape index: {}]   ;;  %s7731_s8 = inlined_call_operand.vmem [shape: f32[1,128], index: 8, kind: input, shape index: {}]   ;;  %s7732_s9 = inlined_call_operand.hbm [shape: f32[8,128], index: 9, kind: output, shape index: {}]  }
   0x1   :  { %15 = vsyncpa [#allocation7], 0 }
   0x2   :  { %16 = vsyncpa [#allocation10], 0 }
   0x3   :  { %17 = vsyncpa [#allocation5], 0  ;;  %s6611_s30 = smov [#allocation6]   ;;  %s6612_s11 = smov [#allocation9]  }
   0x4   :  { %s37_s10 = sshll.u32 %s6611_s30, 4  ;;  %s65_s12 = sshll.u32 %s6612_s11, 4  ;;  %s38_s10 = int_to_ptr.vmem [resolvable:$true] %s37_s10  ;;  %s6676_s12 = int_to_ptr.vmem [resolvable:$true] %s65_s12 }
   0x5   :  { %s6471_s15 = scalar_lea.hbm %s7725_s2, 8192 }
   0x6   :  { %p6472_p0 = scmp.ne.s32.totalorder %s7725_s2, %s6471_s15  ;;  %p6475_p1 = scmp.lt.u32.totalorder %s6471_s15, %s7725_s2 }
   0x8   :  { %p6477_p2 = pnand %p6475_p1, %p6472_p0 }
   0xa   :  { %6480 = shalt.err (!%p6477_p2)
}
   0xb   :  { %s6481_s20 = scalar_lea.vmem %s38_s10, 8192  ;;  %p6486_p4 = scmp.lt.s32.totalorder %s38_s10, %s38_s10 }
   0xc   :  { %p6482_p3 = scmp.ne.s32.totalorder %s38_s10, %s6481_s20  ;;  %p6487_p5 = scmp.lt.s32.totalorder %s6481_s20, %s6481_s20 }
   0xe   :  { %p6488_p6 = por %p6487_p5, %p6486_p4 }
  0x10   :  { %p6489_p7 = pnand %p6488_p6, %p6482_p3 }
  0x12   :  { %6492 = shalt.err (!%p6489_p7)
}
  0x13   :  { %s6613_s21 = smov 512   ;;  %s6614_s22 = smov 32  }
  0x14   :  { %43 = dma.hbm_to_vmem [thread:$0]  %s7725_s2, 8192, %s38_s10, [#allocation7], %s6613_s21, %s6613_s21, %s6614_s22  }
  0x15   :  { %s6493_s27 = scalar_lea.hbm %s7729_s6, 2048 }
  0x16   :  { %p6494_p8 = scmp.ne.s32.totalorder %s7729_s6, %s6493_s27  ;;  %p6497_p9 = scmp.lt.u32.totalorder %s6493_s27, %s7729_s6 }
  0x18   :  { %p6499_p10 = pnand %p6497_p9, %p6494_p8 }
  0x1a   :  { %6502 = shalt.err (!%p6499_p10)
}
  0x1b   :  { %s6503_s13 = scalar_lea.vmem %s6676_s12, 2048  ;;  %p6508_p12 = scmp.lt.s32.totalorder %s6676_s12, %s6676_s12 }
  0x1c   :  { %p6504_p11 = scmp.ne.s32.totalorder %s6676_s12, %s6503_s13  ;;  %p6509_p13 = scmp.lt.s32.totalorder %s6503_s13, %s6503_s13 }
  0x1e   :  { %p6510_p0 = por %p6509_p13, %p6508_p12 }
  0x20   :  { %p6511_p1 = pnand %p6510_p0, %p6504_p11 }
  0x22   :  { %6514 = shalt.err (!%p6511_p1)
}
  0x23   :  { %s6615_s2 = smov 128   ;;  %s6616_s10 = smov 8  }
  0x24   :  { %71 = dma.hbm_to_vmem [thread:$0]  %s7729_s6, 2048, %s6676_s12, [#allocation10], %s6615_s2, %s6615_s2, %s6616_s10  }
  0x25   :  { %s6617_s16 = smov [#allocation3]   ;;  %s6618_s18 = smov [#allocation8]  }
  0x26   :  { %s25_s17 = sshll.u32 %s6617_s16, 4  ;;  %s51_s19 = sshll.u32 %s6618_s18, 4  ;;  %s26_s17 = int_to_ptr.vmem [resolvable:$true] %s25_s17  ;;  %s6713_s19 = int_to_ptr.vmem [resolvable:$true] %s51_s19 }
  0x27   :  { %s6515_s24 = scalar_lea.hbm %s7724_s1, 8192 }
  0x28   :  { %p6516_p2 = scmp.ne.s32.totalorder %s7724_s1, %s6515_s24  ;;  %p6519_p3 = scmp.lt.u32.totalorder %s6515_s24, %s7724_s1 }
  0x2a   :  { %p6521_p4 = pnand %p6519_p3, %p6516_p2 }
  0x2c   :  { %6524 = shalt.err (!%p6521_p4)
}
  0x2d   :  { %s6525_s6 = scalar_lea.vmem %s26_s17, 8192  ;;  %p6530_p6 = scmp.lt.s32.totalorder %s26_s17, %s26_s17 }
  0x2e   :  { %p6526_p5 = scmp.ne.s32.totalorder %s26_s17, %s6525_s6  ;;  %p6531_p7 = scmp.lt.s32.totalorder %s6525_s6, %s6525_s6 }
  0x30   :  { %p6532_p8 = por %p6531_p7, %p6530_p6 }
  0x32   :  { %p6533_p9 = pnand %p6532_p8, %p6526_p5 }
  0x34   :  { %6536 = shalt.err (!%p6533_p9)
}
  0x35   :  { %31 = dma.hbm_to_vmem [thread:$0]  %s7724_s1, 8192, %s26_s17, [#allocation4], %s6613_s21, %s6613_s21, %s6614_s22  }
  0x36   :  { %s6537_s13 = scalar_lea.hbm %s7727_s4, 8192 }
  0x37   :  { %p6538_p10 = scmp.ne.s32.totalorder %s7727_s4, %s6537_s13  ;;  %p6541_p11 = scmp.lt.u32.totalorder %s6537_s13, %s7727_s4 }
  0x39   :  { %p6543_p12 = pnand %p6541_p11, %p6538_p10 }
  0x3b   :  { %6546 = shalt.err (!%p6543_p12)
}
  0x3c   :  { %s6547_s20 = scalar_lea.vmem %s6713_s19, 8192  ;;  %p6552_p0 = scmp.lt.s32.totalorder %s6713_s19, %s6713_s19 }
  0x3d   :  { %p6548_p13 = scmp.ne.s32.totalorder %s6713_s19, %s6547_s20  ;;  %p6553_p1 = scmp.lt.s32.totalorder %s6547_s20, %s6547_s20 }
  0x3f   :  { %p6554_p2 = por %p6553_p1, %p6552_p0 }
  0x41   :  { %p6555_p3 = pnand %p6554_p2, %p6548_p13 }
  0x43   :  { %6558 = shalt.err (!%p6555_p3)
}
  0x44   :  { %57 = dma.hbm_to_vmem [thread:$0]  %s7727_s4, 8192, %s6713_s19, [#allocation7], %s6613_s21, %s6613_s21, %s6614_s22  }
  0x45   :  { %s6619_s23 = smov [#allocation11]   ;;  %s6559_s27 = scalar_lea.hbm %s7730_s7, 2048 }
  0x46   :  { %s77_s24 = sshll.u32 %s6619_s23, 4  ;;  %p6560_p4 = scmp.ne.s32.totalorder %s7730_s7, %s6559_s27  ;;  %s78_s24 = int_to_ptr.vmem [resolvable:$true] %s77_s24 }
  0x47   :  { %p6563_p5 = scmp.lt.u32.totalorder %s6559_s27, %s7730_s7 }
  0x49   :  { %p6565_p6 = pnand %p6563_p5, %p6560_p4 }
  0x4b   :  { %6568 = shalt.err (!%p6565_p6)
}
  0x4c   :  { %s6569_s30 = scalar_lea.vmem %s78_s24, 2048  ;;  %p6574_p8 = scmp.lt.s32.totalorder %s78_s24, %s78_s24 }
  0x4d   :  { %p6570_p7 = scmp.ne.s32.totalorder %s78_s24, %s6569_s30  ;;  %p6575_p9 = scmp.lt.s32.totalorder %s6569_s30, %s6569_s30 }
  0x4f   :  { %p6576_p10 = por %p6575_p9, %p6574_p8 }
  0x51   :  { %p6577_p11 = pnand %p6576_p10, %p6570_p7 }
  0x53   :  { %6580 = shalt.err (!%p6577_p11)
}
  0x54   :  { %83 = dma.hbm_to_vmem [thread:$0]  %s7730_s7, 2048, %s78_s24, [#allocation10], %s6615_s2, %s6615_s2, %s6616_s10  }
  0x55   :  { %6603 = dma.done.wait [#allocation4], 8192  }
  0x56   :  { %6604 = vsyncadd [#allocation4], 4294959104 }
  0x57   :  { %6605 = dma.done.wait [#allocation7], 16384  }
  0x58   :  { %6606 = vsyncadd [#allocation7], 4294950912 }
  0x59   :  { %6607 = dma.done.wait [#allocation10], 4096  }
  0x5a   :  { %6608 = vsyncadd [#allocation10], 4294963200  ;;  %v6620_v0 = vmov 0   ;;  %v103_v1 = vld [vmem:[%s7723_s0 + $0x10] sm:$0xff]  ;;  %v101_v2 = vld [vmem:[%s7723_s0] sm:$0xff]  ;;  %v7733_v6 = vmov 0.0  }
  0x5b   :  { %6326 = vset.pattern.permute.xlu1 %v6620_v0  ;;  %6325 = vset.pattern.permute.xlu0 %v6620_v0  ;;  %v104_v3 = vld [vmem:[%s7723_s0 + $0x18] sm:$0xff]  ;;  %v102_v4 = vld [vmem:[%s7723_s0 + $0x8] sm:$0xff]  ;;  %v160_v5 = vld [vmem:[#allocation3 + $0x8] sm:$0xff]  ;;  %vm6624_vm8 = vmmov 0   ;;  %s6625_s28 = smov [#allocation12]  }
  0x5c   :  { %118 = vperm.xlu1 %6326, %v103_v1   ;;  %112 = vperm.xlu0 %6325, %v101_v2   ;;  %v164_v7 = vld [vmem:[#allocation3 + $0x28] sm:$0xff]  ;;  %v162_v8 = vld [vmem:[#allocation3 + $0x18] sm:$0xff]  ;;  %v106_v10 = vld [vmem:[%s7723_s0 + $0x28] sm:$0xff]  ;;  %s3526_s6 = sshll.u32 %s6625_s28, 4  ;;  %s3527_s6 = int_to_ptr.vmem [resolvable:$true] %s3526_s6 }
  0x5d   :  { %309 = vmatprep.mubr.f32.mxu0 %v7733_v6  ;;  %422 = vmatprep.mubr.f32.mxu1 %v7733_v6  ;;  %v166_v9 = vld [vmem:[#allocation3 + $0x38] sm:$0xff]  ;;  %v105_v11 = vld [vmem:[%s7723_s0 + $0x20] sm:$0xff]  ;;  %v5366_v12 = vpack.c.bf16 %v164_v7, %v160_v5  ;;  %v159_v14 = vld [vmem:[#allocation3] sm:$0xff]  ;;  %s6581_s12 = scalar_lea.vmem %s3527_s6, 128  ;;  %p6586_p13 = scmp.lt.s32.totalorder %s3527_s6, %s3527_s6 }
  0x5e   :  { %v5398_v13 = vpack.c.bf16 %v166_v9, %v162_v8  ;;  %v163_v15 = vld [vmem:[#allocation3 + $0x20] sm:$0xff]  ;;  %v161_v16 = vld [vmem:[#allocation3 + $0x10] sm:$0xff]  ;;  %v168_v19 = vld [vmem:[#allocation3 + $0x48] sm:$0xff]  ;;  %p6582_p12 = scmp.ne.s32.totalorder %s3527_s6, %s6581_s12  ;;  %p6587_p0 = scmp.lt.s32.totalorder %s6581_s12, %s6581_s12 }
  0x5f   :  { %v5368_v17 = vpack.c.bf16 %v163_v15, %v159_v14  ;;  %v165_v18 = vld [vmem:[#allocation3 + $0x30] sm:$0xff]  ;;  %v172_v20 = vld [vmem:[#allocation3 + $0x68] sm:$0xff]  ;;  %5367 = vmatprep.subr.bf16.mxu0 %v5366_v12  ;;  %v170_v23 = vld [vmem:[#allocation3 + $0x58] sm:$0xff] }
  0x60   :  { %121 = vperm.xlu1 %6326, %v104_v3   ;;  %115 = vperm.xlu0 %6325, %v102_v4   ;;  %v5400_v21 = vpack.c.bf16 %v165_v18, %v161_v16  ;;  %v5370_v22 = vpack.c.bf16 %v172_v20, %v168_v19  ;;  %v174_v24 = vld [vmem:[#allocation3 + $0x78] sm:$0xff]  ;;  %v167_v25 = vld [vmem:[#allocation3 + $0x40] sm:$0xff]  ;;  %v169_v28 = vld [vmem:[#allocation3 + $0x50] sm:$0xff]  ;;  %p6588_p1 = por %p6587_p0, %p6586_p13 }
  0x61   :  { %5399 = vmatprep.subr.bf16.mxu1 %v5398_v13  ;;  %5369 = vmatpush1.bf16.msra.mxu0 %v5368_v17  ;;  %v5402_v26 = vpack.c.bf16 %v174_v24, %v170_v23  ;;  %v171_v27 = vld [vmem:[#allocation3 + $0x60] sm:$0xff]  ;;  %v173_v29 = vld [vmem:[#allocation3 + $0x70] sm:$0xff]  ;;  %v107_v31 = vld [vmem:[%s7723_s0 + $0x30] sm:$0xff] }
  0x62   :  { %v108_v30 = vld [vmem:[%s7723_s0 + $0x38] sm:$0xff]  ;;  %5401 = vmatpush1.bf16.msra.mxu1 %v5400_v21  ;;  %5371 = vmatprep.subr.bf16.mxu0 %v5370_v22  ;;  %v5372_v32 = vpack.c.bf16 %v171_v27, %v167_v25  ;;  %v5404_v33 = vpack.c.bf16 %v173_v29, %v169_v28  ;;  %v176_v34 = vld [vmem:[#allocation3 + $0x88] sm:$0xff]  ;;  %v178_v36 = vld [vmem:[#allocation3 + $0x98] sm:$0xff]  ;;  %p6589_p2 = pnand %p6588_p1, %p6582_p12 }
  0x63   :  { %v180_v35 = vld [vmem:[#allocation3 + $0xa8] sm:$0xff]  ;;  %v182_v38 = vld [vmem:[#allocation3 + $0xb8] sm:$0xff]  ;;  %v175_v39 = vld [vmem:[#allocation3 + $0x80] sm:$0xff]  ;;  %5403 = vmatprep.subr.bf16.mxu1 %v5402_v26 }
  0x64   :  { %127 = vperm.xlu1 %6326, %v106_v10   ;;  %124 = vperm.xlu0 %6325, %v105_v11   ;;  %v5374_v37 = vpack.c.bf16 %v180_v35, %v176_v34  ;;  %v179_v40 = vld [vmem:[#allocation3 + $0xa0] sm:$0xff]  ;;  %v5406_v41 = vpack.c.bf16 %v182_v38, %v178_v36  ;;  %v177_v42 = vld [vmem:[#allocation3 + $0x90] sm:$0xff]  ;;  %v184_v44 = vld [vmem:[#allocation3 + $0xc8] sm:$0xff] }
  0x65   :  { %v181_v43 = vld [vmem:[#allocation3 + $0xb0] sm:$0xff]  ;;  %5373 = vmatpush1.bf16.msra.mxu0 %v5372_v32  ;;  %v5376_v45 = vpack.c.bf16 %v179_v40, %v175_v39  ;;  %v188_v46 = vld [vmem:[#allocation3 + $0xe8] sm:$0xff]  ;;  %v186_v47 = vld [vmem:[#allocation3 + $0xd8] sm:$0xff] }
  0x66   :  { %v190_v48 = vld [vmem:[#allocation3 + $0xf8] sm:$0xff]  ;;  %5405 = vmatpush1.bf16.msra.mxu1 %v5404_v33  ;;  %5375 = vmatprep.subr.bf16.mxu0 %v5374_v37  ;;  %v5408_v49 = vpack.c.bf16 %v181_v43, %v177_v42  ;;  %v5378_v50 = vpack.c.bf16 %v188_v46, %v184_v44  ;;  %v183_v51 = vld [vmem:[#allocation3 + $0xc0] sm:$0xff]  ;;  %v185_v53 = vld [vmem:[#allocation3 + $0xd0] sm:$0xff] }
  0x67   :  { %v187_v52 = vld [vmem:[#allocation3 + $0xe0] sm:$0xff]  ;;  %v5410_v54 = vpack.c.bf16 %v190_v48, %v186_v47  ;;  %v189_v55 = vld [vmem:[#allocation3 + $0xf0] sm:$0xff]  ;;  %v192_v56 = vld [vmem:[#allocation3 + $0x108] sm:$0xff]  ;;  %5407 = vmatprep.subr.bf16.mxu1 %v5406_v41 }
  0x68   :  { %133 = vperm.xlu1 %6326, %v108_v30   ;;  %130 = vperm.xlu0 %6325, %v107_v31   ;;  %v196_v57 = vld [vmem:[#allocation3 + $0x128] sm:$0xff]  ;;  %v194_v58 = vld [vmem:[#allocation3 + $0x118] sm:$0xff]  ;;  %v5380_v60 = vpack.c.bf16 %v187_v52, %v183_v51  ;;  %v5412_v61 = vpack.c.bf16 %v189_v55, %v185_v53  ;;  %v191_v63 = vld [vmem:[#allocation3 + $0x100] sm:$0xff] }
  0x69   :  { %v198_v59 = vld [vmem:[#allocation3 + $0x138] sm:$0xff]  ;;  %5377 = vmatpush1.bf16.msra.mxu0 %v5376_v45  ;;  %v5382_v62 = vpack.c.bf16 %v196_v57, %v192_v56  ;;  %v195_v0 = vld [vmem:[#allocation3 + $0x120] sm:$0xff]  ;;  %v193_v1 = vld [vmem:[#allocation3 + $0x110] sm:$0xff] }
  0x6a   :  { %5409 = vmatpush1.bf16.msra.mxu1 %v5408_v49  ;;  %5379 = vmatprep.subr.bf16.mxu0 %v5378_v50  ;;  %v5414_v2 = vpack.c.bf16 %v198_v59, %v194_v58  ;;  %v197_v3 = vld [vmem:[#allocation3 + $0x130] sm:$0xff]  ;;  %v200_v4 = vld [vmem:[#allocation3 + $0x148] sm:$0xff]  ;;  %v202_v7 = vld [vmem:[#allocation3 + $0x158] sm:$0xff]  ;;  %v5384_v9 = vpack.c.bf16 %v195_v0, %v191_v63  ;;  %v109_v49 = vlaneseq }
  0x6b   :  { %5411 = vmatprep.subr.bf16.mxu1 %v5410_v54  ;;  %v204_v5 = vld [vmem:[#allocation3 + $0x168] sm:$0xff]  ;;  %v206_v8 = vld [vmem:[#allocation3 + $0x178] sm:$0xff]  ;;  %v5416_v10 = vpack.c.bf16 %v197_v3, %v193_v1  ;;  %v199_v12 = vld [vmem:[#allocation3 + $0x140] sm:$0xff] }
  0x6c   :  { %v5386_v11 = vpack.c.bf16 %v204_v5, %v200_v4  ;;  %v203_v13 = vld [vmem:[#allocation3 + $0x160] sm:$0xff]  ;;  %v201_v14 = vld [vmem:[#allocation3 + $0x150] sm:$0xff]  ;;  %v5418_v15 = vpack.c.bf16 %v206_v8, %v202_v7  ;;  %v208_v17 = vld [vmem:[#allocation3 + $0x188] sm:$0xff]  ;;  %v6792_v54 = vand.u32 127, %v109_v49  ;;  %v6622_v5 = vmov 1.0  }
  0x6d   :  { %5381 = vmatpush1.bf16.msra.mxu0 %v5380_v60  ;;  %v205_v16 = vld [vmem:[#allocation3 + $0x170] sm:$0xff]  ;;  %v212_v18 = vld [vmem:[#allocation3 + $0x1a8] sm:$0xff]  ;;  %v210_v19 = vld [vmem:[#allocation3 + $0x198] sm:$0xff]  ;;  %v5388_v21 = vpack.c.bf16 %v203_v13, %v199_v12 }
  0x6e   :  { %5413 = vmatpush1.bf16.msra.mxu1 %v5412_v61  ;;  %5383 = vmatprep.subr.bf16.mxu0 %v5382_v62  ;;  %v214_v20 = vld [vmem:[#allocation3 + $0x1b8] sm:$0xff]  ;;  %v5420_v22 = vpack.c.bf16 %v205_v16, %v201_v14  ;;  %v5390_v23 = vpack.c.bf16 %v212_v18, %v208_v17  ;;  %v207_v24 = vld [vmem:[#allocation3 + $0x180] sm:$0xff]  ;;  %v209_v26 = vld [vmem:[#allocation3 + $0x190] sm:$0xff] }
  0x6f   :  { %5415 = vmatprep.subr.bf16.mxu1 %v5414_v2  ;;  %v211_v25 = vld [vmem:[#allocation3 + $0x1a0] sm:$0xff]  ;;  %v5422_v27 = vpack.c.bf16 %v214_v20, %v210_v19  ;;  %v213_v28 = vld [vmem:[#allocation3 + $0x1b0] sm:$0xff]  ;;  %v216_v29 = vld [vmem:[#allocation3 + $0x1c8] sm:$0xff] }
  0x70   :  { %v220_v30 = vld [vmem:[#allocation3 + $0x1e8] sm:$0xff]  ;;  %v218_v31 = vld [vmem:[#allocation3 + $0x1d8] sm:$0xff]  ;;  %v5392_v33 = vpack.c.bf16 %v211_v25, %v207_v24  ;;  %v5424_v34 = vpack.c.bf16 %v213_v28, %v209_v26  ;;  %v215_v36 = vld [vmem:[#allocation3 + $0x1c0] sm:$0xff] }
  0x71   :  { %5385 = vmatpush1.bf16.msra.mxu0 %v5384_v9  ;;  %v222_v32 = vld [vmem:[#allocation3 + $0x1f8] sm:$0xff]  ;;  %v5394_v35 = vpack.c.bf16 %v220_v30, %v216_v29  ;;  %v219_v37 = vld [vmem:[#allocation3 + $0x1e0] sm:$0xff]  ;;  %v217_v38 = vld [vmem:[#allocation3 + $0x1d0] sm:$0xff] }
  0x72   :  { %5417 = vmatpush1.bf16.msra.mxu1 %v5416_v10  ;;  %5387 = vmatprep.subr.bf16.mxu0 %v5386_v11  ;;  %v5426_v39 = vpack.c.bf16 %v222_v32, %v218_v31  ;;  %v221_v40 = vld [vmem:[#allocation3 + $0x1f0] sm:$0xff]  ;;  %v504_v41 = vld [vmem:[#allocation8 + $0x8] sm:$0xff]  ;;  %v506_v43 = vld [vmem:[#allocation8 + $0x18] sm:$0xff]  ;;  %v5396_v45 = vpack.c.bf16 %v219_v37, %v215_v36 }
  0x73   :  { %5419 = vmatprep.subr.bf16.mxu1 %v5418_v15  ;;  %v508_v42 = vld [vmem:[#allocation8 + $0x28] sm:$0xff]  ;;  %v510_v44 = vld [vmem:[#allocation8 + $0x38] sm:$0xff]  ;;  %v5428_v46 = vpack.c.bf16 %v221_v40, %v217_v38  ;;  %v503_v50 = vld [vmem:[#allocation8] sm:$0xff] }
  0x74   :  { %v5430_v47 = vpack.c.bf16 %v508_v42, %v504_v41  ;;  %v5462_v48 = vpack.c.bf16 %v510_v44, %v506_v43  ;;  %v507_v51 = vld [vmem:[#allocation8 + $0x20] sm:$0xff]  ;;  %v505_v52 = vld [vmem:[#allocation8 + $0x10] sm:$0xff]  ;;  %v512_v55 = vld [vmem:[#allocation8 + $0x48] sm:$0xff] }
  0x75   :  { %5389 = vmatpush1.bf16.msra.mxu0 %v5388_v21  ;;  %v509_v53 = vld [vmem:[#allocation8 + $0x30] sm:$0xff]  ;;  %v516_v56 = vld [vmem:[#allocation8 + $0x68] sm:$0xff]  ;;  %v514_v57 = vld [vmem:[#allocation8 + $0x58] sm:$0xff]  ;;  %v5432_v59 = vpack.c.bf16 %v507_v51, %v503_v50 }
  0x76   :  { %5421 = vmatpush1.bf16.msra.mxu1 %v5420_v22  ;;  %5391 = vmatprep.subr.bf16.mxu0 %v5390_v23  ;;  %v518_v58 = vld [vmem:[#allocation8 + $0x78] sm:$0xff]  ;;  %v5464_v60 = vpack.c.bf16 %v509_v53, %v505_v52  ;;  %v511_v61 = vld [vmem:[#allocation8 + $0x40] sm:$0xff]  ;;  %v513_v0 = vld [vmem:[#allocation8 + $0x50] sm:$0xff]  ;;  %v5434_v2 = vpack.c.bf16 %v516_v56, %v512_v55 }
  0x77   :  { %5423 = vmatprep.subr.bf16.mxu1 %v5422_v27  ;;  %v515_v63 = vld [vmem:[#allocation8 + $0x60] sm:$0xff]  ;;  %v517_v1 = vld [vmem:[#allocation8 + $0x70] sm:$0xff]  ;;  %v5466_v3 = vpack.c.bf16 %v518_v58, %v514_v57  ;;  %v520_v4 = vld [vmem:[#allocation8 + $0x88] sm:$0xff] }
  0x78   :  { %v524_v7 = vld [vmem:[#allocation8 + $0xa8] sm:$0xff]  ;;  %v522_v8 = vld [vmem:[#allocation8 + $0x98] sm:$0xff]  ;;  %v5436_v10 = vpack.c.bf16 %v515_v63, %v511_v61  ;;  %v5468_v11 = vpack.c.bf16 %v517_v1, %v513_v0  ;;  %v519_v12 = vld [vmem:[#allocation8 + $0x80] sm:$0xff] }
  0x79   :  { %5393 = vmatpush1.bf16.msra.mxu0 %v5392_v33  ;;  %v526_v9 = vld [vmem:[#allocation8 + $0xb8] sm:$0xff]  ;;  %v523_v14 = vld [vmem:[#allocation8 + $0xa0] sm:$0xff]  ;;  %v521_v15 = vld [vmem:[#allocation8 + $0x90] sm:$0xff]  ;;  %v5438_v17 = vpack.c.bf16 %v524_v7, %v520_v4 }
  0x7a   :  { %5425 = vmatpush1.bf16.msra.mxu1 %v5424_v34  ;;  %5395 = vmatprep.subr.bf16.mxu0 %v5394_v35  ;;  %v525_v16 = vld [vmem:[#allocation8 + $0xb0] sm:$0xff]  ;;  %v5470_v18 = vpack.c.bf16 %v526_v9, %v522_v8  ;;  %v528_v19 = vld [vmem:[#allocation8 + $0xc8] sm:$0xff]  ;;  %v530_v22 = vld [vmem:[#allocation8 + $0xd8] sm:$0xff]  ;;  %v5440_v24 = vpack.c.bf16 %v523_v14, %v519_v12 }
  0x7b   :  { %5427 = vmatprep.subr.bf16.mxu1 %v5426_v39  ;;  %v532_v21 = vld [vmem:[#allocation8 + $0xe8] sm:$0xff]  ;;  %v534_v23 = vld [vmem:[#allocation8 + $0xf8] sm:$0xff]  ;;  %v5472_v25 = vpack.c.bf16 %v525_v16, %v521_v15  ;;  %v527_v26 = vld [vmem:[#allocation8 + $0xc0] sm:$0xff] }
  0x7c   :  { %v531_v27 = vld [vmem:[#allocation8 + $0xe0] sm:$0xff]  ;;  %v529_v28 = vld [vmem:[#allocation8 + $0xd0] sm:$0xff]  ;;  %v5442_v30 = vpack.c.bf16 %v532_v21, %v528_v19  ;;  %v5474_v31 = vpack.c.bf16 %v534_v23, %v530_v22  ;;  %v536_v32 = vld [vmem:[#allocation8 + $0x108] sm:$0xff] }
  0x7d   :  { %5397 = vmatpush1.bf16.msra.mxu0 %v5396_v45  ;;  %v533_v29 = vld [vmem:[#allocation8 + $0xf0] sm:$0xff]  ;;  %v540_v33 = vld [vmem:[#allocation8 + $0x128] sm:$0xff]  ;;  %v538_v34 = vld [vmem:[#allocation8 + $0x118] sm:$0xff]  ;;  %v5444_v36 = vpack.c.bf16 %v531_v27, %v527_v26 }
  0x7e   :  { %5429 = vmatpush1.bf16.msra.mxu1 %v5428_v46  ;;  %5431 = vmatprep.subr.bf16.mxu0 %v5430_v47  ;;  %v542_v35 = vld [vmem:[#allocation8 + $0x138] sm:$0xff]  ;;  %v5476_v37 = vpack.c.bf16 %v533_v29, %v529_v28  ;;  %v535_v38 = vld [vmem:[#allocation8 + $0x100] sm:$0xff]  ;;  %v537_v41 = vld [vmem:[#allocation8 + $0x110] sm:$0xff]  ;;  %v5446_v43 = vpack.c.bf16 %v540_v33, %v536_v32 }
  0x7f   :  { %5463 = vmatprep.subr.bf16.mxu1 %v5462_v48  ;;  %v539_v40 = vld [vmem:[#allocation8 + $0x120] sm:$0xff]  ;;  %v541_v42 = vld [vmem:[#allocation8 + $0x130] sm:$0xff]  ;;  %v5478_v44 = vpack.c.bf16 %v542_v35, %v538_v34  ;;  %v544_v45 = vld [vmem:[#allocation8 + $0x148] sm:$0xff] }
  0x80   :  { %v548_v47 = vld [vmem:[#allocation8 + $0x168] sm:$0xff]  ;;  %v546_v48 = vld [vmem:[#allocation8 + $0x158] sm:$0xff]  ;;  %v5448_v51 = vpack.c.bf16 %v539_v40, %v535_v38  ;;  %v5480_v52 = vpack.c.bf16 %v541_v42, %v537_v41  ;;  %v543_v53 = vld [vmem:[#allocation8 + $0x140] sm:$0xff] }
  0x81   :  { %v550_v50 = vld [vmem:[#allocation8 + $0x178] sm:$0xff]  ;;  %v547_v55 = vld [vmem:[#allocation8 + $0x160] sm:$0xff]  ;;  %v545_v56 = vld [vmem:[#allocation8 + $0x150] sm:$0xff]  ;;  %v5450_v58 = vpack.c.bf16 %v548_v47, %v544_v45 }
  0x82   :  { %v549_v57 = vld [vmem:[#allocation8 + $0x170] sm:$0xff]  ;;  %v554_v63 = vld [vmem:[#allocation8 + $0x198] sm:$0xff]  ;;  %v5452_v1 = vpack.c.bf16 %v547_v55, %v543_v53  ;;  %v555_v4 = vld [vmem:[#allocation8 + $0x1a0] sm:$0xff] }
  0x83   :  { %v558_v0 = vld [vmem:[#allocation8 + $0x1b8] sm:$0xff]  ;;  %v553_v7 = vld [vmem:[#allocation8 + $0x190] sm:$0xff]  ;;  %v563_v19 = vld [vmem:[#allocation8 + $0x1e0] sm:$0xff] }
  0x84   :  { %v557_v8 = vld [vmem:[#allocation8 + $0x1b0] sm:$0xff]  ;;  %v562_v14 = vld [vmem:[#allocation8 + $0x1d8] sm:$0xff]  ;;  %v762_v27 = vld [vmem:[#allocation6] sm:$0xff] }
  0x85   :  { %v566_v15 = vld [vmem:[#allocation8 + $0x1f8] sm:$0xff]  ;;  %v565_v21 = vld [vmem:[#allocation8 + $0x1f0] sm:$0xff]  ;;  %v763_v28 = vld [vmem:[#allocation6 + $0x20] sm:$0xff] }
  0x86   :  { %v5490_v23 = vpack.c.bf16 %v566_v15, %v562_v14  ;;  %v849_v29 = vld [vmem:[#allocation6 + $0x8] sm:$0xff]  ;;  %v764_v33 = vld [vmem:[#allocation6 + $0x40] sm:$0xff]  ;;  %v936_v14 = vld [vmem:[#allocation6 + $0x10] sm:$0xff] }
  0x87   :  { %v765_v34 = vld [vmem:[#allocation6 + $0x60] sm:$0xff]  ;;  %v851_v35 = vld [vmem:[#allocation6 + $0x48] sm:$0xff]  ;;  %v937_v15 = vld [vmem:[#allocation6 + $0x30] sm:$0xff] }
  0x88   :  { %v6856_v38 = vpack.c.bf16 %v765_v34, %v764_v33  ;;  %v766_v40 = vld [vmem:[#allocation6 + $0x80] sm:$0xff]  ;;  %v853_v42 = vld [vmem:[#allocation6 + $0x88] sm:$0xff]  ;;  %v942_v34 = vld [vmem:[#allocation6 + $0xd0] sm:$0xff] }
  0x89   :  { %v767_v41 = vld [vmem:[#allocation6 + $0xa0] sm:$0xff]  ;;  %v856_v47 = vld [vmem:[#allocation6 + $0xe8] sm:$0xff] }
  0x8a   :  { %v769_v45 = vld [vmem:[#allocation6 + $0xe0] sm:$0xff]  ;;  %v857_v53 = vld [vmem:[#allocation6 + $0x108] sm:$0xff] }
  0x8b   :  { %v858_v55 = vld [vmem:[#allocation6 + $0x128] sm:$0xff] }
  0xdb   :  { %v113_v62 = vpop.permute.xlu0 %112  ;;  %v119_v20 = vpop.permute.xlu1 %118 }
  0xdc   :  { %vm135_vm0 = vcmp.eq.s32.totalorder %v6792_v54, %v113_v62  ;;  %vm137_vm2 = vcmp.eq.s32.totalorder %v6792_v54, %v119_v20  ;;  %v556_v62 = vld [vmem:[#allocation8 + $0x1a8] sm:$0xff]  ;;  %v561_v20 = vld [vmem:[#allocation8 + $0x1d0] sm:$0xff] }
  0xdd   :  { %3552 = vmatmul.mubr.msk.f32.vlgmr.msra.gmra.mrb[0].mxu0 %vm135_vm0, %v6622_v5  ;;  %3560 = vmatmul.mubr.msk.f32.vlgmr.msra.gmra.mrb[0].mxu1 %vm135_vm0, %v6622_v5  ;;  %v5492_v26 = vpack.c.bf16 %v565_v21, %v561_v20  ;;  %v938_v20 = vld [vmem:[#allocation6 + $0x50] sm:$0xff] }
  0xde   :  { %5433 = vmatpush1.bf16.msra.mxu0 %v5432_v59  ;;  %5465 = vmatpush1.bf16.msra.mxu1 %v5464_v60  ;;  %v5482_v59 = vpack.c.bf16 %v550_v50, %v546_v48  ;;  %v552_v60 = vld [vmem:[#allocation8 + $0x188] sm:$0xff]  ;;  %v939_v21 = vld [vmem:[#allocation6 + $0x70] sm:$0xff] }
  0xdf   :  { %v116_v13 = vpop.permute.xlu0 %115  ;;  %315 = vmatprep.mubr.f32.mxu0 %v7733_v6  ;;  %428 = vmatprep.mubr.f32.mxu1 %v7733_v6  ;;  %v122_v39 = vpop.permute.xlu1 %121  ;;  %v5454_v9 = vpack.c.bf16 %v556_v62, %v552_v60  ;;  %v859_v60 = vld [vmem:[#allocation6 + $0x148] sm:$0xff] }
  0xe0   :  { %vm136_vm1 = vcmp.eq.s32.totalorder %v6792_v54, %v116_v13  ;;  %5435 = vmatprep.subr.bf16.mxu0 %v5434_v2  ;;  %5467 = vmatprep.subr.bf16.mxu1 %v5466_v3  ;;  %vm138_vm3 = vcmp.eq.s32.totalorder %v6792_v54, %v122_v39  ;;  %v5484_v2 = vpack.c.bf16 %v549_v57, %v545_v56  ;;  %v551_v3 = vld [vmem:[#allocation8 + $0x180] sm:$0xff]  ;;  %v564_v13 = vld [vmem:[#allocation8 + $0x1e8] sm:$0xff] }
  0xe1   :  { %3553 = vmatmul.mubr.msk.f32.gmra.mrb[2].mxu0 %vm136_vm1, %v6622_v5  ;;  %3561 = vmatmul.mubr.msk.f32.gmra.mrb[2].mxu1 %vm136_vm1, %v6622_v5  ;;  %v5456_v16 = vpack.c.bf16 %v555_v4, %v551_v3  ;;  %v6886_v57 = vpack.c.bf16 %v858_v55, %v857_v53  ;;  %v862_v3 = vld [vmem:[#allocation6 + $0x1a8] sm:$0xff]  ;;  %v947_v53 = vld [vmem:[#allocation6 + $0x170] sm:$0xff]  ;;  %v1033_v55 = vld [vmem:[#allocation6 + $0x158] sm:$0xff] }
  0xe2   :  { %5437 = vmatpush1.bf16.msra.mxu0 %v5436_v10  ;;  %5469 = vmatpush1.bf16.msra.mxu1 %v5468_v11  ;;  %v5486_v10 = vpack.c.bf16 %v558_v0, %v554_v63  ;;  %v560_v11 = vld [vmem:[#allocation8 + $0x1c8] sm:$0xff]  ;;  %v774_v0 = vld [vmem:[#allocation6 + $0x180] sm:$0xff] }
  0xe3   :  { %321 = vmatprep.mubr.f32.mxu0 %v7733_v6  ;;  %434 = vmatprep.mubr.f32.mxu1 %v7733_v6  ;;  %v125_v46 = vpop.permute.xlu0 %124  ;;  %v128_v61 = vpop.permute.xlu1 %127  ;;  %v5458_v22 = vpack.c.bf16 %v564_v13, %v560_v11  ;;  %v864_v11 = vld [vmem:[#allocation6 + $0x1e8] sm:$0xff] }
  0xe4   :  { %5439 = vmatprep.subr.bf16.mxu0 %v5438_v17  ;;  %5471 = vmatprep.subr.bf16.mxu1 %v5470_v18  ;;  %vm139_vm4 = vcmp.eq.s32.totalorder %v6792_v54, %v125_v46  ;;  %vm140_vm5 = vcmp.eq.s32.totalorder %v6792_v54, %v128_v61  ;;  %v5488_v17 = vpack.c.bf16 %v557_v8, %v553_v7  ;;  %v559_v18 = vld [vmem:[#allocation8 + $0x1c0] sm:$0xff]  ;;  %v855_v46 = vld [vmem:[#allocation6 + $0xc8] sm:$0xff] }
  0xe5   :  { %3554 = vmatmul.mubr.msk.f32.gmra.mrb[4].mxu0 %vm137_vm2, %v6622_v5  ;;  %3562 = vmatmul.mubr.msk.f32.gmra.mrb[4].mxu1 %vm137_vm2, %v6622_v5  ;;  %v6878_v50 = vpack.c.bf16 %v856_v47, %v855_v46  ;;  %v860_v61 = vld [vmem:[#allocation6 + $0x168] sm:$0xff]  ;;  %v776_v8 = vld [vmem:[#allocation6 + $0x1c0] sm:$0xff]  ;;  %v1032_v46 = vld [vmem:[#allocation6 + $0x138] sm:$0xff] }
  0xe6   :  { %5441 = vmatpush1.bf16.msra.mxu0 %v5440_v24  ;;  %5473 = vmatpush1.bf16.msra.mxu1 %v5472_v25  ;;  %v5460_v25 = vpack.c.bf16 %v563_v19, %v559_v18  ;;  %v6894_v63 = vpack.c.bf16 %v860_v61, %v859_v60  ;;  %v6916_v18 = vpack.c.bf16 %v937_v15, %v936_v14  ;;  %v948_v61 = vld [vmem:[#allocation6 + $0x190] sm:$0xff]  ;;  %v1038_v14 = vld [vmem:[#allocation6 + $0x1f8] sm:$0xff] }
  0xe7   :  { %327 = vmatprep.mubr.f32.mxu0 %v7733_v6  ;;  %440 = vmatprep.mubr.f32.mxu1 %v7733_v6  ;;  %v131_v12 = vpop.permute.xlu0 %130  ;;  %v134_v24 = vpop.permute.xlu1 %133 }
  0xe8   :  { %5443 = vmatprep.subr.bf16.mxu0 %v5442_v30  ;;  %5475 = vmatprep.subr.bf16.mxu1 %v5474_v31  ;;  %vm141_vm6 = vcmp.eq.s32.totalorder %v6792_v54, %v131_v12  ;;  %v850_v30 = vld [vmem:[#allocation6 + $0x28] sm:$0xff]  ;;  %vm142_vm7 = vcmp.eq.s32.totalorder %v6792_v54, %v134_v24  ;;  %v6840_v31 = vpack.c.bf16 %v763_v28, %v762_v27  ;;  %v941_v27 = vld [vmem:[#allocation6 + $0xb0] sm:$0xff]  ;;  %v1027_v28 = vld [vmem:[#allocation6 + $0x98] sm:$0xff] }
  0xe9   :  { %3555 = vmatmul.mubr.msk.f32.gmra.mrb[6].mxu0 %vm138_vm3, %v6622_v5  ;;  %3563 = vmatmul.mubr.msk.f32.gmra.mrb[6].mxu1 %vm138_vm3, %v6622_v5  ;;  %v6842_v32 = vpack.c.bf16 %v850_v30, %v849_v29  ;;  %v6868_v54 = vpack.c.bf16 %v767_v41, %v766_v40  ;;  %v6926_v24 = vpack.c.bf16 %v939_v21, %v938_v20  ;;  %v1028_v29 = vld [vmem:[#allocation6 + $0xb8] sm:$0xff] }
  0xea   :  { %5445 = vmatpush1.bf16.msra.mxu0 %v5444_v36  ;;  %5477 = vmatpush1.bf16.msra.mxu1 %v5476_v37  ;;  %v852_v36 = vld [vmem:[#allocation6 + $0x68] sm:$0xff]  ;;  %v7735_v37 = vmov 0.0|0.0   ;;  %v6940_v33 = vpack.c.bf16 %v1028_v29, %v1027_v28  ;;  %v1030_v40 = vld [vmem:[#allocation6 + $0xf8] sm:$0xff] }
  0xeb   :  { %333 = vmatprep.mubr.f32.mxu0 %v7733_v6  ;;  %446 = vmatprep.mubr.f32.mxu1 %v7733_v6  ;;  %v6858_v39 = vpack.c.bf16 %v852_v36, %v851_v35  ;;  %v943_v35 = vld [vmem:[#allocation6 + $0xf0] sm:$0xff]  ;;  %v1029_v36 = vld [vmem:[#allocation6 + $0xd8] sm:$0xff] }
  0xec   :  { %5447 = vmatprep.subr.bf16.mxu0 %v5446_v43  ;;  %5479 = vmatprep.subr.bf16.mxu1 %v5478_v44  ;;  %v854_v43 = vld [vmem:[#allocation6 + $0xa8] sm:$0xff]  ;;  %v768_v44 = vld [vmem:[#allocation6 + $0xc0] sm:$0xff]  ;;  %v6946_v41 = vpack.c.bf16 %v943_v35, %v942_v34 }
  0xed   :  { %3556 = vmatmul.mubr.msk.f32.gmra.mrb[8].mxu0 %vm139_vm4, %v6622_v5  ;;  %3564 = vmatmul.mubr.msk.f32.gmra.mrb[8].mxu1 %vm139_vm4, %v6622_v5  ;;  %v6876_v48 = vpack.c.bf16 %v769_v45, %v768_v44  ;;  %v945_v44 = vld [vmem:[#allocation6 + $0x130] sm:$0xff]  ;;  %v1031_v45 = vld [vmem:[#allocation6 + $0x118] sm:$0xff] }
  0xee   :  { %5449 = vmatpush1.bf16.msra.mxu0 %v5448_v51  ;;  %5481 = vmatpush1.bf16.msra.mxu1 %v5480_v52  ;;  %v770_v51 = vld [vmem:[#allocation6 + $0x100] sm:$0xff] }
  0xef   :  { %339 = vmatprep.mubr.f32.mxu0 %v7733_v6  ;;  %452 = vmatprep.mubr.f32.mxu1 %v7733_v6  ;;  %v771_v52 = vld [vmem:[#allocation6 + $0x120] sm:$0xff] }
  0xf0   :  { %5451 = vmatprep.subr.bf16.mxu0 %v5450_v58  ;;  %5483 = vmatprep.subr.bf16.mxu1 %v5482_v59  ;;  %v6884_v56 = vpack.c.bf16 %v771_v52, %v770_v51  ;;  %v772_v58 = vld [vmem:[#allocation6 + $0x140] sm:$0xff]  ;;  %v6956_v51 = vpack.c.bf16 %v1032_v46, %v1031_v45  ;;  %v946_v52 = vld [vmem:[#allocation6 + $0x150] sm:$0xff] }
  0xf1   :  { %3557 = vmatmul.mubr.msk.f32.gmra.mrb[10].mxu0 %vm140_vm5, %v6622_v5  ;;  %3565 = vmatmul.mubr.msk.f32.gmra.mrb[10].mxu1 %vm140_vm5, %v6622_v5  ;;  %v773_v59 = vld [vmem:[#allocation6 + $0x160] sm:$0xff] }
  0xf2   :  { %5453 = vmatpush1.bf16.msra.mxu0 %v5452_v1  ;;  %5485 = vmatpush1.bf16.msra.mxu1 %v5484_v2  ;;  %v6892_v62 = vpack.c.bf16 %v773_v59, %v772_v58  ;;  %v775_v1 = vld [vmem:[#allocation6 + $0x1a0] sm:$0xff]  ;;  %v861_v2 = vld [vmem:[#allocation6 + $0x188] sm:$0xff]  ;;  %v1034_v58 = vld [vmem:[#allocation6 + $0x178] sm:$0xff]  ;;  %v6962_v59 = vpack.c.bf16 %v947_v53, %v946_v52 }
  0xf3   :  { %345 = vmatprep.mubr.f32.mxu0 %v7733_v6  ;;  %458 = vmatprep.mubr.f32.mxu1 %v7733_v6  ;;  %v6900_v4 = vpack.c.bf16 %v775_v1, %v774_v0  ;;  %v6902_v7 = vpack.c.bf16 %v862_v3, %v861_v2  ;;  %v6964_v60 = vpack.c.bf16 %v1034_v58, %v1033_v55  ;;  %v949_v0 = vld [vmem:[#allocation6 + $0x1b0] sm:$0xff]  ;;  %v1035_v1 = vld [vmem:[#allocation6 + $0x198] sm:$0xff] }
  0xf4   :  { %5455 = vmatprep.subr.bf16.mxu0 %v5454_v9  ;;  %5487 = vmatprep.subr.bf16.mxu1 %v5486_v10  ;;  %v777_v9 = vld [vmem:[#allocation6 + $0x1e0] sm:$0xff]  ;;  %v863_v10 = vld [vmem:[#allocation6 + $0x1c8] sm:$0xff]  ;;  %v1036_v2 = vld [vmem:[#allocation6 + $0x1b8] sm:$0xff]  ;;  %v6970_v3 = vpack.c.bf16 %v949_v0, %v948_v61 }
  0xf5   :  { %3558 = vmatmul.mubr.msk.f32.gmra.mrb[12].mxu0 %vm141_vm6, %v6622_v5  ;;  %3566 = vmatmul.mubr.msk.f32.gmra.mrb[12].mxu1 %vm141_vm6, %v6622_v5  ;;  %v6908_v12 = vpack.c.bf16 %v777_v9, %v776_v8  ;;  %v6910_v13 = vpack.c.bf16 %v864_v11, %v863_v10  ;;  %v6972_v8 = vpack.c.bf16 %v1036_v2, %v1035_v1  ;;  %v950_v9 = vld [vmem:[#allocation6 + $0x1d0] sm:$0xff]  ;;  %v1037_v11 = vld [vmem:[#allocation6 + $0x1d8] sm:$0xff] }
  0xf6   :  { %5457 = vmatpush1.bf16.msra.mxu0 %v5456_v16  ;;  %5489 = vmatpush1.bf16.msra.mxu1 %v5488_v17  ;;  %v1023_v16 = vld [vmem:[#allocation6 + $0x18] sm:$0xff]  ;;  %v951_v10 = vld [vmem:[#allocation6 + $0x1f0] sm:$0xff] }
  0xf7   :  { %351 = vmatprep.mubr.f32.mxu0 %v7733_v6  ;;  %464 = vmatprep.mubr.f32.mxu1 %v7733_v6  ;;  %v1024_v17 = vld [vmem:[#allocation6 + $0x38] sm:$0xff]  ;;  %v6978_v15 = vpack.c.bf16 %v951_v10, %v950_v9 }
  0xf8   :  { %5459 = vmatprep.subr.bf16.mxu0 %v5458_v22  ;;  %5491 = vmatprep.subr.bf16.mxu1 %v5490_v23  ;;  %v6918_v19 = vpack.c.bf16 %v1024_v17, %v1023_v16  ;;  %v1025_v22 = vld [vmem:[#allocation6 + $0x58] sm:$0xff]  ;;  %v6980_v16 = vpack.c.bf16 %v1038_v14, %v1037_v11  ;;  %v7027_v17 = vshrl.u32 %v109_v49, 7 }
  0xf9   :  { %3559 = vmatmul.mubr.msk.f32.gmra.mrb[14].mxu0 %vm142_vm7, %v6622_v5  ;;  %3567 = vmatmul.mubr.msk.f32.gmra.mrb[14].mxu1 %vm142_vm7, %v6622_v5  ;;  %v1026_v23 = vld [vmem:[#allocation6 + $0x78] sm:$0xff] }
  0xfa   :  { %5461 = vmatpush1.bf16.msra.mxu0 %v5460_v25  ;;  %5493 = vmatpush1.bf16.msra.mxu1 %v5492_v26  ;;  %v6928_v25 = vpack.c.bf16 %v1026_v23, %v1025_v22  ;;  %v940_v26 = vld [vmem:[#allocation6 + $0x90] sm:$0xff]  ;;  %v7740_v20 = vsub.s32 0, %v7027_v17  ;;  %v7739_v21 = vsub.s32 2, %v7027_v17  ;;  %v223_v22 = vld [vmem:[%s7726_s3] sm:$0xf]  ;;  %v7737_v28 = vsub.s32 3, %v7027_v17 }
  0xfb   :  { %653 = vmatprep.mubr.f32.mxu0 %v7733_v6  ;;  %724 = vmatprep.mubr.f32.mxu1 %v7733_v6  ;;  %v6938_v30 = vpack.c.bf16 %v941_v27, %v940_v26  ;;  %v7738_v27 = vsub.s32 1, %v7027_v17 }
  0xfc   :  { %5494 = vmatprep.subr.bf16.mxu0 %v7735_v37  ;;  %5518 = vmatprep.subr.bf16.mxu1 %v7735_v37  ;;  %v7046_v34 = vrot.slane %v223_v22, %v7740_v20  ;;  %v7050_v35 = vrot.slane %v223_v22, %v7739_v21 }
  0xfd   :  { %3568 = vmatmul.mubr.msk.f32.vlgmr.msra.gmra.mrb[16].mxu0 %vm142_vm7, %v6622_v5  ;;  %3569 = vmatmul.mubr.msk.f32.vlgmr.msra.gmra.mrb[16].mxu1 %vm142_vm7, %v6622_v5  ;;  %v6870_v5 = vpack.c.bf16 %v854_v43, %v853_v42  ;;  %v6948_v42 = vpack.c.bf16 %v1030_v40, %v1029_v36  ;;  %v944_v43 = vld [vmem:[#allocation6 + $0x110] sm:$0xff]  ;;  %v7054_v36 = vrot.slane %v223_v22, %v7738_v27 }
  0xfe   :  { %5496 = vmatpush3.bf16.msra.mxu0 %v6840_v31  ;;  %5520 = vmatpush3.bf16.msra.mxu1 %v6842_v32  ;;  %v6954_v47 = vpack.c.bf16 %v945_v44, %v944_v43  ;;  %v7058_v40 = vrot.slane %v223_v22, %v7737_v28 }
  0xff   :  { %5497 = vmatprep.subr.bf16.mxu0 %v7735_v37  ;;  %5521 = vmatprep.subr.bf16.mxu1 %v7735_v37 }
 0x100   :  { %4208 = vmatprep.mubr.msk.f32.mxu0 %vm6624_vm8, %v7733_v6  ;;  %4243 = vmatprep.mubr.msk.f32.mxu1 %vm6624_vm8, %v7733_v6 }
 0x102   :  { %5499 = vmatpush3.bf16.msra.mxu0 %v6856_v38  ;;  %5523 = vmatpush3.bf16.msra.mxu1 %v6858_v39 }
 0x103   :  { %5500 = vmatprep.subr.bf16.mxu0 %v7735_v37  ;;  %5524 = vmatprep.subr.bf16.mxu1 %v7735_v37 }
 0x106   :  { %5502 = vmatpush3.bf16.msra.mxu0 %v6868_v54  ;;  %5526 = vmatpush3.bf16.msra.mxu1 %v6870_v5 }
 0x107   :  { %5503 = vmatprep.subr.bf16.mxu0 %v7735_v37  ;;  %5527 = vmatprep.subr.bf16.mxu1 %v7735_v37 }
 0x10a   :  { %5505 = vmatpush3.bf16.msra.mxu0 %v6876_v48  ;;  %5529 = vmatpush3.bf16.msra.mxu1 %v6878_v50 }
 0x10b   :  { %5506 = vmatprep.subr.bf16.mxu0 %v7735_v37  ;;  %5530 = vmatprep.subr.bf16.mxu1 %v7735_v37 }
 0x10e   :  { %5508 = vmatpush3.bf16.msra.mxu0 %v6884_v56  ;;  %5532 = vmatpush3.bf16.msra.mxu1 %v6886_v57 }
 0x10f   :  { %5509 = vmatprep.subr.bf16.mxu0 %v7735_v37  ;;  %5533 = vmatprep.subr.bf16.mxu1 %v7735_v37 }
 0x112   :  { %5511 = vmatpush3.bf16.msra.mxu0 %v6892_v62  ;;  %5535 = vmatpush3.bf16.msra.mxu1 %v6894_v63 }
 0x113   :  { %5512 = vmatprep.subr.bf16.mxu0 %v7735_v37  ;;  %5536 = vmatprep.subr.bf16.mxu1 %v7735_v37 }
 0x116   :  { %5514 = vmatpush3.bf16.msra.mxu0 %v6900_v4  ;;  %5538 = vmatpush3.bf16.msra.mxu1 %v6902_v7 }
 0x117   :  { %5515 = vmatprep.subr.bf16.mxu0 %v7735_v37  ;;  %5539 = vmatprep.subr.bf16.mxu1 %v7735_v37 }
 0x11a   :  { %5517 = vmatpush3.bf16.msra.mxu0 %v6908_v12  ;;  %5541 = vmatpush3.bf16.msra.mxu1 %v6910_v13 }
 0x11b   :  { %5542 = vmatprep.subr.bf16.mxu0 %v7735_v37  ;;  %5566 = vmatprep.subr.bf16.mxu1 %v7735_v37 }
 0x11d   :  { %4209 = vmatmul.mubr.f32.vlgmr.msra.gmra.mrb[18].mxu0 %v7733_v6  ;;  %4244 = vmatmul.mubr.f32.vlgmr.msra.gmra.mrb[18].mxu1 %v7733_v6 }
 0x11e   :  { %5544 = vmatpush3.bf16.msra.mxu0 %v6916_v18  ;;  %5568 = vmatpush3.bf16.msra.mxu1 %v6918_v19 }
 0x11f   :  { %5545 = vmatprep.subr.bf16.mxu0 %v7735_v37  ;;  %5569 = vmatprep.subr.bf16.mxu1 %v7735_v37 }
 0x120   :  { %4278 = vmatprep.mubr.msk.f32.mxu0 %vm6624_vm8, %v7733_v6  ;;  %4313 = vmatprep.mubr.msk.f32.mxu1 %vm6624_vm8, %v7733_v6 }
 0x122   :  { %5547 = vmatpush3.bf16.msra.mxu0 %v6926_v24  ;;  %5571 = vmatpush3.bf16.msra.mxu1 %v6928_v25 }
 0x123   :  { %5548 = vmatprep.subr.bf16.mxu0 %v7735_v37  ;;  %5572 = vmatprep.subr.bf16.mxu1 %v7735_v37 }
 0x126   :  { %5550 = vmatpush3.bf16.msra.mxu0 %v6938_v30  ;;  %5574 = vmatpush3.bf16.msra.mxu1 %v6940_v33 }
 0x127   :  { %5551 = vmatprep.subr.bf16.mxu0 %v7735_v37  ;;  %5575 = vmatprep.subr.bf16.mxu1 %v7735_v37 }
 0x12a   :  { %5553 = vmatpush3.bf16.msra.mxu0 %v6946_v41  ;;  %5577 = vmatpush3.bf16.msra.mxu1 %v6948_v42 }
 0x12b   :  { %5554 = vmatprep.subr.bf16.mxu0 %v7735_v37  ;;  %5578 = vmatprep.subr.bf16.mxu1 %v7735_v37 }
 0x12e   :  { %5556 = vmatpush3.bf16.msra.mxu0 %v6954_v47  ;;  %5580 = vmatpush3.bf16.msra.mxu1 %v6956_v51 }
 0x12f   :  { %5557 = vmatprep.subr.bf16.mxu0 %v7735_v37  ;;  %5581 = vmatprep.subr.bf16.mxu1 %v7735_v37 }
 0x132   :  { %5559 = vmatpush3.bf16.msra.mxu0 %v6962_v59  ;;  %5583 = vmatpush3.bf16.msra.mxu1 %v6964_v60 }
 0x133   :  { %5560 = vmatprep.subr.bf16.mxu0 %v7735_v37  ;;  %5584 = vmatprep.subr.bf16.mxu1 %v7735_v37 }
 0x136   :  { %5562 = vmatpush3.bf16.msra.mxu0 %v6970_v3  ;;  %5586 = vmatpush3.bf16.msra.mxu1 %v6972_v8 }
 0x137   :  { %5563 = vmatprep.subr.bf16.mxu0 %v7735_v37  ;;  %5587 = vmatprep.subr.bf16.mxu1 %v7735_v37 }
 0x13a   :  { %5565 = vmatpush3.bf16.msra.mxu0 %v6978_v15  ;;  %5589 = vmatpush3.bf16.msra.mxu1 %v6980_v16 }
 0x13b   :  { %5590 = vmatprep.subr.bf16.mxu0 %v7735_v37  ;;  %5614 = vmatprep.subr.bf16.mxu1 %v7735_v37 }
 0x13d   :  { %4279 = vmatmul.mubr.f32.vlgmr.msra.gmra.mrb[20].mxu0 %v7733_v6  ;;  %4314 = vmatmul.mubr.f32.vlgmr.msra.gmra.mrb[20].mxu1 %v7733_v6 }
 0x13e   :  { %5592 = vmatpush3.bf16.msra.mxu0 %v6840_v31  ;;  %5616 = vmatpush3.bf16.msra.mxu1 %v6842_v32 }
 0x13f   :  { %5593 = vmatprep.subr.bf16.mxu0 %v7735_v37  ;;  %5617 = vmatprep.subr.bf16.mxu1 %v7735_v37 }
 0x140   :  { %4348 = vmatprep.mubr.msk.f32.mxu0 %vm6624_vm8, %v7733_v6  ;;  %4383 = vmatprep.mubr.msk.f32.mxu1 %vm6624_vm8, %v7733_v6 }
 0x142   :  { %5595 = vmatpush3.bf16.msra.mxu0 %v6856_v38  ;;  %5619 = vmatpush3.bf16.msra.mxu1 %v6858_v39 }
 0x143   :  { %5596 = vmatprep.subr.bf16.mxu0 %v7735_v37  ;;  %5620 = vmatprep.subr.bf16.mxu1 %v7735_v37 }
 0x146   :  { %5598 = vmatpush3.bf16.msra.mxu0 %v6868_v54  ;;  %5622 = vmatpush3.bf16.msra.mxu1 %v6870_v5 }
 0x147   :  { %5599 = vmatprep.subr.bf16.mxu0 %v7735_v37  ;;  %5623 = vmatprep.subr.bf16.mxu1 %v7735_v37 }
 0x14a   :  { %5601 = vmatpush3.bf16.msra.mxu0 %v6876_v48  ;;  %5625 = vmatpush3.bf16.msra.mxu1 %v6878_v50 }
 0x14b   :  { %5602 = vmatprep.subr.bf16.mxu0 %v7735_v37  ;;  %5626 = vmatprep.subr.bf16.mxu1 %v7735_v37 }
 0x14e   :  { %5604 = vmatpush3.bf16.msra.mxu0 %v6884_v56  ;;  %5628 = vmatpush3.bf16.msra.mxu1 %v6886_v57 }
 0x14f   :  { %5605 = vmatprep.subr.bf16.mxu0 %v7735_v37  ;;  %5629 = vmatprep.subr.bf16.mxu1 %v7735_v37 }
 0x152   :  { %5607 = vmatpush3.bf16.msra.mxu0 %v6892_v62  ;;  %5631 = vmatpush3.bf16.msra.mxu1 %v6894_v63 }
 0x153   :  { %5608 = vmatprep.subr.bf16.mxu0 %v7735_v37  ;;  %5632 = vmatprep.subr.bf16.mxu1 %v7735_v37 }
 0x156   :  { %5610 = vmatpush3.bf16.msra.mxu0 %v6900_v4  ;;  %5634 = vmatpush3.bf16.msra.mxu1 %v6902_v7 }
 0x157   :  { %5611 = vmatprep.subr.bf16.mxu0 %v7735_v37  ;;  %5635 = vmatprep.subr.bf16.mxu1 %v7735_v37 }
 0x15a   :  { %5613 = vmatpush3.bf16.msra.mxu0 %v6908_v12  ;;  %5637 = vmatpush3.bf16.msra.mxu1 %v6910_v13 }
 0x15b   :  { %5638 = vmatprep.subr.bf16.mxu0 %v7735_v37  ;;  %5662 = vmatprep.subr.bf16.mxu1 %v7735_v37 }
 0x1b0   :  { %v7034_v23 = vpop.f32.mrb[0].mxu0  ;;  %v7036_v26 = vpop.f32.mrb[0].mxu1 }
 0x1b1   :  { %v7040_v29 = vpop.f32.mrb[1].mxu0  ;;  %v7042_v49 = vpop.f32.mrb[1].mxu1 }
 0x1b4   :  { %v317_v43 = vpop.f32.mrb[2].mxu0  ;;  %v430_v44 = vpop.f32.mrb[2].mxu1 }
 0x1b5   :  { %v7061_v45 = vadd.f32 %v317_v43, %v7046_v34  ;;  %v7064_v46 = vadd.f32 %v430_v44, %v7050_v35  ;;  %v319_v52 = vpop.f32.mrb[3].mxu0  ;;  %v432_v53 = vpop.f32.mrb[3].mxu1 }
 0x1b6   :  { %v7067_v55 = vadd.f32 %v319_v52, %v7054_v36  ;;  %v7070_v58 = vadd.f32 %v432_v53, %v7058_v40 }
 0x1b7   :  { %7741 = vst [vmem:[#allocation17_spill] sm:$0xff] %v7064_v46 }
 0x1b8   :  { %7742 = vst [vmem:[#allocation18_spill] sm:$0xff] %v7070_v58  ;;  %v323_v61 = vpop.f32.mrb[4].mxu0  ;;  %v436_v0 = vpop.f32.mrb[4].mxu1 }
 0x1b9   :  { %v7073_v1 = vadd.f32 %v323_v61, %v7046_v34  ;;  %v7076_v2 = vadd.f32 %v436_v0, %v7050_v35  ;;  %v325_v9 = vpop.f32.mrb[5].mxu0  ;;  %v438_v10 = vpop.f32.mrb[5].mxu1 }
 0x1ba   :  { %v7079_v11 = vadd.f32 %v325_v9, %v7054_v36  ;;  %v7082_v14 = vadd.f32 %v438_v10, %v7058_v40 }
 0x1bb   :  { %7743 = vst [vmem:[#allocation19_spill] sm:$0xff] %v7073_v1  ;;  %7744 = vst [vmem:[#allocation20_spill] sm:$0xff] %v7076_v2 }
 0x1bc   :  { %7745 = vst [vmem:[#allocation21_spill] sm:$0xff] %v7079_v11  ;;  %7746 = vst [vmem:[#allocation22_spill] sm:$0xff] %v7082_v14  ;;  %v329_v22 = vpop.f32.mrb[6].mxu0  ;;  %v442_v43 = vpop.f32.mrb[6].mxu1 }
 0x1bd   :  { %v7085_v44 = vadd.f32 %v329_v22, %v7046_v34  ;;  %v7088_v52 = vadd.f32 %v442_v43, %v7050_v35  ;;  %v331_v53 = vpop.f32.mrb[7].mxu0  ;;  %v444_v61 = vpop.f32.mrb[7].mxu1 }
 0x1be   :  { %v7091_v0 = vadd.f32 %v331_v53, %v7054_v36  ;;  %v7094_v6 = vadd.f32 %v444_v61, %v7058_v40 }
 0x1bf   :  { %7747 = vst [vmem:[#allocation23_spill] sm:$0xff] %v7085_v44  ;;  %7748 = vst [vmem:[#allocation24_spill] sm:$0xff] %v7088_v52 }
 0x1c0   :  { %7749 = vst [vmem:[#allocation25_spill] sm:$0xff] %v7091_v0  ;;  %7750 = vst [vmem:[#allocation26_spill] sm:$0xff] %v7094_v6  ;;  %v335_v9 = vpop.f32.mrb[8].mxu0  ;;  %v448_v37 = vpop.f32.mrb[8].mxu1 }
 0x1c1   :  { %v7097_v10 = vadd.f32 %v335_v9, %v7046_v34  ;;  %v7100_v28 = vadd.f32 %v448_v37, %v7050_v35  ;;  %v337_v22 = vpop.f32.mrb[9].mxu0  ;;  %v450_v27 = vpop.f32.mrb[9].mxu1 }
 0x1c2   :  { %v7103_v43 = vadd.f32 %v337_v22, %v7054_v36  ;;  %v7106_v21 = vadd.f32 %v450_v27, %v7058_v40 }
 0x1c3   :  { %7751 = vst [vmem:[#allocation27_spill] sm:$0xff] %v7097_v10  ;;  %7752 = vst [vmem:[#allocation28_spill] sm:$0xff] %v7100_v28 }
 0x1c4   :  { %7753 = vst [vmem:[#allocation29_spill] sm:$0xff] %v7103_v43  ;;  %7754 = vst [vmem:[#allocation30_spill] sm:$0xff] %v7106_v21  ;;  %v341_v53 = vpop.f32.mrb[10].mxu0  ;;  %v454_v20 = vpop.f32.mrb[10].mxu1 }
 0x1c5   :  { %v7109_v61 = vadd.f32 %v341_v53, %v7046_v34  ;;  %v7112_v6 = vadd.f32 %v454_v20, %v7050_v35  ;;  %v343_v9 = vpop.f32.mrb[11].mxu0  ;;  %v456_v10 = vpop.f32.mrb[11].mxu1 }
 0x1c6   :  { %v7115_v37 = vadd.f32 %v343_v9, %v7054_v36  ;;  %v7118_v28 = vadd.f32 %v456_v10, %v7058_v40  ;;  %v567_v10 = vld [vmem:[%s7728_s5] sm:$0xf] }
 0x1c7   :  { %7755 = vst [vmem:[#allocation31_spill] sm:$0xff] %v7109_v61  ;;  %7756 = vst [vmem:[#allocation32_spill] sm:$0xff] %v7112_v6 }
 0x1c8   :  { %7757 = vst [vmem:[#allocation33_spill] sm:$0xff] %v7115_v37  ;;  %7758 = vst [vmem:[#allocation34_spill] sm:$0xff] %v7118_v28  ;;  %v347_v22 = vpop.f32.mrb[12].mxu0  ;;  %v460_v43 = vpop.f32.mrb[12].mxu1 }
 0x1c9   :  { %v7121_v27 = vadd.f32 %v347_v22, %v7046_v34  ;;  %v7124_v21 = vadd.f32 %v460_v43, %v7050_v35  ;;  %v349_v53 = vpop.f32.mrb[13].mxu0  ;;  %v462_v61 = vpop.f32.mrb[13].mxu1 }
 0x1ca   :  { %v7127_v20 = vadd.f32 %v349_v53, %v7054_v36  ;;  %v7130_v6 = vadd.f32 %v462_v61, %v7058_v40  ;;  %v7765_v53 = vsub.s32 0, %v7027_v17  ;;  %v7766_v61 = vsub.s32 2, %v7027_v17 }
 0x1cb   :  { %7759 = vst [vmem:[#allocation35_spill] sm:$0xff] %v7121_v27  ;;  %7760 = vst [vmem:[#allocation36_spill] sm:$0xff] %v7124_v21 }
 0x1cc   :  { %7761 = vst [vmem:[#allocation37_spill] sm:$0xff] %v7127_v20  ;;  %7762 = vst [vmem:[#allocation38_spill] sm:$0xff] %v7130_v6  ;;  %v353_v9 = vpop.f32.mrb[14].mxu0  ;;  %v466_v28 = vpop.f32.mrb[14].mxu1  ;;  %v572_v20 = vrot.slane %v567_v10, %v7765_v53  ;;  %v580_v6 = vrot.slane %v567_v10, %v7766_v61 }
 0x1cd   :  { %v7136_v22 = vadd.f32 %v353_v9, %v7046_v34  ;;  %v7139_v43 = vadd.f32 %v466_v28, %v7050_v35  ;;  %v355_v21 = vpop.f32.mrb[15].mxu0  ;;  %v468_v27 = vpop.f32.mrb[15].mxu1  ;;  %v7769_v9 = vsub.s32 1, %v7027_v17  ;;  %v7770_v28 = vsub.s32 3, %v7027_v17 }
 0x1ce   :  { %v7146_v37 = vadd.f32 %v355_v21, %v7054_v36  ;;  %v7149_v52 = vadd.f32 %v468_v27, %v7058_v40 }
 0x1cf   :  { %7763 = vst [vmem:[#allocation39_spill] sm:$0xff] %v7136_v22  ;;  %7764 = vst [vmem:[#allocation40_spill] sm:$0xff] %v7139_v43  ;;  %v576_v22 = vrot.slane %v567_v10, %v7769_v9  ;;  %v584_v43 = vrot.slane %v567_v10, %v7770_v28 }
 0x1d0   :  { %7767 = vst [vmem:[#allocation41_spill] sm:$0xff] %v7146_v37  ;;  %7768 = vst [vmem:[#allocation42_spill] sm:$0xff] %v7149_v52  ;;  %v655_v0 = vpop.f32.mrb[16].mxu0  ;;  %v726_v44 = vpop.f32.mrb[16].mxu1 }
 0x1d1   :  { %v656_v14 = vadd.f32 %v655_v0, %v572_v20  ;;  %v727_v2 = vadd.f32 %v726_v44, %v580_v6  ;;  %v657_v53 = vpop.f32.mrb[17].mxu0  ;;  %v728_v11 = vpop.f32.mrb[17].mxu1 }
 0x1d2   :  { %v658_v1 = vadd.f32 %v657_v53, %v576_v22  ;;  %v729_v61 = vadd.f32 %v728_v11, %v584_v43 }
 0x1d3   :  { %v3570_v58 = vmul.f32 -1.442695, %v656_v14 }
 0x1d4   :  { %v3571_v21 = vmul.f32 -1.442695, %v658_v1  ;;  %v3572_v27 = vmul.f32 -1.442695, %v729_v61  ;;  %v314_v1 = vadd.f32 %v7040_v29, %v7054_v36 }
 0x1d5   :  { %6327 = vpow2.f32 %v3570_v58  ;;  %v312_v58 = vadd.f32 %v7034_v23, %v7046_v34 }
 0x1d6   :  { %6329 = vpow2.f32 %v3571_v21 }
 0x1d7   :  { %6331 = vpow2.f32 %v3572_v27 }
 0x1d8   :  { %6333 = vtanh.f32 %v727_v2 }
 0x1df   :  { %v6328_v52 = vpop.eup %6327 }
 0x1e0   :  { %v6330_v37 = vpop.eup %6329  ;;  %v734_v46 = vadd.f32 1.0, %v6328_v52 }
 0x1e1   :  { %v740_v17 = vadd.f32 1.0, %v6330_v37  ;;  %v6332_v10 = vpop.eup %6331 }
 0x1e2   :  { %6335 = vrcp.f32 %v734_v46  ;;  %v6334_v0 = vpop.eup %6333  ;;  %v746_v22 = vadd.f32 1.0, %v6332_v10  ;;  %v427_v10 = vadd.f32 %v7042_v49, %v7058_v40 }
 0x1e3   :  { %6337 = vrcp.f32 %v740_v17  ;;  %v425_v17 = vadd.f32 %v7036_v26, %v7050_v35 }
 0x1e4   :  { %6339 = vrcp.f32 %v746_v22 }
 0x1ec   :  { %v6336_v6 = vpop.eup %6335 }
 0x1ed   :  { %v6338_v44 = vpop.eup %6337  ;;  %v751_v20 = vmul.f32 %v6336_v6, %v6334_v0 }
 0x1ee   :  { %v750_v11 = vmul.f32 0.0, %v6338_v44  ;;  %v6340_v28 = vpop.eup %6339 }
 0x1f0   :  { %v752_v14 = vadd.f32 %v751_v20, %v750_v11  ;;  %v844_v52 = vpop.f32.mrb[18].mxu0  ;;  %v931_v43 = vpop.f32.mrb[18].mxu1 }
 0x1f1   :  { %v848_v2 = vadd.f32 %v844_v52, %v312_v58  ;;  %v935_v46 = vadd.f32 %v931_v43, %v314_v1  ;;  %v4210_v37 = vpop.f32.mrb[19].mxu0  ;;  %v4245_v9 = vpop.f32.mrb[19].mxu1 }
 0x1f2   :  { %6341 = vtanh.f32 %v752_v14  ;;  %v7771_v9 = vmov 0.0|0.0  }
 0x1f3   :  { %v3574_v61 = vmul.f32 -1.442695, %v935_v46  ;;  %v3573_v21 = vmul.f32 -1.442695, %v848_v2 }
 0x1f5   :  { %6343 = vpow2.f32 %v3574_v61 }
 0x1f6   :  { %6345 = vpow2.f32 %v3573_v21 }
 0x1fc   :  { %v6342_v53 = vpop.eup %6341 }
 0x1fd   :  { %v7159_v27 = vmul.f32 %v6342_v53, %v6340_v28  ;;  %v7772_v28 = vmov 0.0  }
 0x1ff   :  { %v6344_v23 = vpop.eup %6343 }
 0x200   :  { %v6346_v34 = vpop.eup %6345  ;;  %v1119_v29 = vadd.f32 1.0, %v6344_v23 }
 0x201   :  { %v1113_v36 = vadd.f32 1.0, %v6346_v34 }
 0x202   :  { %6347 = vrcp.f32 %v1119_v29 }
 0x203   :  { %6349 = vrcp.f32 %v1113_v36 }
 0x20c   :  { %v6348_v1 = vpop.eup %6347 }
 0x20d   :  { %v6350_v14 = vpop.eup %6349  ;;  %v1129_v43 = vmul.f32 0.0, %v6348_v1  ;;  %v7774_v1 = vld [vmem:[#allocation18_spill] sm:$0xff] }
 0x210   :  { %v1018_v0 = vpop.f32.mrb[20].mxu0  ;;  %v1105_v6 = vpop.f32.mrb[20].mxu1 }
 0x211   :  { %v1022_v44 = vadd.f32 %v1018_v0, %v425_v17  ;;  %v1109_v20 = vadd.f32 %v1105_v6, %v427_v10  ;;  %v4280_v22 = vpop.f32.mrb[21].mxu0  ;;  %v4315_v11 = vpop.f32.mrb[21].mxu1 }
 0x212   :  { %v7773_v11 = vld [vmem:[#allocation17_spill] sm:$0xff] }
 0x213   :  { %6351 = vtanh.f32 %v1022_v44  ;;  %v3575_v58 = vmul.f32 -1.442695, %v1109_v20 }
 0x215   :  { %6353 = vpow2.f32 %v3575_v58 }
 0x21d   :  { %v6352_v52 = vpop.eup %6351 }
 0x21e   :  { %v1130_v2 = vmul.f32 %v6352_v52, %v6350_v14 }
 0x21f   :  { %v6354_v26 = vpop.eup %6353 }
 0x220   :  { %v7165_v35 = vadd.f32 %v1130_v2, %v1129_v43  ;;  %v1125_v49 = vadd.f32 1.0, %v6354_v26 }
 0x222   :  { %6355 = vtanh.f32 %v7165_v35 }
 0x223   :  { %6357 = vrcp.f32 %v1125_v49 }
 0x22c   :  { %v6356_v40 = vpop.eup %6355 }
 0x22d   :  { %v6358_v46 = vpop.eup %6357 }
 0x22e   :  { %v1133_v37 = vmul.f32 %v6358_v46, %v6356_v40 }
 0x230   :  { %4349 = vmatmul.mubr.f32.vlgmr.msra.gmra.mrb[22].mxu0 %v1133_v37  ;;  %4384 = vmatmul.mubr.f32.vlgmr.msra.gmra.mrb[22].mxu1 %v1133_v37 }
 0x231   :  { %5640 = vmatpush3.bf16.msra.mxu0 %v6916_v18  ;;  %5664 = vmatpush3.bf16.msra.mxu1 %v6918_v19 }
 0x232   :  { %5641 = vmatprep.subr.bf16.mxu0 %v7771_v9  ;;  %5665 = vmatprep.subr.bf16.mxu1 %v7771_v9 }
 0x233   :  { %4418 = vmatprep.mubr.msk.f32.mxu0 %vm6624_vm8, %v7772_v28  ;;  %4453 = vmatprep.mubr.msk.f32.mxu1 %vm6624_vm8, %v7772_v28 }
 0x235   :  { %5643 = vmatpush3.bf16.msra.mxu0 %v6926_v24  ;;  %5667 = vmatpush3.bf16.msra.mxu1 %v6928_v25 }
 0x236   :  { %5644 = vmatprep.subr.bf16.mxu0 %v7771_v9  ;;  %5668 = vmatprep.subr.bf16.mxu1 %v7771_v9 }
 0x239   :  { %5646 = vmatpush3.bf16.msra.mxu0 %v6938_v30  ;;  %5670 = vmatpush3.bf16.msra.mxu1 %v6940_v33 }
 0x23a   :  { %5647 = vmatprep.subr.bf16.mxu0 %v7771_v9  ;;  %5671 = vmatprep.subr.bf16.mxu1 %v7771_v9 }
 0x23d   :  { %5649 = vmatpush3.bf16.msra.mxu0 %v6946_v41  ;;  %5673 = vmatpush3.bf16.msra.mxu1 %v6948_v42 }
 0x23e   :  { %5650 = vmatprep.subr.bf16.mxu0 %v7771_v9  ;;  %5674 = vmatprep.subr.bf16.mxu1 %v7771_v9 }
 0x241   :  { %5652 = vmatpush3.bf16.msra.mxu0 %v6954_v47  ;;  %5676 = vmatpush3.bf16.msra.mxu1 %v6956_v51 }
 0x242   :  { %5653 = vmatprep.subr.bf16.mxu0 %v7771_v9  ;;  %5677 = vmatprep.subr.bf16.mxu1 %v7771_v9 }
 0x245   :  { %5655 = vmatpush3.bf16.msra.mxu0 %v6962_v59  ;;  %5679 = vmatpush3.bf16.msra.mxu1 %v6964_v60 }
 0x246   :  { %5656 = vmatprep.subr.bf16.mxu0 %v7771_v9  ;;  %5680 = vmatprep.subr.bf16.mxu1 %v7771_v9 }
 0x249   :  { %5658 = vmatpush3.bf16.msra.mxu0 %v6970_v3  ;;  %5682 = vmatpush3.bf16.msra.mxu1 %v6972_v8 }
 0x24a   :  { %5659 = vmatprep.subr.bf16.mxu0 %v7771_v9  ;;  %5683 = vmatprep.subr.bf16.mxu1 %v7771_v9 }
 0x24d   :  { %5661 = vmatpush3.bf16.msra.mxu0 %v6978_v15  ;;  %5685 = vmatpush3.bf16.msra.mxu1 %v6980_v16 }
 0x24e   :  { %5686 = vmatprep.subr.bf16.mxu0 %v7771_v9  ;;  %5710 = vmatprep.subr.bf16.mxu1 %v7771_v9 }
 0x250   :  { %4419 = vmatmul.mubr.f32.vlgmr.msra.gmra.mrb[24].mxu0 %v1133_v37  ;;  %4454 = vmatmul.mubr.f32.vlgmr.msra.gmra.mrb[24].mxu1 %v1133_v37 }
 0x251   :  { %5688 = vmatpush3.bf16.msra.mxu0 %v6840_v31  ;;  %5712 = vmatpush3.bf16.msra.mxu1 %v6842_v32 }
 0x252   :  { %5689 = vmatprep.subr.bf16.mxu0 %v7771_v9  ;;  %5713 = vmatprep.subr.bf16.mxu1 %v7771_v9 }
 0x253   :  { %4488 = vmatprep.mubr.msk.f32.mxu0 %vm6624_vm8, %v7772_v28  ;;  %4523 = vmatprep.mubr.msk.f32.mxu1 %vm6624_vm8, %v7772_v28 }
 0x255   :  { %5691 = vmatpush3.bf16.msra.mxu0 %v6856_v38  ;;  %5715 = vmatpush3.bf16.msra.mxu1 %v6858_v39 }
 0x256   :  { %5692 = vmatprep.subr.bf16.mxu0 %v7771_v9  ;;  %5716 = vmatprep.subr.bf16.mxu1 %v7771_v9 }
 0x259   :  { %5694 = vmatpush3.bf16.msra.mxu0 %v6868_v54  ;;  %5718 = vmatpush3.bf16.msra.mxu1 %v6870_v5 }
 0x25a   :  { %5695 = vmatprep.subr.bf16.mxu0 %v7771_v9  ;;  %5719 = vmatprep.subr.bf16.mxu1 %v7771_v9 }
 0x25d   :  { %5697 = vmatpush3.bf16.msra.mxu0 %v6876_v48  ;;  %5721 = vmatpush3.bf16.msra.mxu1 %v6878_v50 }
 0x25e   :  { %5698 = vmatprep.subr.bf16.mxu0 %v7771_v9  ;;  %5722 = vmatprep.subr.bf16.mxu1 %v7771_v9 }
 0x261   :  { %5700 = vmatpush3.bf16.msra.mxu0 %v6884_v56  ;;  %5724 = vmatpush3.bf16.msra.mxu1 %v6886_v57 }
 0x262   :  { %5701 = vmatprep.subr.bf16.mxu0 %v7771_v9  ;;  %5725 = vmatprep.subr.bf16.mxu1 %v7771_v9 }
 0x265   :  { %5703 = vmatpush3.bf16.msra.mxu0 %v6892_v62  ;;  %5727 = vmatpush3.bf16.msra.mxu1 %v6894_v63 }
 0x266   :  { %5704 = vmatprep.subr.bf16.mxu0 %v7771_v9  ;;  %5728 = vmatprep.subr.bf16.mxu1 %v7771_v9 }
 0x269   :  { %5706 = vmatpush3.bf16.msra.mxu0 %v6900_v4  ;;  %5730 = vmatpush3.bf16.msra.mxu1 %v6902_v7 }
 0x26a   :  { %5707 = vmatprep.subr.bf16.mxu0 %v7771_v9  ;;  %5731 = vmatprep.subr.bf16.mxu1 %v7771_v9 }
 0x26d   :  { %5709 = vmatpush3.bf16.msra.mxu0 %v6908_v12  ;;  %5733 = vmatpush3.bf16.msra.mxu1 %v6910_v13 }
 0x26e   :  { %5734 = vmatprep.subr.bf16.mxu0 %v7771_v9  ;;  %5758 = vmatprep.subr.bf16.mxu1 %v7771_v9 }
 0x303   :  { %v1207_v53 = vpop.f32.mrb[22].mxu0  ;;  %v1278_v61 = vpop.f32.mrb[22].mxu1 }
 0x304   :  { %v1211_v21 = vadd.f32 %v1207_v53, %v7061_v45  ;;  %v1282_v23 = vadd.f32 %v1278_v61, %v7067_v55  ;;  %v4350_v34 = vpop.f32.mrb[23].mxu0  ;;  %v4385_v29 = vpop.f32.mrb[23].mxu1 }
 0x305   :  { %v7775_v29 = vld [vmem:[#allocation19_spill] sm:$0xff] }
 0x306   :  { %v3577_v36 = vmul.f32 -1.442695, %v1282_v23  ;;  %v3576_v17 = vmul.f32 -1.442695, %v1211_v21 }
 0x308   :  { %6359 = vpow2.f32 %v3577_v36 }
 0x309   :  { %6361 = vpow2.f32 %v3576_v17  ;;  %v7776_v17 = vld [vmem:[#allocation21_spill] sm:$0xff] }
 0x312   :  { %v6360_v10 = vpop.eup %6359 }
 0x313   :  { %v6362_v0 = vpop.eup %6361  ;;  %v1434_v6 = vadd.f32 1.0, %v6360_v10 }
 0x314   :  { %v1428_v44 = vadd.f32 1.0, %v6362_v0 }
 0x315   :  { %6363 = vrcp.f32 %v1434_v6 }
 0x316   :  { %6365 = vrcp.f32 %v1428_v44 }
 0x31f   :  { %v6364_v43 = vpop.eup %6363 }
 0x320   :  { %v6366_v2 = vpop.eup %6365  ;;  %v1444_v49 = vmul.f32 %v6364_v43, %v7165_v35  ;;  %v7778_v43 = vld [vmem:[#allocation22_spill] sm:$0xff] }
 0x323   :  { %v1349_v20 = vpop.f32.mrb[24].mxu0  ;;  %v1420_v22 = vpop.f32.mrb[24].mxu1 }
 0x324   :  { %v1353_v58 = vadd.f32 %v1349_v20, %v7773_v11  ;;  %v1424_v14 = vadd.f32 %v1420_v22, %v7774_v1  ;;  %v4420_v45 = vpop.f32.mrb[25].mxu0  ;;  %v4455_v52 = vpop.f32.mrb[25].mxu1 }
 0x325   :  { %v7777_v52 = vld [vmem:[#allocation20_spill] sm:$0xff] }
 0x326   :  { %6367 = vtanh.f32 %v1353_v58  ;;  %v3578_v55 = vmul.f32 -1.442695, %v1424_v14 }
 0x328   :  { %6369 = vpow2.f32 %v3578_v55 }
 0x330   :  { %v6368_v26 = vpop.eup %6367 }
 0x331   :  { %v1445_v40 = vmul.f32 %v6368_v26, %v6366_v2 }
 0x332   :  { %v6370_v46 = vpop.eup %6369 }
 0x333   :  { %v7245_v37 = vadd.f32 %v1445_v40, %v1444_v49  ;;  %v1440_v53 = vadd.f32 1.0, %v6370_v46 }
 0x335   :  { %6371 = vtanh.f32 %v7245_v37 }
 0x336   :  { %6373 = vrcp.f32 %v1440_v53 }
 0x33f   :  { %v6372_v61 = vpop.eup %6371 }
 0x340   :  { %v6374_v21 = vpop.eup %6373 }
 0x341   :  { %v1448_v23 = vmul.f32 %v6374_v21, %v6372_v61 }
 0x343   :  { %4489 = vmatmul.mubr.f32.vlgmr.msra.gmra.mrb[26].mxu0 %v1448_v23  ;;  %4524 = vmatmul.mubr.f32.vlgmr.msra.gmra.mrb[26].mxu1 %v1448_v23 }
 0x344   :  { %5736 = vmatpush3.bf16.msra.mxu0 %v6916_v18  ;;  %5760 = vmatpush3.bf16.msra.mxu1 %v6918_v19 }
 0x345   :  { %5737 = vmatprep.subr.bf16.mxu0 %v7771_v9  ;;  %5761 = vmatprep.subr.bf16.mxu1 %v7771_v9 }
 0x346   :  { %4558 = vmatprep.mubr.msk.f32.mxu0 %vm6624_vm8, %v7772_v28  ;;  %4593 = vmatprep.mubr.msk.f32.mxu1 %vm6624_vm8, %v7772_v28 }
 0x348   :  { %5739 = vmatpush3.bf16.msra.mxu0 %v6926_v24  ;;  %5763 = vmatpush3.bf16.msra.mxu1 %v6928_v25 }
 0x349   :  { %5740 = vmatprep.subr.bf16.mxu0 %v7771_v9  ;;  %5764 = vmatprep.subr.bf16.mxu1 %v7771_v9 }
 0x34c   :  { %5742 = vmatpush3.bf16.msra.mxu0 %v6938_v30  ;;  %5766 = vmatpush3.bf16.msra.mxu1 %v6940_v33 }
 0x34d   :  { %5743 = vmatprep.subr.bf16.mxu0 %v7771_v9  ;;  %5767 = vmatprep.subr.bf16.mxu1 %v7771_v9 }
 0x350   :  { %5745 = vmatpush3.bf16.msra.mxu0 %v6946_v41  ;;  %5769 = vmatpush3.bf16.msra.mxu1 %v6948_v42 }
 0x351   :  { %5746 = vmatprep.subr.bf16.mxu0 %v7771_v9  ;;  %5770 = vmatprep.subr.bf16.mxu1 %v7771_v9 }
 0x354   :  { %5748 = vmatpush3.bf16.msra.mxu0 %v6954_v47  ;;  %5772 = vmatpush3.bf16.msra.mxu1 %v6956_v51 }
 0x355   :  { %5749 = vmatprep.subr.bf16.mxu0 %v7771_v9  ;;  %5773 = vmatprep.subr.bf16.mxu1 %v7771_v9 }
 0x358   :  { %5751 = vmatpush3.bf16.msra.mxu0 %v6962_v59  ;;  %5775 = vmatpush3.bf16.msra.mxu1 %v6964_v60 }
 0x359   :  { %5752 = vmatprep.subr.bf16.mxu0 %v7771_v9  ;;  %5776 = vmatprep.subr.bf16.mxu1 %v7771_v9 }
 0x35c   :  { %5754 = vmatpush3.bf16.msra.mxu0 %v6970_v3  ;;  %5778 = vmatpush3.bf16.msra.mxu1 %v6972_v8 }
 0x35d   :  { %5755 = vmatprep.subr.bf16.mxu0 %v7771_v9  ;;  %5779 = vmatprep.subr.bf16.mxu1 %v7771_v9 }
 0x360   :  { %5757 = vmatpush3.bf16.msra.mxu0 %v6978_v15  ;;  %5781 = vmatpush3.bf16.msra.mxu1 %v6980_v16 }
 0x361   :  { %5782 = vmatprep.subr.bf16.mxu0 %v7771_v9  ;;  %5806 = vmatprep.subr.bf16.mxu1 %v7771_v9 }
 0x363   :  { %4559 = vmatmul.mubr.f32.vlgmr.msra.gmra.mrb[28].mxu0 %v1448_v23  ;;  %4594 = vmatmul.mubr.f32.vlgmr.msra.gmra.mrb[28].mxu1 %v1448_v23 }
 0x364   :  { %5784 = vmatpush3.bf16.msra.mxu0 %v6840_v31  ;;  %5808 = vmatpush3.bf16.msra.mxu1 %v6842_v32 }
 0x365   :  { %5785 = vmatprep.subr.bf16.mxu0 %v7771_v9  ;;  %5809 = vmatprep.subr.bf16.mxu1 %v7771_v9 }
 0x366   :  { %4628 = vmatprep.mubr.msk.f32.mxu0 %vm6624_vm8, %v7772_v28  ;;  %4663 = vmatprep.mubr.msk.f32.mxu1 %vm6624_vm8, %v7772_v28 }
 0x368   :  { %5787 = vmatpush3.bf16.msra.mxu0 %v6856_v38  ;;  %5811 = vmatpush3.bf16.msra.mxu1 %v6858_v39 }
 0x369   :  { %5788 = vmatprep.subr.bf16.mxu0 %v7771_v9  ;;  %5812 = vmatprep.subr.bf16.mxu1 %v7771_v9 }
 0x36c   :  { %5790 = vmatpush3.bf16.msra.mxu0 %v6868_v54  ;;  %5814 = vmatpush3.bf16.msra.mxu1 %v6870_v5 }
 0x36d   :  { %5791 = vmatprep.subr.bf16.mxu0 %v7771_v9  ;;  %5815 = vmatprep.subr.bf16.mxu1 %v7771_v9 }
 0x370   :  { %5793 = vmatpush3.bf16.msra.mxu0 %v6876_v48  ;;  %5817 = vmatpush3.bf16.msra.mxu1 %v6878_v50 }
 0x371   :  { %5794 = vmatprep.subr.bf16.mxu0 %v7771_v9  ;;  %5818 = vmatprep.subr.bf16.mxu1 %v7771_v9 }
 0x374   :  { %5796 = vmatpush3.bf16.msra.mxu0 %v6884_v56  ;;  %5820 = vmatpush3.bf16.msra.mxu1 %v6886_v57 }
 0x375   :  { %5797 = vmatprep.subr.bf16.mxu0 %v7771_v9  ;;  %5821 = vmatprep.subr.bf16.mxu1 %v7771_v9 }
 0x378   :  { %5799 = vmatpush3.bf16.msra.mxu0 %v6892_v62  ;;  %5823 = vmatpush3.bf16.msra.mxu1 %v6894_v63 }
 0x379   :  { %5800 = vmatprep.subr.bf16.mxu0 %v7771_v9  ;;  %5824 = vmatprep.subr.bf16.mxu1 %v7771_v9 }
 0x37c   :  { %5802 = vmatpush3.bf16.msra.mxu0 %v6900_v4  ;;  %5826 = vmatpush3.bf16.msra.mxu1 %v6902_v7 }
 0x37d   :  { %5803 = vmatprep.subr.bf16.mxu0 %v7771_v9  ;;  %5827 = vmatprep.subr.bf16.mxu1 %v7771_v9 }
 0x380   :  { %5805 = vmatpush3.bf16.msra.mxu0 %v6908_v12  ;;  %5829 = vmatpush3.bf16.msra.mxu1 %v6910_v13 }
 0x381   :  { %5830 = vmatprep.subr.bf16.mxu0 %v7771_v9  ;;  %5854 = vmatprep.subr.bf16.mxu1 %v7771_v9 }
 0x416   :  { %v1522_v35 = vpop.f32.mrb[26].mxu0  ;;  %v1593_v34 = vpop.f32.mrb[26].mxu1 }
 0x417   :  { %v1526_v36 = vadd.f32 %v1522_v35, %v7775_v29  ;;  %v1597_v10 = vadd.f32 %v1593_v34, %v7776_v17  ;;  %v4490_v0 = vpop.f32.mrb[27].mxu0  ;;  %v4525_v6 = vpop.f32.mrb[27].mxu1 }
 0x418   :  { %v7779_v6 = vld [vmem:[#allocation23_spill] sm:$0xff] }
 0x419   :  { %v3580_v44 = vmul.f32 -1.442695, %v1597_v10  ;;  %v3579_v20 = vmul.f32 -1.442695, %v1526_v36 }
 0x41b   :  { %6375 = vpow2.f32 %v3580_v44 }
 0x41c   :  { %6377 = vpow2.f32 %v3579_v20  ;;  %v7780_v20 = vld [vmem:[#allocation25_spill] sm:$0xff] }
 0x425   :  { %v6376_v22 = vpop.eup %6375 }
 0x426   :  { %v6378_v11 = vpop.eup %6377  ;;  %v1749_v58 = vadd.f32 1.0, %v6376_v22 }
 0x427   :  { %v1743_v1 = vadd.f32 1.0, %v6378_v11 }
 0x428   :  { %6379 = vrcp.f32 %v1749_v58 }
 0x429   :  { %6381 = vrcp.f32 %v1743_v1 }
 0x432   :  { %v6380_v46 = vpop.eup %6379 }
 0x433   :  { %v6382_v53 = vpop.eup %6381  ;;  %v1759_v21 = vmul.f32 %v6380_v46, %v7245_v37  ;;  %v7782_v46 = vld [vmem:[#allocation26_spill] sm:$0xff] }
 0x436   :  { %v1664_v14 = vpop.f32.mrb[28].mxu0  ;;  %v1735_v45 = vpop.f32.mrb[28].mxu1 }
 0x437   :  { %v1668_v55 = vadd.f32 %v1664_v14, %v7777_v52  ;;  %v1739_v2 = vadd.f32 %v1735_v45, %v7778_v43  ;;  %v4560_v26 = vpop.f32.mrb[29].mxu0  ;;  %v4595_v49 = vpop.f32.mrb[29].mxu1 }
 0x438   :  { %v7781_v49 = vld [vmem:[#allocation24_spill] sm:$0xff] }
 0x439   :  { %6383 = vtanh.f32 %v1668_v55  ;;  %v3581_v40 = vmul.f32 -1.442695, %v1739_v2 }
 0x43b   :  { %6385 = vpow2.f32 %v3581_v40 }
 0x443   :  { %v6384_v61 = vpop.eup %6383 }
 0x444   :  { %v1760_v23 = vmul.f32 %v6384_v61, %v6382_v53 }
 0x445   :  { %v6386_v35 = vpop.eup %6385 }
 0x446   :  { %v7325_v34 = vadd.f32 %v1760_v23, %v1759_v21  ;;  %v1755_v29 = vadd.f32 1.0, %v6386_v35 }
 0x448   :  { %6387 = vtanh.f32 %v7325_v34 }
 0x449   :  { %6389 = vrcp.f32 %v1755_v29 }
 0x452   :  { %v6388_v36 = vpop.eup %6387 }
 0x453   :  { %v6390_v17 = vpop.eup %6389 }
 0x454   :  { %v1763_v10 = vmul.f32 %v6390_v17, %v6388_v36 }
 0x456   :  { %4629 = vmatmul.mubr.f32.vlgmr.msra.gmra.mrb[30].mxu0 %v1763_v10  ;;  %4664 = vmatmul.mubr.f32.vlgmr.msra.gmra.mrb[30].mxu1 %v1763_v10 }
 0x457   :  { %5832 = vmatpush3.bf16.msra.mxu0 %v6916_v18  ;;  %5856 = vmatpush3.bf16.msra.mxu1 %v6918_v19 }
 0x458   :  { %5833 = vmatprep.subr.bf16.mxu0 %v7771_v9  ;;  %5857 = vmatprep.subr.bf16.mxu1 %v7771_v9 }
 0x459   :  { %4698 = vmatprep.mubr.msk.f32.mxu0 %vm6624_vm8, %v7772_v28  ;;  %4733 = vmatprep.mubr.msk.f32.mxu1 %vm6624_vm8, %v7772_v28 }
 0x45b   :  { %5835 = vmatpush3.bf16.msra.mxu0 %v6926_v24  ;;  %5859 = vmatpush3.bf16.msra.mxu1 %v6928_v25 }
 0x45c   :  { %5836 = vmatprep.subr.bf16.mxu0 %v7771_v9  ;;  %5860 = vmatprep.subr.bf16.mxu1 %v7771_v9 }
 0x45f   :  { %5838 = vmatpush3.bf16.msra.mxu0 %v6938_v30  ;;  %5862 = vmatpush3.bf16.msra.mxu1 %v6940_v33 }
 0x460   :  { %5839 = vmatprep.subr.bf16.mxu0 %v7771_v9  ;;  %5863 = vmatprep.subr.bf16.mxu1 %v7771_v9 }
 0x463   :  { %5841 = vmatpush3.bf16.msra.mxu0 %v6946_v41  ;;  %5865 = vmatpush3.bf16.msra.mxu1 %v6948_v42 }
 0x464   :  { %5842 = vmatprep.subr.bf16.mxu0 %v7771_v9  ;;  %5866 = vmatprep.subr.bf16.mxu1 %v7771_v9 }
 0x467   :  { %5844 = vmatpush3.bf16.msra.mxu0 %v6954_v47  ;;  %5868 = vmatpush3.bf16.msra.mxu1 %v6956_v51 }
 0x468   :  { %5845 = vmatprep.subr.bf16.mxu0 %v7771_v9  ;;  %5869 = vmatprep.subr.bf16.mxu1 %v7771_v9 }
 0x46b   :  { %5847 = vmatpush3.bf16.msra.mxu0 %v6962_v59  ;;  %5871 = vmatpush3.bf16.msra.mxu1 %v6964_v60 }
 0x46c   :  { %5848 = vmatprep.subr.bf16.mxu0 %v7771_v9  ;;  %5872 = vmatprep.subr.bf16.mxu1 %v7771_v9 }
 0x46f   :  { %5850 = vmatpush3.bf16.msra.mxu0 %v6970_v3  ;;  %5874 = vmatpush3.bf16.msra.mxu1 %v6972_v8 }
 0x470   :  { %5851 = vmatprep.subr.bf16.mxu0 %v7771_v9  ;;  %5875 = vmatprep.subr.bf16.mxu1 %v7771_v9 }
 0x473   :  { %5853 = vmatpush3.bf16.msra.mxu0 %v6978_v15  ;;  %5877 = vmatpush3.bf16.msra.mxu1 %v6980_v16 }
 0x474   :  { %5878 = vmatprep.subr.bf16.mxu0 %v7771_v9  ;;  %5902 = vmatprep.subr.bf16.mxu1 %v7771_v9 }
 0x476   :  { %4699 = vmatmul.mubr.f32.vlgmr.msra.gmra.mrb[32].mxu0 %v1763_v10  ;;  %4734 = vmatmul.mubr.f32.vlgmr.msra.gmra.mrb[32].mxu1 %v1763_v10 }
 0x477   :  { %5880 = vmatpush3.bf16.msra.mxu0 %v6840_v31  ;;  %5904 = vmatpush3.bf16.msra.mxu1 %v6842_v32 }
 0x478   :  { %5881 = vmatprep.subr.bf16.mxu0 %v7771_v9  ;;  %5905 = vmatprep.subr.bf16.mxu1 %v7771_v9 }
 0x479   :  { %4768 = vmatprep.mubr.msk.f32.mxu0 %vm6624_vm8, %v7772_v28  ;;  %4803 = vmatprep.mubr.msk.f32.mxu1 %vm6624_vm8, %v7772_v28 }
 0x47b   :  { %5883 = vmatpush3.bf16.msra.mxu0 %v6856_v38  ;;  %5907 = vmatpush3.bf16.msra.mxu1 %v6858_v39 }
 0x47c   :  { %5884 = vmatprep.subr.bf16.mxu0 %v7771_v9  ;;  %5908 = vmatprep.subr.bf16.mxu1 %v7771_v9 }
 0x47f   :  { %5886 = vmatpush3.bf16.msra.mxu0 %v6868_v54  ;;  %5910 = vmatpush3.bf16.msra.mxu1 %v6870_v5 }
 0x480   :  { %5887 = vmatprep.subr.bf16.mxu0 %v7771_v9  ;;  %5911 = vmatprep.subr.bf16.mxu1 %v7771_v9 }
 0x483   :  { %5889 = vmatpush3.bf16.msra.mxu0 %v6876_v48  ;;  %5913 = vmatpush3.bf16.msra.mxu1 %v6878_v50 }
 0x484   :  { %5890 = vmatprep.subr.bf16.mxu0 %v7771_v9  ;;  %5914 = vmatprep.subr.bf16.mxu1 %v7771_v9 }
 0x487   :  { %5892 = vmatpush3.bf16.msra.mxu0 %v6884_v56  ;;  %5916 = vmatpush3.bf16.msra.mxu1 %v6886_v57 }
 0x488   :  { %5893 = vmatprep.subr.bf16.mxu0 %v7771_v9  ;;  %5917 = vmatprep.subr.bf16.mxu1 %v7771_v9 }
 0x48b   :  { %5895 = vmatpush3.bf16.msra.mxu0 %v6892_v62  ;;  %5919 = vmatpush3.bf16.msra.mxu1 %v6894_v63 }
 0x48c   :  { %5896 = vmatprep.subr.bf16.mxu0 %v7771_v9  ;;  %5920 = vmatprep.subr.bf16.mxu1 %v7771_v9 }
 0x48f   :  { %5898 = vmatpush3.bf16.msra.mxu0 %v6900_v4  ;;  %5922 = vmatpush3.bf16.msra.mxu1 %v6902_v7 }
 0x490   :  { %5899 = vmatprep.subr.bf16.mxu0 %v7771_v9  ;;  %5923 = vmatprep.subr.bf16.mxu1 %v7771_v9 }
 0x493   :  { %5901 = vmatpush3.bf16.msra.mxu0 %v6908_v12  ;;  %5925 = vmatpush3.bf16.msra.mxu1 %v6910_v13 }
 0x494   :  { %5926 = vmatprep.subr.bf16.mxu0 %v7771_v9  ;;  %5950 = vmatprep.subr.bf16.mxu1 %v7771_v9 }
 0x529   :  { %v1837_v37 = vpop.f32.mrb[30].mxu0  ;;  %v1908_v0 = vpop.f32.mrb[30].mxu1 }
 0x52a   :  { %v1841_v44 = vadd.f32 %v1837_v37, %v7779_v6  ;;  %v1912_v22 = vadd.f32 %v1908_v0, %v7780_v20  ;;  %v4630_v11 = vpop.f32.mrb[31].mxu0  ;;  %v4665_v58 = vpop.f32.mrb[31].mxu1 }
 0x52b   :  { %v7783_v58 = vld [vmem:[#allocation27_spill] sm:$0xff] }
 0x52c   :  { %v3583_v1 = vmul.f32 -1.442695, %v1912_v22  ;;  %v3582_v14 = vmul.f32 -1.442695, %v1841_v44 }
 0x52e   :  { %6391 = vpow2.f32 %v3583_v1 }
 0x52f   :  { %6393 = vpow2.f32 %v3582_v14  ;;  %v7784_v14 = vld [vmem:[#allocation29_spill] sm:$0xff] }
 0x538   :  { %v6392_v45 = vpop.eup %6391 }
 0x539   :  { %v6394_v52 = vpop.eup %6393  ;;  %v2064_v55 = vadd.f32 1.0, %v6392_v45 }
 0x53a   :  { %v2058_v43 = vadd.f32 1.0, %v6394_v52 }
 0x53b   :  { %6395 = vrcp.f32 %v2064_v55 }
 0x53c   :  { %6397 = vrcp.f32 %v2058_v43 }
 0x545   :  { %v6396_v35 = vpop.eup %6395 }
 0x546   :  { %v6398_v29 = vpop.eup %6397  ;;  %v2074_v17 = vmul.f32 %v6396_v35, %v7325_v34  ;;  %v7786_v35 = vld [vmem:[#allocation30_spill] sm:$0xff] }
 0x549   :  { %v1979_v2 = vpop.f32.mrb[32].mxu0  ;;  %v2050_v26 = vpop.f32.mrb[32].mxu1 }
 0x54a   :  { %v1983_v40 = vadd.f32 %v1979_v2, %v7781_v49  ;;  %v2054_v53 = vadd.f32 %v2050_v26, %v7782_v46  ;;  %v4700_v61 = vpop.f32.mrb[33].mxu0  ;;  %v4735_v21 = vpop.f32.mrb[33].mxu1 }
 0x54b   :  { %v7785_v21 = vld [vmem:[#allocation28_spill] sm:$0xff] }
 0x54c   :  { %6399 = vtanh.f32 %v1983_v40  ;;  %v3584_v23 = vmul.f32 -1.442695, %v2054_v53 }
 0x54e   :  { %6401 = vpow2.f32 %v3584_v23 }
 0x556   :  { %v6400_v36 = vpop.eup %6399 }
 0x557   :  { %v2075_v10 = vmul.f32 %v6400_v36, %v6398_v29 }
 0x558   :  { %v6402_v37 = vpop.eup %6401 }
 0x559   :  { %v7405_v0 = vadd.f32 %v2075_v10, %v2074_v17  ;;  %v2070_v6 = vadd.f32 1.0, %v6402_v37 }
 0x55b   :  { %6403 = vtanh.f32 %v7405_v0 }
 0x55c   :  { %6405 = vrcp.f32 %v2070_v6 }
 0x565   :  { %v6404_v44 = vpop.eup %6403 }
 0x566   :  { %v6406_v20 = vpop.eup %6405 }
 0x567   :  { %v2078_v22 = vmul.f32 %v6406_v20, %v6404_v44 }
 0x569   :  { %4769 = vmatmul.mubr.f32.vlgmr.msra.gmra.mrb[34].mxu0 %v2078_v22  ;;  %4804 = vmatmul.mubr.f32.vlgmr.msra.gmra.mrb[34].mxu1 %v2078_v22 }
 0x56a   :  { %5928 = vmatpush3.bf16.msra.mxu0 %v6916_v18  ;;  %5952 = vmatpush3.bf16.msra.mxu1 %v6918_v19 }
 0x56b   :  { %5929 = vmatprep.subr.bf16.mxu0 %v7771_v9  ;;  %5953 = vmatprep.subr.bf16.mxu1 %v7771_v9 }
 0x56c   :  { %4838 = vmatprep.mubr.msk.f32.mxu0 %vm6624_vm8, %v7772_v28  ;;  %4873 = vmatprep.mubr.msk.f32.mxu1 %vm6624_vm8, %v7772_v28 }
 0x56e   :  { %5931 = vmatpush3.bf16.msra.mxu0 %v6926_v24  ;;  %5955 = vmatpush3.bf16.msra.mxu1 %v6928_v25 }
 0x56f   :  { %5932 = vmatprep.subr.bf16.mxu0 %v7771_v9  ;;  %5956 = vmatprep.subr.bf16.mxu1 %v7771_v9 }
 0x572   :  { %5934 = vmatpush3.bf16.msra.mxu0 %v6938_v30  ;;  %5958 = vmatpush3.bf16.msra.mxu1 %v6940_v33 }
 0x573   :  { %5935 = vmatprep.subr.bf16.mxu0 %v7771_v9  ;;  %5959 = vmatprep.subr.bf16.mxu1 %v7771_v9 }
 0x576   :  { %5937 = vmatpush3.bf16.msra.mxu0 %v6946_v41  ;;  %5961 = vmatpush3.bf16.msra.mxu1 %v6948_v42 }
 0x577   :  { %5938 = vmatprep.subr.bf16.mxu0 %v7771_v9  ;;  %5962 = vmatprep.subr.bf16.mxu1 %v7771_v9 }
 0x57a   :  { %5940 = vmatpush3.bf16.msra.mxu0 %v6954_v47  ;;  %5964 = vmatpush3.bf16.msra.mxu1 %v6956_v51 }
 0x57b   :  { %5941 = vmatprep.subr.bf16.mxu0 %v7771_v9  ;;  %5965 = vmatprep.subr.bf16.mxu1 %v7771_v9 }
 0x57e   :  { %5943 = vmatpush3.bf16.msra.mxu0 %v6962_v59  ;;  %5967 = vmatpush3.bf16.msra.mxu1 %v6964_v60 }
 0x57f   :  { %5944 = vmatprep.subr.bf16.mxu0 %v7771_v9  ;;  %5968 = vmatprep.subr.bf16.mxu1 %v7771_v9 }
 0x582   :  { %5946 = vmatpush3.bf16.msra.mxu0 %v6970_v3  ;;  %5970 = vmatpush3.bf16.msra.mxu1 %v6972_v8 }
 0x583   :  { %5947 = vmatprep.subr.bf16.mxu0 %v7771_v9  ;;  %5971 = vmatprep.subr.bf16.mxu1 %v7771_v9 }
 0x586   :  { %5949 = vmatpush3.bf16.msra.mxu0 %v6978_v15  ;;  %5973 = vmatpush3.bf16.msra.mxu1 %v6980_v16 }
 0x587   :  { %5974 = vmatprep.subr.bf16.mxu0 %v7771_v9  ;;  %5998 = vmatprep.subr.bf16.mxu1 %v7771_v9 }
 0x589   :  { %4839 = vmatmul.mubr.f32.vlgmr.msra.gmra.mrb[36].mxu0 %v2078_v22  ;;  %4874 = vmatmul.mubr.f32.vlgmr.msra.gmra.mrb[36].mxu1 %v2078_v22 }
 0x58a   :  { %5976 = vmatpush3.bf16.msra.mxu0 %v6840_v31  ;;  %6000 = vmatpush3.bf16.msra.mxu1 %v6842_v32 }
 0x58b   :  { %5977 = vmatprep.subr.bf16.mxu0 %v7771_v9  ;;  %6001 = vmatprep.subr.bf16.mxu1 %v7771_v9 }
 0x58c   :  { %4908 = vmatprep.mubr.msk.f32.mxu0 %vm6624_vm8, %v7772_v28  ;;  %4943 = vmatprep.mubr.msk.f32.mxu1 %vm6624_vm8, %v7772_v28 }
 0x58e   :  { %5979 = vmatpush3.bf16.msra.mxu0 %v6856_v38  ;;  %6003 = vmatpush3.bf16.msra.mxu1 %v6858_v39 }
 0x58f   :  { %5980 = vmatprep.subr.bf16.mxu0 %v7771_v9  ;;  %6004 = vmatprep.subr.bf16.mxu1 %v7771_v9 }
 0x592   :  { %5982 = vmatpush3.bf16.msra.mxu0 %v6868_v54  ;;  %6006 = vmatpush3.bf16.msra.mxu1 %v6870_v5 }
 0x593   :  { %5983 = vmatprep.subr.bf16.mxu0 %v7771_v9  ;;  %6007 = vmatprep.subr.bf16.mxu1 %v7771_v9 }
 0x596   :  { %5985 = vmatpush3.bf16.msra.mxu0 %v6876_v48  ;;  %6009 = vmatpush3.bf16.msra.mxu1 %v6878_v50 }
 0x597   :  { %5986 = vmatprep.subr.bf16.mxu0 %v7771_v9  ;;  %6010 = vmatprep.subr.bf16.mxu1 %v7771_v9 }
 0x59a   :  { %5988 = vmatpush3.bf16.msra.mxu0 %v6884_v56  ;;  %6012 = vmatpush3.bf16.msra.mxu1 %v6886_v57 }
 0x59b   :  { %5989 = vmatprep.subr.bf16.mxu0 %v7771_v9  ;;  %6013 = vmatprep.subr.bf16.mxu1 %v7771_v9 }
 0x59e   :  { %5991 = vmatpush3.bf16.msra.mxu0 %v6892_v62  ;;  %6015 = vmatpush3.bf16.msra.mxu1 %v6894_v63 }
 0x59f   :  { %5992 = vmatprep.subr.bf16.mxu0 %v7771_v9  ;;  %6016 = vmatprep.subr.bf16.mxu1 %v7771_v9 }
 0x5a2   :  { %5994 = vmatpush3.bf16.msra.mxu0 %v6900_v4  ;;  %6018 = vmatpush3.bf16.msra.mxu1 %v6902_v7 }
 0x5a3   :  { %5995 = vmatprep.subr.bf16.mxu0 %v7771_v9  ;;  %6019 = vmatprep.subr.bf16.mxu1 %v7771_v9 }
 0x5a6   :  { %5997 = vmatpush3.bf16.msra.mxu0 %v6908_v12  ;;  %6021 = vmatpush3.bf16.msra.mxu1 %v6910_v13 }
 0x5a7   :  { %6022 = vmatprep.subr.bf16.mxu0 %v7771_v9  ;;  %6046 = vmatprep.subr.bf16.mxu1 %v7771_v9 }
 0x63c   :  { %v2152_v34 = vpop.f32.mrb[34].mxu0  ;;  %v2223_v11 = vpop.f32.mrb[34].mxu1 }
 0x63d   :  { %v2156_v1 = vadd.f32 %v2152_v34, %v7783_v58  ;;  %v2227_v45 = vadd.f32 %v2223_v11, %v7784_v14  ;;  %v4770_v52 = vpop.f32.mrb[35].mxu0  ;;  %v4805_v55 = vpop.f32.mrb[35].mxu1 }
 0x63e   :  { %v7787_v55 = vld [vmem:[#allocation31_spill] sm:$0xff] }
 0x63f   :  { %v3586_v43 = vmul.f32 -1.442695, %v2227_v45  ;;  %v3585_v2 = vmul.f32 -1.442695, %v2156_v1 }
 0x641   :  { %6407 = vpow2.f32 %v3586_v43 }
 0x642   :  { %6409 = vpow2.f32 %v3585_v2  ;;  %v7788_v2 = vld [vmem:[#allocation33_spill] sm:$0xff] }
 0x64b   :  { %v6408_v26 = vpop.eup %6407 }
 0x64c   :  { %v6410_v49 = vpop.eup %6409  ;;  %v2379_v40 = vadd.f32 1.0, %v6408_v26 }
 0x64d   :  { %v2373_v46 = vadd.f32 1.0, %v6410_v49 }
 0x64e   :  { %6411 = vrcp.f32 %v2379_v40 }
 0x64f   :  { %6413 = vrcp.f32 %v2373_v46 }
 0x658   :  { %v6412_v37 = vpop.eup %6411 }
 0x659   :  { %v6414_v6 = vpop.eup %6413  ;;  %v2389_v20 = vmul.f32 %v6412_v37, %v7405_v0  ;;  %v7790_v37 = vld [vmem:[#allocation34_spill] sm:$0xff] }
 0x65c   :  { %v2294_v53 = vpop.f32.mrb[36].mxu0  ;;  %v2365_v61 = vpop.f32.mrb[36].mxu1 }
 0x65d   :  { %v2298_v23 = vadd.f32 %v2294_v53, %v7785_v21  ;;  %v2369_v29 = vadd.f32 %v2365_v61, %v7786_v35  ;;  %v4840_v36 = vpop.f32.mrb[37].mxu0  ;;  %v4875_v17 = vpop.f32.mrb[37].mxu1 }
 0x65e   :  { %v7789_v17 = vld [vmem:[#allocation32_spill] sm:$0xff] }
 0x65f   :  { %6415 = vtanh.f32 %v2298_v23  ;;  %v3587_v10 = vmul.f32 -1.442695, %v2369_v29 }
 0x661   :  { %6417 = vpow2.f32 %v3587_v10 }
 0x669   :  { %v6416_v44 = vpop.eup %6415 }
 0x66a   :  { %v2390_v22 = vmul.f32 %v6416_v44, %v6414_v6 }
 0x66b   :  { %v6418_v34 = vpop.eup %6417 }
 0x66c   :  { %v7485_v11 = vadd.f32 %v2390_v22, %v2389_v20  ;;  %v2385_v58 = vadd.f32 1.0, %v6418_v34 }
 0x66e   :  { %6419 = vtanh.f32 %v7485_v11 }
 0x66f   :  { %6421 = vrcp.f32 %v2385_v58 }
 0x678   :  { %v6420_v1 = vpop.eup %6419 }
 0x679   :  { %v6422_v14 = vpop.eup %6421 }
 0x67a   :  { %v2393_v45 = vmul.f32 %v6422_v14, %v6420_v1 }
 0x67c   :  { %4909 = vmatmul.mubr.f32.vlgmr.msra.gmra.mrb[38].mxu0 %v2393_v45  ;;  %4944 = vmatmul.mubr.f32.vlgmr.msra.gmra.mrb[38].mxu1 %v2393_v45 }
 0x67d   :  { %6024 = vmatpush3.bf16.msra.mxu0 %v6916_v18  ;;  %6048 = vmatpush3.bf16.msra.mxu1 %v6918_v19 }
 0x67e   :  { %6025 = vmatprep.subr.bf16.mxu0 %v7771_v9  ;;  %6049 = vmatprep.subr.bf16.mxu1 %v7771_v9 }
 0x67f   :  { %4978 = vmatprep.mubr.msk.f32.mxu0 %vm6624_vm8, %v7772_v28  ;;  %5013 = vmatprep.mubr.msk.f32.mxu1 %vm6624_vm8, %v7772_v28 }
 0x681   :  { %6027 = vmatpush3.bf16.msra.mxu0 %v6926_v24  ;;  %6051 = vmatpush3.bf16.msra.mxu1 %v6928_v25 }
 0x682   :  { %6028 = vmatprep.subr.bf16.mxu0 %v7771_v9  ;;  %6052 = vmatprep.subr.bf16.mxu1 %v7771_v9 }
 0x685   :  { %6030 = vmatpush3.bf16.msra.mxu0 %v6938_v30  ;;  %6054 = vmatpush3.bf16.msra.mxu1 %v6940_v33 }
 0x686   :  { %6031 = vmatprep.subr.bf16.mxu0 %v7771_v9  ;;  %6055 = vmatprep.subr.bf16.mxu1 %v7771_v9 }
 0x689   :  { %6033 = vmatpush3.bf16.msra.mxu0 %v6946_v41  ;;  %6057 = vmatpush3.bf16.msra.mxu1 %v6948_v42 }
 0x68a   :  { %6034 = vmatprep.subr.bf16.mxu0 %v7771_v9  ;;  %6058 = vmatprep.subr.bf16.mxu1 %v7771_v9 }
 0x68d   :  { %6036 = vmatpush3.bf16.msra.mxu0 %v6954_v47  ;;  %6060 = vmatpush3.bf16.msra.mxu1 %v6956_v51 }
 0x68e   :  { %6037 = vmatprep.subr.bf16.mxu0 %v7771_v9  ;;  %6061 = vmatprep.subr.bf16.mxu1 %v7771_v9 }
 0x691   :  { %6039 = vmatpush3.bf16.msra.mxu0 %v6962_v59  ;;  %6063 = vmatpush3.bf16.msra.mxu1 %v6964_v60 }
 0x692   :  { %6040 = vmatprep.subr.bf16.mxu0 %v7771_v9  ;;  %6064 = vmatprep.subr.bf16.mxu1 %v7771_v9 }
 0x695   :  { %6042 = vmatpush3.bf16.msra.mxu0 %v6970_v3  ;;  %6066 = vmatpush3.bf16.msra.mxu1 %v6972_v8 }
 0x696   :  { %6043 = vmatprep.subr.bf16.mxu0 %v7771_v9  ;;  %6067 = vmatprep.subr.bf16.mxu1 %v7771_v9 }
 0x699   :  { %6045 = vmatpush3.bf16.msra.mxu0 %v6978_v15  ;;  %6069 = vmatpush3.bf16.msra.mxu1 %v6980_v16 }
 0x69a   :  { %6070 = vmatprep.subr.bf16.mxu0 %v7771_v9  ;;  %6094 = vmatprep.subr.bf16.mxu1 %v7771_v9 }
 0x69c   :  { %4979 = vmatmul.mubr.f32.vlgmr.msra.gmra.mrb[40].mxu0 %v2393_v45  ;;  %5014 = vmatmul.mubr.f32.vlgmr.msra.gmra.mrb[40].mxu1 %v2393_v45 }
 0x69d   :  { %6072 = vmatpush3.bf16.msra.mxu0 %v6840_v31  ;;  %6096 = vmatpush3.bf16.msra.mxu1 %v6842_v32 }
 0x69e   :  { %6073 = vmatprep.subr.bf16.mxu0 %v7771_v9  ;;  %6097 = vmatprep.subr.bf16.mxu1 %v7771_v9 }
 0x69f   :  { %5048 = vmatprep.mubr.msk.f32.mxu0 %vm6624_vm8, %v7772_v28  ;;  %5083 = vmatprep.mubr.msk.f32.mxu1 %vm6624_vm8, %v7772_v28 }
 0x6a1   :  { %6075 = vmatpush3.bf16.msra.mxu0 %v6856_v38  ;;  %6099 = vmatpush3.bf16.msra.mxu1 %v6858_v39 }
 0x6a2   :  { %6076 = vmatprep.subr.bf16.mxu0 %v7771_v9  ;;  %6100 = vmatprep.subr.bf16.mxu1 %v7771_v9 }
 0x6a5   :  { %6078 = vmatpush3.bf16.msra.mxu0 %v6868_v54  ;;  %6102 = vmatpush3.bf16.msra.mxu1 %v6870_v5 }
 0x6a6   :  { %6079 = vmatprep.subr.bf16.mxu0 %v7771_v9  ;;  %6103 = vmatprep.subr.bf16.mxu1 %v7771_v9 }
 0x6a9   :  { %6081 = vmatpush3.bf16.msra.mxu0 %v6876_v48  ;;  %6105 = vmatpush3.bf16.msra.mxu1 %v6878_v50 }
 0x6aa   :  { %6082 = vmatprep.subr.bf16.mxu0 %v7771_v9  ;;  %6106 = vmatprep.subr.bf16.mxu1 %v7771_v9 }
 0x6ad   :  { %6084 = vmatpush3.bf16.msra.mxu0 %v6884_v56  ;;  %6108 = vmatpush3.bf16.msra.mxu1 %v6886_v57 }
 0x6ae   :  { %6085 = vmatprep.subr.bf16.mxu0 %v7771_v9  ;;  %6109 = vmatprep.subr.bf16.mxu1 %v7771_v9 }
 0x6b1   :  { %6087 = vmatpush3.bf16.msra.mxu0 %v6892_v62  ;;  %6111 = vmatpush3.bf16.msra.mxu1 %v6894_v63 }
 0x6b2   :  { %6088 = vmatprep.subr.bf16.mxu0 %v7771_v9  ;;  %6112 = vmatprep.subr.bf16.mxu1 %v7771_v9 }
 0x6b5   :  { %6090 = vmatpush3.bf16.msra.mxu0 %v6900_v4  ;;  %6114 = vmatpush3.bf16.msra.mxu1 %v6902_v7 }
 0x6b6   :  { %6091 = vmatprep.subr.bf16.mxu0 %v7771_v9  ;;  %6115 = vmatprep.subr.bf16.mxu1 %v7771_v9 }
 0x6b9   :  { %6093 = vmatpush3.bf16.msra.mxu0 %v6908_v12  ;;  %6117 = vmatpush3.bf16.msra.mxu1 %v6910_v13 }
 0x6ba   :  { %6118 = vmatprep.subr.bf16.mxu0 %v7771_v9  ;;  %6142 = vmatprep.subr.bf16.mxu1 %v7771_v9 }
 0x74f   :  { %v2467_v0 = vpop.f32.mrb[38].mxu0  ;;  %v2538_v52 = vpop.f32.mrb[38].mxu1 }
 0x750   :  { %v2471_v43 = vadd.f32 %v2467_v0, %v7787_v55  ;;  %v2542_v26 = vadd.f32 %v2538_v52, %v7788_v2  ;;  %v4910_v49 = vpop.f32.mrb[39].mxu0  ;;  %v4945_v40 = vpop.f32.mrb[39].mxu1 }
 0x751   :  { %v7794_v40 = vld [vmem:[#allocation38_spill] sm:$0xff] }
 0x752   :  { %v3589_v46 = vmul.f32 -1.442695, %v2542_v26  ;;  %v3588_v53 = vmul.f32 -1.442695, %v2471_v43 }
 0x754   :  { %6423 = vpow2.f32 %v3589_v46 }
 0x755   :  { %6425 = vpow2.f32 %v3588_v53 }
 0x75e   :  { %v6424_v61 = vpop.eup %6423 }
 0x75f   :  { %v6426_v21 = vpop.eup %6425  ;;  %v2694_v23 = vadd.f32 1.0, %v6424_v61 }
 0x760   :  { %v2688_v35 = vadd.f32 1.0, %v6426_v21 }
 0x761   :  { %6427 = vrcp.f32 %v2694_v23 }
 0x762   :  { %6429 = vrcp.f32 %v2688_v35 }
 0x76b   :  { %v6428_v34 = vpop.eup %6427 }
 0x76c   :  { %v6430_v58 = vpop.eup %6429  ;;  %v2704_v14 = vmul.f32 %v6428_v34, %v7485_v11  ;;  %v7793_v11 = vld [vmem:[#allocation36_spill] sm:$0xff]  ;;  %v3366_v34 = vld [vmem:[#allocation11 + $0x58] sm:$0xff] }
 0x76f   :  { %v2609_v29 = vpop.f32.mrb[40].mxu0  ;;  %v2680_v36 = vpop.f32.mrb[40].mxu1 }
 0x770   :  { %v2613_v10 = vadd.f32 %v2609_v29, %v7789_v17  ;;  %v2684_v6 = vadd.f32 %v2680_v36, %v7790_v37  ;;  %v4980_v44 = vpop.f32.mrb[41].mxu0  ;;  %v5015_v20 = vpop.f32.mrb[41].mxu1 }
 0x772   :  { %6431 = vtanh.f32 %v2613_v10  ;;  %v3590_v22 = vmul.f32 -1.442695, %v2684_v6 }
 0x774   :  { %6433 = vpow2.f32 %v3590_v22 }
 0x77c   :  { %v6432_v1 = vpop.eup %6431 }
 0x77d   :  { %v2705_v45 = vmul.f32 %v6432_v1, %v6430_v58  ;;  %v3367_v58 = vld [vmem:[#allocation11 + $0x60] sm:$0xff]  ;;  %v3368_v1 = vld [vmem:[#allocation11 + $0x68] sm:$0xff] }
 0x77e   :  { %v6434_v0 = vpop.eup %6433 }
 0x77f   :  { %v7565_v52 = vadd.f32 %v2705_v45, %v2704_v14  ;;  %v2700_v55 = vadd.f32 1.0, %v6434_v0  ;;  %v6281_v14 = vpack.c.bf16 %v3368_v1, %v3367_v58  ;;  %v3369_v45 = vld [vmem:[#allocation11 + $0x70] sm:$0xff]  ;;  %v3370_v0 = vld [vmem:[#allocation11 + $0x78] sm:$0xff] }
 0x781   :  { %6435 = vtanh.f32 %v7565_v52 }
 0x782   :  { %6437 = vrcp.f32 %v2700_v55  ;;  %v3339_v55 = vld [vmem:[#allocation9] sm:$0xff] }
 0x78b   :  { %v6436_v43 = vpop.eup %6435 }
 0x78c   :  { %v6438_v2 = vpop.eup %6437 }
 0x78d   :  { %v2708_v26 = vmul.f32 %v6438_v2, %v6436_v43  ;;  %v3340_v43 = vld [vmem:[#allocation9 + $0x8] sm:$0xff] }
 0x78e   :  { %v6287_v2 = vpack.c.bf16 %v3340_v43, %v3339_v55 }
 0x78f   :  { %5049 = vmatmul.mubr.f32.vlgmr.msra.gmra.mrb[42].mxu0 %v2708_v26  ;;  %5084 = vmatmul.mubr.f32.vlgmr.msra.gmra.mrb[42].mxu1 %v2708_v26 }
 0x790   :  { %6120 = vmatpush3.bf16.msra.mxu0 %v6916_v18  ;;  %6144 = vmatpush3.bf16.msra.mxu1 %v6918_v19 }
 0x791   :  { %6121 = vmatprep.subr.bf16.mxu0 %v7771_v9  ;;  %6145 = vmatprep.subr.bf16.mxu1 %v7771_v9 }
 0x792   :  { %5118 = vmatprep.mubr.msk.f32.mxu0 %vm6624_vm8, %v7772_v28  ;;  %5153 = vmatprep.mubr.msk.f32.mxu1 %vm6624_vm8, %v7772_v28 }
 0x794   :  { %6123 = vmatpush3.bf16.msra.mxu0 %v6926_v24  ;;  %6147 = vmatpush3.bf16.msra.mxu1 %v6928_v25 }
 0x795   :  { %6124 = vmatprep.subr.bf16.mxu0 %v7771_v9  ;;  %6148 = vmatprep.subr.bf16.mxu1 %v7771_v9 }
 0x798   :  { %6126 = vmatpush3.bf16.msra.mxu0 %v6938_v30  ;;  %6150 = vmatpush3.bf16.msra.mxu1 %v6940_v33 }
 0x799   :  { %6127 = vmatprep.subr.bf16.mxu0 %v7771_v9  ;;  %6151 = vmatprep.subr.bf16.mxu1 %v7771_v9 }
 0x79c   :  { %6129 = vmatpush3.bf16.msra.mxu0 %v6946_v41  ;;  %6153 = vmatpush3.bf16.msra.mxu1 %v6948_v42 }
 0x79d   :  { %6130 = vmatprep.subr.bf16.mxu0 %v7771_v9  ;;  %6154 = vmatprep.subr.bf16.mxu1 %v7771_v9 }
 0x7a0   :  { %6132 = vmatpush3.bf16.msra.mxu0 %v6954_v47  ;;  %6156 = vmatpush3.bf16.msra.mxu1 %v6956_v51 }
 0x7a1   :  { %6133 = vmatprep.subr.bf16.mxu0 %v7771_v9  ;;  %6157 = vmatprep.subr.bf16.mxu1 %v7771_v9 }
 0x7a4   :  { %6135 = vmatpush3.bf16.msra.mxu0 %v6962_v59  ;;  %6159 = vmatpush3.bf16.msra.mxu1 %v6964_v60 }
 0x7a5   :  { %6136 = vmatprep.subr.bf16.mxu0 %v7771_v9  ;;  %6160 = vmatprep.subr.bf16.mxu1 %v7771_v9 }
 0x7a8   :  { %6138 = vmatpush3.bf16.msra.mxu0 %v6970_v3  ;;  %6162 = vmatpush3.bf16.msra.mxu1 %v6972_v8 }
 0x7a9   :  { %6139 = vmatprep.subr.bf16.mxu0 %v7771_v9  ;;  %6163 = vmatprep.subr.bf16.mxu1 %v7771_v9 }
 0x7ac   :  { %6141 = vmatpush3.bf16.msra.mxu0 %v6978_v15  ;;  %6165 = vmatpush3.bf16.msra.mxu1 %v6980_v16 }
 0x7ad   :  { %6166 = vmatprep.subr.bf16.mxu0 %v7771_v9  ;;  %6190 = vmatprep.subr.bf16.mxu1 %v7771_v9 }
 0x7af   :  { %5119 = vmatmul.mubr.f32.vlgmr.msra.gmra.mrb[44].mxu0 %v2708_v26  ;;  %5154 = vmatmul.mubr.f32.vlgmr.msra.gmra.mrb[44].mxu1 %v2708_v26  ;;  %v3341_v26 = vld [vmem:[#allocation9 + $0x10] sm:$0xff] }
 0x7b0   :  { %6168 = vmatpush3.bf16.msra.mxu0 %v6840_v31  ;;  %6192 = vmatpush3.bf16.msra.mxu1 %v6842_v32 }
 0x7b1   :  { %6169 = vmatprep.subr.bf16.mxu0 %v7771_v9  ;;  %6193 = vmatprep.subr.bf16.mxu1 %v7771_v9 }
 0x7b2   :  { %5188 = vmatprep.mubr.msk.f32.mxu0 %vm6624_vm8, %v7772_v28  ;;  %5223 = vmatprep.mubr.msk.f32.mxu1 %vm6624_vm8, %v7772_v28 }
 0x7b4   :  { %6171 = vmatpush3.bf16.msra.mxu0 %v6856_v38  ;;  %6195 = vmatpush3.bf16.msra.mxu1 %v6858_v39  ;;  %v7791_v38 = vld [vmem:[#allocation35_spill] sm:$0xff] }
 0x7b5   :  { %6172 = vmatprep.subr.bf16.mxu0 %v7771_v9  ;;  %6196 = vmatprep.subr.bf16.mxu1 %v7771_v9 }
 0x7b8   :  { %6174 = vmatpush3.bf16.msra.mxu0 %v6868_v54  ;;  %6198 = vmatpush3.bf16.msra.mxu1 %v6870_v5  ;;  %v7792_v54 = vld [vmem:[#allocation37_spill] sm:$0xff] }
 0x7b9   :  { %6175 = vmatprep.subr.bf16.mxu0 %v7771_v9  ;;  %6199 = vmatprep.subr.bf16.mxu1 %v7771_v9 }
 0x7bc   :  { %6177 = vmatpush3.bf16.msra.mxu0 %v6876_v48  ;;  %6201 = vmatpush3.bf16.msra.mxu1 %v6878_v50 }
 0x7bd   :  { %6178 = vmatprep.subr.bf16.mxu0 %v7771_v9  ;;  %6202 = vmatprep.subr.bf16.mxu1 %v7771_v9 }
 0x7c0   :  { %6180 = vmatpush3.bf16.msra.mxu0 %v6884_v56  ;;  %6204 = vmatpush3.bf16.msra.mxu1 %v6886_v57 }
 0x7c1   :  { %6181 = vmatprep.subr.bf16.mxu0 %v7771_v9  ;;  %6205 = vmatprep.subr.bf16.mxu1 %v7771_v9 }
 0x7c4   :  { %6183 = vmatpush3.bf16.msra.mxu0 %v6892_v62  ;;  %6207 = vmatpush3.bf16.msra.mxu1 %v6894_v63 }
 0x7c5   :  { %6184 = vmatprep.subr.bf16.mxu0 %v7771_v9  ;;  %6208 = vmatprep.subr.bf16.mxu1 %v7771_v9 }
 0x7c8   :  { %6186 = vmatpush3.bf16.msra.mxu0 %v6900_v4  ;;  %6210 = vmatpush3.bf16.msra.mxu1 %v6902_v7 }
 0x7c9   :  { %6187 = vmatprep.subr.bf16.mxu0 %v7771_v9  ;;  %6211 = vmatprep.subr.bf16.mxu1 %v7771_v9 }
 0x7cc   :  { %6189 = vmatpush3.bf16.msra.mxu0 %v6908_v12  ;;  %6213 = vmatpush3.bf16.msra.mxu1 %v6910_v13 }
 0x7cd   :  { %6214 = vmatprep.subr.bf16.mxu0 %v7771_v9  ;;  %6238 = vmatprep.subr.bf16.mxu1 %v7771_v9 }
 0x862   :  { %v2782_v31 = vpop.f32.mrb[42].mxu0  ;;  %v2853_v32 = vpop.f32.mrb[42].mxu1 }
 0x863   :  { %v2786_v39 = vadd.f32 %v2782_v31, %v7791_v38  ;;  %v2857_v5 = vadd.f32 %v2853_v32, %v7792_v54  ;;  %v5050_v48 = vpop.f32.mrb[43].mxu0  ;;  %v5085_v50 = vpop.f32.mrb[43].mxu1  ;;  %v3342_v31 = vld [vmem:[#allocation9 + $0x18] sm:$0xff]  ;;  %v3343_v38 = vld [vmem:[#allocation9 + $0x20] sm:$0xff] }
 0x864   :  { %v6290_v32 = vpack.c.bf16 %v3342_v31, %v3341_v26  ;;  %v3347_v50 = vld [vmem:[#allocation9 + $0x40] sm:$0xff] }
 0x865   :  { %v3592_v56 = vmul.f32 -1.442695, %v2857_v5  ;;  %v3591_v57 = vmul.f32 -1.442695, %v2786_v39  ;;  %v3344_v39 = vld [vmem:[#allocation9 + $0x28] sm:$0xff]  ;;  %v3345_v5 = vld [vmem:[#allocation9 + $0x30] sm:$0xff] }
 0x866   :  { %v6293_v54 = vpack.c.bf16 %v3344_v39, %v3343_v38 }
 0x867   :  { %6439 = vpow2.f32 %v3592_v56  ;;  %v3348_v56 = vld [vmem:[#allocation9 + $0x48] sm:$0xff] }
 0x868   :  { %6441 = vpow2.f32 %v3591_v57  ;;  %v6299_v57 = vpack.c.bf16 %v3348_v56, %v3347_v50 }
 0x871   :  { %v6440_v62 = vpop.eup %6439 }
 0x872   :  { %v6442_v63 = vpop.eup %6441  ;;  %v3009_v4 = vadd.f32 1.0, %v6440_v62  ;;  %v3349_v62 = vld [vmem:[#allocation9 + $0x50] sm:$0xff] }
 0x873   :  { %v3003_v7 = vadd.f32 1.0, %v6442_v63  ;;  %v3350_v63 = vld [vmem:[#allocation9 + $0x58] sm:$0xff] }
 0x874   :  { %6443 = vrcp.f32 %v3009_v4  ;;  %v6302_v4 = vpack.c.bf16 %v3350_v63, %v3349_v62 }
 0x875   :  { %6445 = vrcp.f32 %v3003_v7  ;;  %v3351_v7 = vld [vmem:[#allocation9 + $0x60] sm:$0xff] }
 0x87e   :  { %v6444_v23 = vpop.eup %6443 }
 0x87f   :  { %v6446_v35 = vpop.eup %6445  ;;  %v3019_v36 = vmul.f32 %v6444_v23, %v7565_v52  ;;  %v6284_v52 = vpack.c.bf16 %v3370_v0, %v3369_v45  ;;  %v7796_v23 = vld [vmem:[#allocation41_spill] sm:$0xff] }
 0x880   :  { %v3597_v0 = vld [vmem:[%s7731_s8] ss:$0 sm:$0xff] }
 0x882   :  { %v2924_v12 = vpop.f32.mrb[44].mxu0  ;;  %v2995_v13 = vpop.f32.mrb[44].mxu1 }
 0x883   :  { %v2928_v49 = vadd.f32 %v2924_v12, %v7793_v11  ;;  %v2999_v46 = vadd.f32 %v2995_v13, %v7794_v40  ;;  %v5120_v53 = vpop.f32.mrb[45].mxu0  ;;  %v5155_v61 = vpop.f32.mrb[45].mxu1  ;;  %v3352_v12 = vld [vmem:[#allocation9 + $0x68] sm:$0xff]  ;;  %v3353_v11 = vld [vmem:[#allocation9 + $0x70] sm:$0xff] }
 0x884   :  { %v6305_v13 = vpack.c.bf16 %v3352_v12, %v3351_v7  ;;  %v7795_v61 = vld [vmem:[#allocation39_spill] sm:$0xff] }
 0x885   :  { %6447 = vtanh.f32 %v2928_v49  ;;  %v3593_v21 = vmul.f32 -1.442695, %v2999_v46  ;;  %v3354_v49 = vld [vmem:[#allocation9 + $0x78] sm:$0xff] }
 0x886   :  { %v6308_v40 = vpack.c.bf16 %v3354_v49, %v3353_v11 }
 0x887   :  { %6449 = vpow2.f32 %v3593_v21 }
 0x88f   :  { %v6448_v29 = vpop.eup %6447 }
 0x890   :  { %v3020_v17 = vmul.f32 %v6448_v29, %v6446_v35 }
 0x891   :  { %v6450_v10 = vpop.eup %6449 }
 0x892   :  { %v7645_v37 = vadd.f32 %v3020_v17, %v3019_v36  ;;  %v3015_v6 = vadd.f32 1.0, %v6450_v10 }
 0x894   :  { %6451 = vtanh.f32 %v7645_v37 }
 0x895   :  { %6453 = vrcp.f32 %v3015_v6 }
 0x89e   :  { %v6452_v44 = vpop.eup %6451 }
 0x89f   :  { %v6454_v20 = vpop.eup %6453 }
 0x8a0   :  { %v3023_v22 = vmul.f32 %v6454_v20, %v6452_v44 }
 0x8a2   :  { %5189 = vmatmul.mubr.f32.vlgmr.msra.gmra.mrb[46].mxu0 %v3023_v22  ;;  %5224 = vmatmul.mubr.f32.vlgmr.msra.gmra.mrb[46].mxu1 %v3023_v22 }
 0x8a3   :  { %6216 = vmatpush3.bf16.msra.mxu0 %v6916_v18  ;;  %6240 = vmatpush3.bf16.msra.mxu1 %v6918_v19  ;;  %v3355_v18 = vld [vmem:[#allocation11] sm:$0xff]  ;;  %v3356_v19 = vld [vmem:[#allocation11 + $0x8] sm:$0xff] }
 0x8a4   :  { %6217 = vmatprep.subr.bf16.mxu0 %v7771_v9  ;;  %6241 = vmatprep.subr.bf16.mxu1 %v7771_v9 }
 0x8a5   :  { %5258 = vmatprep.mubr.msk.f32.mxu0 %vm6624_vm8, %v7772_v28  ;;  %5293 = vmatprep.mubr.msk.f32.mxu1 %vm6624_vm8, %v7772_v28 }
 0x8a7   :  { %6219 = vmatpush3.bf16.msra.mxu0 %v6926_v24  ;;  %6243 = vmatpush3.bf16.msra.mxu1 %v6928_v25  ;;  %v6263_v24 = vpack.c.bf16 %v3356_v19, %v3355_v18  ;;  %v3357_v25 = vld [vmem:[#allocation11 + $0x10] sm:$0xff] }
 0x8a8   :  { %6220 = vmatprep.subr.bf16.mxu0 %v7771_v9  ;;  %6244 = vmatprep.subr.bf16.mxu1 %v7771_v9 }
 0x8ab   :  { %6222 = vmatpush3.bf16.msra.mxu0 %v6938_v30  ;;  %6246 = vmatpush3.bf16.msra.mxu1 %v6940_v33  ;;  %v3358_v30 = vld [vmem:[#allocation11 + $0x18] sm:$0xff] }
 0x8ac   :  { %6223 = vmatprep.subr.bf16.mxu0 %v7771_v9  ;;  %6247 = vmatprep.subr.bf16.mxu1 %v7771_v9  ;;  %v6266_v33 = vpack.c.bf16 %v3358_v30, %v3357_v25  ;;  %v7798_v25 = vld [vmem:[#allocation42_spill] sm:$0xff] }
 0x8af   :  { %6225 = vmatpush3.bf16.msra.mxu0 %v6946_v41  ;;  %6249 = vmatpush3.bf16.msra.mxu1 %v6948_v42  ;;  %v3359_v41 = vld [vmem:[#allocation11 + $0x20] sm:$0xff]  ;;  %v3360_v42 = vld [vmem:[#allocation11 + $0x28] sm:$0xff] }
 0x8b0   :  { %6226 = vmatprep.subr.bf16.mxu0 %v7771_v9  ;;  %6250 = vmatprep.subr.bf16.mxu1 %v7771_v9 }
 0x8b3   :  { %6228 = vmatpush3.bf16.msra.mxu0 %v6954_v47  ;;  %6252 = vmatpush3.bf16.msra.mxu1 %v6956_v51  ;;  %v6269_v47 = vpack.c.bf16 %v3360_v42, %v3359_v41  ;;  %v3361_v51 = vld [vmem:[#allocation11 + $0x30] sm:$0xff] }
 0x8b4   :  { %6229 = vmatprep.subr.bf16.mxu0 %v7771_v9  ;;  %6253 = vmatprep.subr.bf16.mxu1 %v7771_v9 }
 0x8b7   :  { %6231 = vmatpush3.bf16.msra.mxu0 %v6962_v59  ;;  %6255 = vmatpush3.bf16.msra.mxu1 %v6964_v60  ;;  %v3362_v59 = vld [vmem:[#allocation11 + $0x38] sm:$0xff] }
 0x8b8   :  { %6232 = vmatprep.subr.bf16.mxu0 %v7771_v9  ;;  %6256 = vmatprep.subr.bf16.mxu1 %v7771_v9  ;;  %v6272_v60 = vpack.c.bf16 %v3362_v59, %v3361_v51 }
 0x8bb   :  { %6234 = vmatpush3.bf16.msra.mxu0 %v6970_v3  ;;  %6258 = vmatpush3.bf16.msra.mxu1 %v6972_v8  ;;  %v3363_v3 = vld [vmem:[#allocation11 + $0x40] sm:$0xff]  ;;  %v3364_v8 = vld [vmem:[#allocation11 + $0x48] sm:$0xff] }
 0x8bc   :  { %6235 = vmatprep.subr.bf16.mxu0 %v7771_v9  ;;  %6259 = vmatprep.subr.bf16.mxu1 %v7771_v9 }
 0x8bf   :  { %6237 = vmatpush3.bf16.msra.mxu0 %v6978_v15  ;;  %6261 = vmatpush3.bf16.msra.mxu1 %v6980_v16  ;;  %v6275_v15 = vpack.c.bf16 %v3364_v8, %v3363_v3  ;;  %v3365_v16 = vld [vmem:[#allocation11 + $0x50] sm:$0xff] }
 0x8c0   :  { %6262 = vmatprep.subr.bf16.mxu0 %v7771_v9  ;;  %6286 = vmatprep.subr.bf16.mxu1 %v7771_v9 }
 0x8c2   :  { %5259 = vmatmul.mubr.f32.vlgmr.msra.gmra.mrb[48].mxu0 %v3023_v22  ;;  %5294 = vmatmul.mubr.f32.vlgmr.msra.gmra.mrb[48].mxu1 %v3023_v22 }
 0x8c3   :  { %6264 = vmatpush3.bf16.msra.mxu0 %v6263_v24  ;;  %5328 = vmatprep.mubr.msk.f32.mxu0 %vm6624_vm8, %v7772_v28 }
 0x8c4   :  { %6265 = vmatprep.subr.bf16.mxu0 %v7771_v9  ;;  %5363 = vmatprep.mubr.msk.f32.mxu1 %vm6624_vm8, %v7772_v28  ;;  %v6278_v28 = vpack.c.bf16 %v3366_v34, %v3365_v16 }
 0x8c5   :  { %6288 = vmatpush3.bf16.msra.mxu1 %v6287_v2 }
 0x8c6   :  { %6289 = vmatprep.subr.bf16.mxu1 %v7771_v9 }
 0x8c7   :  { %6267 = vmatpush3.bf16.msra.mxu0 %v6266_v33 }
 0x8c8   :  { %6268 = vmatprep.subr.bf16.mxu0 %v7771_v9 }
 0x8c9   :  { %6291 = vmatpush3.bf16.msra.mxu1 %v6290_v32 }
 0x8ca   :  { %6292 = vmatprep.subr.bf16.mxu1 %v7771_v9 }
 0x8cb   :  { %6270 = vmatpush3.bf16.msra.mxu0 %v6269_v47 }
 0x8cc   :  { %6271 = vmatprep.subr.bf16.mxu0 %v7771_v9 }
 0x8cd   :  { %6294 = vmatpush3.bf16.msra.mxu1 %v6293_v54 }
 0x8ce   :  { %6295 = vmatprep.subr.bf16.mxu1 %v7771_v9 }
 0x8cf   :  { %6273 = vmatpush3.bf16.msra.mxu0 %v6272_v60 }
 0x8d0   :  { %6274 = vmatprep.subr.bf16.mxu0 %v7771_v9 }
 0x8d3   :  { %6276 = vmatpush3.bf16.msra.mxu0 %v6275_v15 }
 0x8d4   :  { %6277 = vmatprep.subr.bf16.mxu0 %v7771_v9 }
 0x8d7   :  { %6279 = vmatpush3.bf16.msra.mxu0 %v6278_v28 }
 0x8d8   :  { %6280 = vmatprep.subr.bf16.mxu0 %v7771_v9 }
 0x8db   :  { %6282 = vmatpush3.bf16.msra.mxu0 %v6281_v14 }
 0x8dc   :  { %6283 = vmatprep.subr.bf16.mxu0 %v7771_v9 }
 0x8df   :  { %6285 = vmatpush3.bf16.msra.mxu0 %v6284_v52 }
 0x8e2   :  { %5329 = vmatmul.mubr.f32.vlgmr.msra.gmra.mrb[50].mxu0 %v7159_v27  ;;  %v3346_v27 = vld [vmem:[#allocation9 + $0x38] sm:$0xff] }
 0x8e3   :  { %v6296_v48 = vpack.c.bf16 %v3346_v27, %v3345_v5 }
 0x8e5   :  { %6297 = vmatpush3.bf16.msra.mxu1 %v6296_v48 }
 0x8e6   :  { %6298 = vmatprep.subr.bf16.mxu1 %v7771_v9 }
 0x8e9   :  { %6300 = vmatpush3.bf16.msra.mxu1 %v6299_v57 }
 0x8ea   :  { %6301 = vmatprep.subr.bf16.mxu1 %v7771_v9 }
 0x8ed   :  { %6303 = vmatpush3.bf16.msra.mxu1 %v6302_v4 }
 0x8ee   :  { %6304 = vmatprep.subr.bf16.mxu1 %v7771_v9 }
 0x8f1   :  { %6306 = vmatpush3.bf16.msra.mxu1 %v6305_v13 }
 0x8f2   :  { %6307 = vmatprep.subr.bf16.mxu1 %v7771_v9  ;;  %v7797_v9 = vld [vmem:[#allocation40_spill] sm:$0xff] }
 0x8f5   :  { %6309 = vmatpush3.bf16.msra.mxu1 %v6308_v40 }
 0x975   :  { %v3097_v46 = vpop.f32.mrb[46].mxu0  ;;  %v3168_v53 = vpop.f32.mrb[46].mxu1 }
 0x976   :  { %v3101_v21 = vadd.f32 %v3097_v46, %v7795_v61  ;;  %v3172_v35 = vadd.f32 %v3168_v53, %v7796_v23  ;;  %v5190_v29 = vpop.f32.mrb[47].mxu0  ;;  %v5225_v36 = vpop.f32.mrb[47].mxu1 }
 0x978   :  { %v3595_v17 = vmul.f32 -1.442695, %v3172_v35  ;;  %v3594_v10 = vmul.f32 -1.442695, %v3101_v21 }
 0x97a   :  { %6455 = vpow2.f32 %v3595_v17 }
 0x97b   :  { %6457 = vpow2.f32 %v3594_v10 }
 0x984   :  { %v6456_v6 = vpop.eup %6455 }
 0x985   :  { %v6458_v44 = vpop.eup %6457  ;;  %v3324_v20 = vadd.f32 1.0, %v6456_v6 }
 0x986   :  { %v3318_v22 = vadd.f32 1.0, %v6458_v44 }
 0x987   :  { %6459 = vrcp.f32 %v3324_v20 }
 0x988   :  { %6461 = vrcp.f32 %v3318_v22 }
 0x991   :  { %v6460_v47 = vpop.eup %6459 }
 0x992   :  { %v6462_v51 = vpop.eup %6461  ;;  %v3334_v60 = vmul.f32 %v6460_v47, %v7645_v37 }
 0x995   :  { %v3239_v18 = vpop.f32.mrb[48].mxu0  ;;  %v3310_v19 = vpop.f32.mrb[48].mxu1 }
 0x996   :  { %v3243_v24 = vadd.f32 %v3239_v18, %v7797_v9  ;;  %v3314_v30 = vadd.f32 %v3310_v19, %v7798_v25  ;;  %v5260_v33 = vpop.f32.mrb[49].mxu0  ;;  %v5295_v41 = vpop.f32.mrb[49].mxu1 }
 0x998   :  { %6463 = vtanh.f32 %v3243_v24  ;;  %v3596_v42 = vmul.f32 -1.442695, %v3314_v30 }
 0x99a   :  { %6465 = vpow2.f32 %v3596_v42 }
 0x9a2   :  { %v6464_v59 = vpop.eup %6463 }
 0x9a3   :  { %v3335_v3 = vmul.f32 %v6464_v59, %v6462_v51 }
 0x9a4   :  { %v6466_v8 = vpop.eup %6465 }
 0x9a5   :  { %v3336_v15 = vadd.f32 %v3335_v3, %v3334_v60  ;;  %v3330_v16 = vadd.f32 1.0, %v6466_v8 }
 0x9a7   :  { %6467 = vtanh.f32 %v3336_v15 }
 0x9a8   :  { %6469 = vrcp.f32 %v3330_v16 }
 0x9b1   :  { %v6468_v34 = vpop.eup %6467 }
 0x9b2   :  { %v6470_v28 = vpop.eup %6469 }
 0x9b3   :  { %v3338_v58 = vmul.f32 %v6470_v28, %v6468_v34 }
 0x9b5   :  { %5364 = vmatmul.mubr.f32.vlgmr.msra.gmra.mrb[50].mxu1 %v3338_v58  ;;  %v3437_v1 = vpop.f32.mrb[50].mxu0 }
 0x9b6   :  { %v5330_v14 = vpop.f32.mrb[51].mxu0 }
 0xa88   :  { %v3507_v45 = vpop.f32.mrb[50].mxu1 }
 0xa89   :  { %v3508_v37 = vadd.f32 %v3507_v45, %v3437_v1  ;;  %v5365_v52 = vpop.f32.mrb[51].mxu1 }
 0xa8b   :  { %v3518_v55 = vadd.f32 %v3597_v0, %v3508_v37 }
 0xa8d   :  { %3519 = vst [vmem:[#allocation12] sm:$0xff] %v3518_v55 }
 0xa8e   :  { %6592 = shalt.err (!%p6589_p2)
}
 0xa8f   :  { %s6593_s4 = scalar_lea.hbm %s7732_s9, 128 }
 0xa90   :  { %p6594_p3 = scmp.ne.s32.totalorder %s7732_s9, %s6593_s4  ;;  %p6597_p4 = scmp.lt.u32.totalorder %s6593_s4, %s7732_s9 }
 0xa92   :  { %p6599_p5 = pnand %p6597_p4, %p6594_p3 }
 0xa94   :  { %6602 = shalt.err (!%p6599_p5)
}
 0xa95   :  { %3529 = dma.vmem_to_hbm [thread:$0]  %s3527_s6, 128, %s7732_s9, [#allocation5]  }
 0xa96   :  { %6609 = dma.done.wait [#allocation5], 128  }
 0xa97   :  { %6610 = vsyncadd [#allocation5], 4294967168 }
 0xa98   :  { %3533 = vsyncpa [#allocation4], 1 }
 0xa99   :  { %3534 = vsyncpa [#allocation7], 1 }
 0xa9a   :  { %3535 = vsyncpa [#allocation10], 1 }
 0xa9b   :  { %3536 = vsyncpa [#allocation5], 1 }

</bundles_post_ra>
